<compile_context>
chip_gen: v5e
topology: v5e:2x2
jax: 0.10.0
libtpu: 0.0.40
codegen_flags: <defaults>
</compile_context>

<pallas_src>
import numpy as np

import jax
import jax.numpy as jnp
from jax import lax
from jax.experimental import pallas as pl
from jax.experimental.pallas import tpu as pltpu


# ----------------------------------------------------------------------------
# Static network configuration (matches the PyTorch module instantiation).
# ----------------------------------------------------------------------------
IN_CH, OUT_CH = 4, 2
CHS = (8, 16, 32)
HW = 16                       # input spatial size (H == W)
EPS = 1e-5                    # InstanceNorm eps


# ----------------------------------------------------------------------------
# Host-side (numpy) frame bookkeeping: masks + 0/1 permutation matrices.
# ----------------------------------------------------------------------------
def _stride2_frame(hin):
    """Output frame of a k3/s2/p1 conv fed by mod-2 phase canvases of an
    (hin x hin) input.  Frame row width = phase-canvas width."""
    ho = hin // 2
    wph = hin // 2 + 1
    m = wph * (ho - 1) + ho
    mask = np.zeros((1, m), np.float32)
    coords = []
    for q in range(m):
        a, b = divmod(q, wph)
        if b < ho:
            mask[0, q] = 1.0
            coords.append((q, a, b))
    return ho, wph, m, mask, coords


def _canvas_frame(h):
    """Central frame of the flattened (h+2)x(h+2) zero-bordered canvas."""
    wc = h + 2
    base = wc + 1
    m = wc * (h - 1) + h
    mask = np.zeros((1, m), np.float32)
    coords = []
    for t in range(m):
        i, j = divmod(t + base, wc)
        if 1 <= i <= h and 1 <= j <= h:
            mask[0, t] = 1.0
            coords.append((t, i - 1, j - 1))
    return wc, base, m, mask, coords


def _scatter(coords, m, ncols, col_fn):
    p = np.zeros((m, ncols), np.float32)
    for (q, a, b) in coords:
        p[q, col_fn(a, b)] = 1.0
    return p


# down1: consumes mod-2 phases of zero-padded x (18x18 -> 4 canvases of 9x9).
_H1, _WPH0, _M1, _MASK1, _CO1 = _stride2_frame(HW)                  # 8, 9, 71
_WC1 = _H1 + 2                                                      # 10
_P_D1_CANVAS = _scatter(_CO1, _M1, _WC1 * _WC1,
                        lambda a, b: (a + 1) * _WC1 + (b + 1))
_WPH1 = _H1 // 2 + 1                                                # 5


def _d1_phase_col(a, b):
    r, i = (a + 1) % 2, (a + 1) // 2
    c, j = (b + 1) % 2, (b + 1) // 2
    return (2 * r + c) * (_WPH1 * _WPH1) + i * _WPH1 + j


_P_D1_PHASES = _scatter(_CO1, _M1, 4 * _WPH1 * _WPH1, _d1_phase_col)

# down2 frame (consumes d1 phase canvases, 5x5 each).
_H2, _WPH1B, _M2, _MASK2, _CO2 = _stride2_frame(_H1)                # 4, 5, 19
_WC2 = _H2 + 2                                                      # 6
_P_D2_CANVAS = _scatter(_CO2, _M2, _WC2 * _WC2,
                        lambda a, b: (a + 1) * _WC2 + (b + 1))

# bottom conv / up1 sub-pixel phases: central frame on the 6x6 canvas.
_WC2B, _BASE2, _M3, _MASK3, _CO3 = _canvas_frame(_H2)               # 6, 7, 22
_P_BT_CANVAS = _scatter(_CO3, _M3, _WC2 * _WC2,
                        lambda a, b: (a + 1) * _WC2 + (b + 1))
_P_U1_CANVAS = np.stack([
    _scatter(_CO3, _M3, _WC1 * _WC1,
             lambda a, b, r=r, c=c: (2 * a + r + 1) * _WC1 + (2 * b + c + 1))
    for r in (0, 1) for c in (0, 1)])                                # (4,22,100)

# up2 sub-pixel phases: central frame on the 10x10 canvas -> final 16x16.
_WC1B, _BASE1, _M4, _MASK4, _CO4 = _canvas_frame(_H1)               # 10, 11, 78
_P_OUT = np.stack([
    _scatter(_CO4, _M4, HW * HW,
             lambda a, b, r=r, c=c: (2 * a + r) * HW + (2 * b + c))
    for r in (0, 1) for c in (0, 1)])                                # (4,78,256)

# kh -> (row parity of 2*ho+kh, extra phase-row shift) for s=2 forward convs.
_S2_TAP = ((0, 0), (1, 0), (0, 1))
# ConvTranspose2d(k3,s2,p1,op1) sub-pixel decomposition: output row 2a+r gets
# contributions from (kh, input row a+dh) in _CT_TAPS[r].
_CT_TAPS = (((1, 0),), ((0, 1), (2, 0)))


# ----------------------------------------------------------------------------
# Fused Pallas kernel: the whole UNet forward for one batch element.
# ----------------------------------------------------------------------------
def _unet_kernel(alpha_ref, xph_ref,
                 w1_ref, w2_ref, w3_ref, w4a_ref, w4b_ref, w5a_ref, w5b_ref,
                 b5_ref,
                 mask1_ref, mask2_ref, mask3_ref,
                 pd1c_ref, pd1p_ref, pd2c_ref, pbtc_ref, pu1c_ref, pout_ref,
                 out_ref):
    f32 = jnp.float32
    c1, c2, c3 = CHS

    def instnorm_prelu(raw, mask, count, alpha):
        # InstanceNorm2d(affine=False) + PReLU over the lane (spatial) axis.
        m = raw * mask
        s = jnp.sum(m, axis=-1, keepdims=True)
        ss = jnp.sum(m * m, axis=-1, keepdims=True)
        mean = s / count
        var = ss / count - mean * mean
        y = (raw - mean) * lax.rsqrt(var + EPS)
        return jnp.where(y >= 0.0, y, alpha * y)

    def conv_s2(phases, w_ref, wph, m):
        # k3/s2/p1 conv from mod-2 phase canvases; lane-dense (Cout, m).
        acc = None
        for kh in range(3):
            rh, dh = _S2_TAP[kh]
            for kw in range(3):
                rw, dw = _S2_TAP[kw]
                off = dh * wph + dw
                xs = phases[2 * rh + rw][:, off:off + m]
                d = jnp.dot(w_ref[kh * 3 + kw], xs, preferred_element_type=f32)
                acc = d if acc is None else acc + d
        return acc

    # ---------------- down1: Conv(4->8, s2) + IN + PReLU --------------------
    xph = [xph_ref[0, i] for i in range(4)]                 # 4 x (CIN, 81) bf16
    d1 = conv_s2(xph, w1_ref, _WPH0, _M1)                   # (C1, 71) f32
    d1 = instnorm_prelu(d1, mask1_ref[...], float(_H1 * _H1),
                        alpha_ref[:, 0:1])
    # Exact 0/1 permutation matmuls: frame -> zero-bordered canvas / phases.
    d1_canvas = jnp.dot(d1, pd1c_ref[...], preferred_element_type=f32)
    d1_phases = jnp.dot(d1, pd1p_ref[...], preferred_element_type=f32)
    d1_ph_b = d1_phases.astype(jnp.bfloat16)
    ph_len = _WPH1 * _WPH1
    d1_ph = [d1_ph_b[:, i * ph_len:(i + 1) * ph_len] for i in range(4)]

    # ---------------- down2: Conv(8->16, s2) + IN + PReLU -------------------
    d2 = conv_s2(d1_ph, w2_ref, _WPH1, _M2)                 # (C2, 19)
    d2 = instnorm_prelu(d2, mask2_ref[...], float(_H2 * _H2),
                        alpha_ref[:, 1:2])
    d2_canvas = jnp.dot(d2, pd2c_ref[...], preferred_element_type=f32)
    d2c_b = d2_canvas.astype(jnp.bfloat16)                  # (C2, 36)

    # ---------------- bottom: Conv(16->32, s1) + IN + PReLU -----------------
    bt = None
    for kh in range(3):
        for kw in range(3):
            off = _BASE2 + (kh - 1) * _WC2 + (kw - 1)
            d = jnp.dot(w3_ref[kh * 3 + kw], d2c_b[:, off:off + _M3],
                        preferred_element_type=f32)
            bt = d if bt is None else bt + d
    bt = instnorm_prelu(bt, mask3_ref[...], float(_H2 * _H2),
                        alpha_ref[:, 2:3])
    bt_canvas = jnp.dot(bt, pbtc_ref[...], preferred_element_type=f32)
    btc_b = bt_canvas.astype(jnp.bfloat16)                  # (C3, 36)

    # -------- up1: ConvT(48->8, s2) on cat[d2, bt] + IN + PReLU -------------
    # Sub-pixel decomposition (9 taps across 4 output phases) and fused
    # skip-concat (one dot per concatenated operand per tap).
    mask3 = mask3_ref[...]
    u1_raw = []
    s_acc = jnp.zeros((c1, 1), f32)
    ss_acc = jnp.zeros((c1, 1), f32)
    for r in range(2):
        for c in range(2):
            acc = None
            for kh, dh in _CT_TAPS[r]:
                for kw, dw in _CT_TAPS[c]:
                    off = _BASE2 + dh * _WC2 + dw
                    k = kh * 3 + kw
                    d = (jnp.dot(w4a_ref[k], d2c_b[:, off:off + _M3],
                                 preferred_element_type=f32)
                         + jnp.dot(w4b_ref[k], btc_b[:, off:off + _M3],
                                   preferred_element_type=f32))
                    acc = d if acc is None else acc + d
            u1_raw.append(acc)
            msk = acc * mask3
            s_acc = s_acc + jnp.sum(msk, axis=-1, keepdims=True)
            ss_acc = ss_acc + jnp.sum(msk * msk, axis=-1, keepdims=True)
    cnt = float(_H1 * _H1)
    mean = s_acc / cnt
    var = ss_acc / cnt - mean * mean
    inv = lax.rsqrt(var + EPS)
    a_u1 = alpha_ref[:, 3:4]
    u1_canvas = jnp.zeros((c1, _WC1 * _WC1), f32)
    for i in range(4):
        y = (u1_raw[i] - mean) * inv
        y = jnp.where(y >= 0.0, y, a_u1 * y)
        u1_canvas = u1_canvas + jnp.dot(y, pu1c_ref[i],
                                        preferred_element_type=f32)

    # -------- up2: ConvT(16->2, s2) on cat[d1, u1], conv_only (+ bias) ------
    d1c_b = d1_canvas.astype(jnp.bfloat16)
    u1c_b = u1_canvas.astype(jnp.bfloat16)
    out = jnp.zeros((OUT_CH, HW * HW), f32)
    for r in range(2):
        for c in range(2):
            acc = None
            for kh, dh in _CT_TAPS[r]:
                for kw, dw in _CT_TAPS[c]:
                    off = _BASE1 + dh * _WC1 + dw
                    k = kh * 3 + kw
                    d = (jnp.dot(w5a_ref[k], d1c_b[:, off:off + _M4],
                                 preferred_element_type=f32)
                         + jnp.dot(w5b_ref[k], u1c_b[:, off:off + _M4],
                                   preferred_element_type=f32))
                    acc = d if acc is None else acc + d
            # Scatter this output phase into the lane-dense (2, 256) result.
            out = out + jnp.dot(acc, pout_ref[2 * r + c],
                                preferred_element_type=f32)
    out = out + b5_ref[...]                                  # (OUT_CH, 1) bcast
    out_ref[0] = out.astype(out_ref.dtype)


# ----------------------------------------------------------------------------
# Wrapper: parameter plumbing + pallas_call.
# ----------------------------------------------------------------------------
def _bcast(shape):
    zeros = (0,) * len(shape)
    return pl.BlockSpec(shape, lambda i, z=zeros: z)


def _conv_taps(w):
    """torch Conv2d (Cout, Cin, 3, 3) -> (9, Cout, Cin) tap matrices."""
    return jnp.transpose(w, (2, 3, 0, 1)).reshape(9, w.shape[0], w.shape[1])


def _convt_taps(w):
    """torch ConvTranspose2d (Cin, Cout, 3, 3) -> (9, Cout, Cin)."""
    return jnp.transpose(w, (2, 3, 1, 0)).reshape(9, w.shape[1], w.shape[0])


@jax.jit
def unet_forward(x_nchw, params):
    """Public interface matches the PyTorch module: NCHW in, NCHW out."""
    n = x_nchw.shape[0]
    c1, c2, c3 = CHS
    x = x_nchw.astype(jnp.float32)

    # mod-2 phase canvases of the zero-padded input (layout glue, same bytes).
    xp = jnp.pad(x, ((0, 0), (0, 0), (1, 1), (1, 1)))
    xph = jnp.stack([xp[:, :, r::2, c::2] for r in (0, 1) for c in (0, 1)],
                    axis=1)                                  # (N, 4, CIN, 9, 9)
    xph = xph.reshape(n, 4, IN_CH, _WPH0 * _WPH0).astype(jnp.bfloat16)

    p = params
    bf = jnp.bfloat16
    w1 = _conv_taps(p["down1"]["w"]).astype(bf)
    w2 = _conv_taps(p["down2"]["w"]).astype(bf)
    w3 = _conv_taps(p["bottom"]["w"]).astype(bf)
    w4 = _convt_taps(p["up1"]["w"])
    w4a, w4b = w4[:, :, :c2].astype(bf), w4[:, :, c2:].astype(bf)
    w5 = _convt_taps(p["up2"]["w"])
    w5a, w5b = w5[:, :, :c1].astype(bf), w5[:, :, c1:].astype(bf)
    b5 = p["up2"]["b"].reshape(OUT_CH, 1).astype(jnp.float32)
    # NOTE: biases of the IN+PReLU layers are exactly cancelled by the
    # InstanceNorm mean subtraction, so they are not sent to the kernel.
    alphas = jnp.stack([p["down1"]["alpha"], p["down2"]["alpha"],
                        p["bottom"]["alpha"], p["up1"]["alpha"]])
    alphas = alphas.astype(jnp.float32).reshape(1, 4)

    mask1 = jnp.asarray(_MASK1)
    mask2 = jnp.asarray(_MASK2)
    mask3 = jnp.asarray(_MASK3)
    pd1c = jnp.asarray(_P_D1_CANVAS)
    pd1p = jnp.asarray(_P_D1_PHASES)
    pd2c = jnp.asarray(_P_D2_CANVAS)
    pbtc = jnp.asarray(_P_BT_CANVAS)
    pu1c = jnp.asarray(_P_U1_CANVAS)
    pout = jnp.asarray(_P_OUT)

    out = pl.pallas_call(
        _unet_kernel,
        out_shape=jax.ShapeDtypeStruct((n, OUT_CH, HW * HW), jnp.float32),
        grid=(n,),
        in_specs=[
            _bcast((1, 4)),                                          # alphas
            pl.BlockSpec((1, 4, IN_CH, _WPH0 * _WPH0),
                         lambda i: (i, 0, 0, 0)),                    # x phases
            _bcast(w1.shape), _bcast(w2.shape), _bcast(w3.shape),
            _bcast(w4a.shape), _bcast(w4b.shape),
            _bcast(w5a.shape), _bcast(w5b.shape),
            _bcast(b5.shape),
            _bcast(mask1.shape), _bcast(mask2.shape), _bcast(mask3.shape),
            _bcast(pd1c.shape), _bcast(pd1p.shape), _bcast(pd2c.shape),
            _bcast(pbtc.shape), _bcast(pu1c.shape), _bcast(pout.shape),
        ],
        out_specs=pl.BlockSpec((1, OUT_CH, HW * HW), lambda i: (i, 0, 0)),
        compiler_params=pltpu.CompilerParams(
            dimension_semantics=("parallel",),
            vmem_limit_bytes=32 * 1024 * 1024),
    )(alphas, xph, w1, w2, w3, w4a, w4b, w5a, w5b, b5,
      mask1, mask2, mask3, pd1c, pd1p, pd2c, pbtc, pu1c, pout)

    return out.reshape(n, OUT_CH, HW, HW)


# ----------------------------------------------------------------------------
# Parameter construction (deterministic, synthetic; torch-style layouts).
# ----------------------------------------------------------------------------
def init_unet_params(key, in_channels=IN_CH, out_channels=OUT_CH, channels=CHS):
    c1, c2, c3 = channels
    k = 3

    def u(kk, shape, bound):
        return jax.random.uniform(kk, shape, jnp.float32, -bound, bound)

    keys = jax.random.split(key, 10)

    def conv(kw, kb, cin, cout):
        bound = 1.0 / float(np.sqrt(k * k * cin))
        return {"w": u(kw, (cout, cin, k, k), bound),   # torch Conv2d layout
                "b": u(kb, (cout,), bound), "alpha": 0.25}

    def convt(kw, kb, cin, cout, alpha=0.25):
        bound = 1.0 / float(np.sqrt(k * k * cin))
        return {"w": u(kw, (cin, cout, k, k), bound),   # torch ConvT layout
                "b": u(kb, (cout,), bound), "alpha": alpha}

    return {
        "down1": conv(keys[0], keys[1], in_channels, c1),
        "down2": conv(keys[2], keys[3], c1, c2),
        "bottom": conv(keys[4], keys[5], c2, c3),
        "up1": convt(keys[6], keys[7], c2 + c3, c1),
        # top up layer is conv_only (no norm / act) -> alpha unused
        "up2": convt(keys[8], keys[9], 2 * c1, out_channels, alpha=0.0),
    }


# ----------------------------------------------------------------------------
# Plain-JAX reference (f32) used only to verify the fused kernel's semantics.
# ----------------------------------------------------------------------------
def _in_prelu_ref(x, alpha):
    mean = jnp.mean(x, axis=(2, 3), keepdims=True)
    var = jnp.mean((x - mean) ** 2, axis=(2, 3), keepdims=True)
    y = (x - mean) * lax.rsqrt(var + EPS)
    return jnp.where(y >= 0.0, y, alpha * y)


def _conv_ref(x, w, b, stride):
    y = lax.conv_general_dilated(x, w, (stride, stride), ((1, 1), (1, 1)),
                                 dimension_numbers=("NCHW", "OIHW", "NCHW"))
    return y + b.reshape(1, -1, 1, 1)


def _convt_ref(x, w, b):
    # ConvTranspose2d(k3, s2, p1, output_padding=1) via lhs-dilated conv.
    w_eq = jnp.transpose(jnp.flip(w, (2, 3)), (1, 0, 2, 3))
    y = lax.conv_general_dilated(x, w_eq, (1, 1), ((1, 2), (1, 2)),
                                 lhs_dilation=(2, 2),
                                 dimension_numbers=("NCHW", "OIHW", "NCHW"))
    return y + b.reshape(1, -1, 1, 1)


def _unet_reference(x, p):
    d1 = _in_prelu_ref(_conv_ref(x, p["down1"]["w"], p["down1"]["b"], 2),
                       p["down1"]["alpha"])
    d2 = _in_prelu_ref(_conv_ref(d1, p["down2"]["w"], p["down2"]["b"], 2),
                       p["down2"]["alpha"])
    bt = _in_prelu_ref(_conv_ref(d2, p["bottom"]["w"], p["bottom"]["b"], 1),
                       p["bottom"]["alpha"])
    u1 = _in_prelu_ref(_convt_ref(jnp.concatenate([d2, bt], 1),
                                  p["up1"]["w"], p["up1"]["b"]),
                       p["up1"]["alpha"])
    return _convt_ref(jnp.concatenate([d1, u1], 1),
                      p["up2"]["w"], p["up2"]["b"])


if __name__ == "__main__":
    key = jax.random.PRNGKey(0)
    kx, kp = jax.random.split(key)

    N = 2
    x = jax.random.normal(kx, (N, IN_CH, HW, HW), jnp.float32)
    params = init_unet_params(kp)

    y = unet_forward(x, params)
    y = jax.block_until_ready(y)

    assert y.shape == (N, OUT_CH, HW, HW), y.shape
    assert bool(jnp.all(jnp.isfinite(y)))

    # Semantics check against the plain-JAX reference (loose tolerance: the
    # kernel runs the conv matmuls in bf16).
    ref = _unet_reference(x, params)
    err = float(jnp.max(jnp.abs(y - ref)))
    scale = float(jnp.max(jnp.abs(ref)))
    assert err <= 0.1 * scale + 1e-4, (err, scale)

    print("KERNEL_OK")
</pallas_src>

<mosaic_0001>
module attributes {stable_mosaic.version = 11 : i64} {
  func.func @_unet_kernel(%arg0: i32, %arg1: memref<1x4xf32, #tpu.memory_space<vmem>>, %arg2: memref<1x4x4x81xbf16, #tpu.memory_space<vmem>>, %arg3: memref<9x8x4xbf16, #tpu.memory_space<vmem>>, %arg4: memref<9x16x8xbf16, #tpu.memory_space<vmem>>, %arg5: memref<9x32x16xbf16, #tpu.memory_space<vmem>>, %arg6: memref<9x8x16xbf16, #tpu.memory_space<vmem>>, %arg7: memref<9x8x32xbf16, #tpu.memory_space<vmem>>, %arg8: memref<9x2x8xbf16, #tpu.memory_space<vmem>>, %arg9: memref<9x2x8xbf16, #tpu.memory_space<vmem>>, %arg10: memref<2x1xf32, #tpu.memory_space<vmem>>, %arg11: memref<1x71xf32, #tpu.memory_space<vmem>>, %arg12: memref<1x19xf32, #tpu.memory_space<vmem>>, %arg13: memref<1x22xf32, #tpu.memory_space<vmem>>, %arg14: memref<71x100xf32, #tpu.memory_space<vmem>>, %arg15: memref<71x100xf32, #tpu.memory_space<vmem>>, %arg16: memref<19x36xf32, #tpu.memory_space<vmem>>, %arg17: memref<22x36xf32, #tpu.memory_space<vmem>>, %arg18: memref<4x22x100xf32, #tpu.memory_space<vmem>>, %arg19: memref<4x78x256xf32, #tpu.memory_space<vmem>>, %arg20: memref<1x2x256xf32, #tpu.memory_space<vmem>>) attributes {dimension_semantics = [#tpu.dimension_semantics<parallel>], iteration_bounds = array<i64: 2>, scalar_prefetch = 0 : i64, scratch_operands = 0 : i64, tpu.core_type = #tpu.core_type<tc>, window_params = [{pipeline_mode = #tpu.pipeline_mode<synchronous>, transform_indices = @transform_0, window_bounds = array<i64: 1, 4>}, {transform_indices = @transform_1, window_bounds = array<i64: 1, 4, 4, 81>}, {pipeline_mode = #tpu.pipeline_mode<synchronous>, transform_indices = @transform_2, window_bounds = array<i64: 9, 8, 4>}, {pipeline_mode = #tpu.pipeline_mode<synchronous>, transform_indices = @transform_3, window_bounds = array<i64: 9, 16, 8>}, {pipeline_mode = #tpu.pipeline_mode<synchronous>, transform_indices = @transform_4, window_bounds = array<i64: 9, 32, 16>}, {pipeline_mode = #tpu.pipeline_mode<synchronous>, transform_indices = @transform_5, window_bounds = array<i64: 9, 8, 16>}, {pipeline_mode = #tpu.pipeline_mode<synchronous>, transform_indices = @transform_6, window_bounds = array<i64: 9, 8, 32>}, {pipeline_mode = #tpu.pipeline_mode<synchronous>, transform_indices = @transform_7, window_bounds = array<i64: 9, 2, 8>}, {pipeline_mode = #tpu.pipeline_mode<synchronous>, transform_indices = @transform_8, window_bounds = array<i64: 9, 2, 8>}, {pipeline_mode = #tpu.pipeline_mode<synchronous>, transform_indices = @transform_9, window_bounds = array<i64: 2, 1>}, {pipeline_mode = #tpu.pipeline_mode<synchronous>, transform_indices = @transform_10, window_bounds = array<i64: 1, 71>}, {pipeline_mode = #tpu.pipeline_mode<synchronous>, transform_indices = @transform_11, window_bounds = array<i64: 1, 19>}, {pipeline_mode = #tpu.pipeline_mode<synchronous>, transform_indices = @transform_12, window_bounds = array<i64: 1, 22>}, {pipeline_mode = #tpu.pipeline_mode<synchronous>, transform_indices = @transform_13, window_bounds = array<i64: 71, 100>}, {pipeline_mode = #tpu.pipeline_mode<synchronous>, transform_indices = @transform_14, window_bounds = array<i64: 71, 100>}, {pipeline_mode = #tpu.pipeline_mode<synchronous>, transform_indices = @transform_15, window_bounds = array<i64: 19, 36>}, {pipeline_mode = #tpu.pipeline_mode<synchronous>, transform_indices = @transform_16, window_bounds = array<i64: 22, 36>}, {pipeline_mode = #tpu.pipeline_mode<synchronous>, transform_indices = @transform_17, window_bounds = array<i64: 4, 22, 100>}, {pipeline_mode = #tpu.pipeline_mode<synchronous>, transform_indices = @transform_18, window_bounds = array<i64: 4, 78, 256>}, {transform_indices = @transform_19, window_bounds = array<i64: 1, 2, 256>}]} {
    %c0 = arith.constant 0 : index
    %c0_0 = arith.constant 0 : index
    %c0_1 = arith.constant 0 : index
    %c0_2 = arith.constant 0 : index
    %0 = vector.load %arg2[%c0, %c0_0, %c0_1, %c0_2] : memref<1x4x4x81xbf16, #tpu.memory_space<vmem>>, vector<1x1x4x81xbf16>
    %1 = vector.shape_cast %0 : vector<1x1x4x81xbf16> to vector<4x81xbf16>
    %c0_3 = arith.constant 0 : index
    %c1 = arith.constant 1 : index
    %c0_4 = arith.constant 0 : index
    %c0_5 = arith.constant 0 : index
    %2 = vector.load %arg2[%c0_3, %c1, %c0_4, %c0_5] : memref<1x4x4x81xbf16, #tpu.memory_space<vmem>>, vector<1x1x4x81xbf16>
    %3 = vector.shape_cast %2 : vector<1x1x4x81xbf16> to vector<4x81xbf16>
    %c0_6 = arith.constant 0 : index
    %c2 = arith.constant 2 : index
    %c0_7 = arith.constant 0 : index
    %c0_8 = arith.constant 0 : index
    %4 = vector.load %arg2[%c0_6, %c2, %c0_7, %c0_8] : memref<1x4x4x81xbf16, #tpu.memory_space<vmem>>, vector<1x1x4x81xbf16>
    %5 = vector.shape_cast %4 : vector<1x1x4x81xbf16> to vector<4x81xbf16>
    %c0_9 = arith.constant 0 : index
    %c3 = arith.constant 3 : index
    %c0_10 = arith.constant 0 : index
    %c0_11 = arith.constant 0 : index
    %6 = vector.load %arg2[%c0_9, %c3, %c0_10, %c0_11] : memref<1x4x4x81xbf16, #tpu.memory_space<vmem>>, vector<1x1x4x81xbf16>
    %7 = vector.shape_cast %6 : vector<1x1x4x81xbf16> to vector<4x81xbf16>
    %8 = vector.extract_strided_slice %1 {offsets = [0, 0], sizes = [4, 71], strides = [1, 1]} : vector<4x81xbf16> to vector<4x71xbf16>
    %c0_12 = arith.constant 0 : index
    %c0_13 = arith.constant 0 : index
    %c0_14 = arith.constant 0 : index
    %9 = vector.load %arg3[%c0_12, %c0_13, %c0_14] : memref<9x8x4xbf16, #tpu.memory_space<vmem>>, vector<1x8x4xbf16>
    %10 = vector.shape_cast %9 : vector<1x8x4xbf16> to vector<8x4xbf16>
    %cst = arith.constant dense<0.000000e+00> : vector<8x71xf32>
    %11 = tpu.matmul %10, %8, %cst {dimension_numbers = #tpu.dot_dimension_numbers<[1], [0], [0], [1], [0, 0, 1, 1], [], []>} : vector<8x4xbf16>, vector<4x71xbf16>, vector<8x71xf32> -> vector<8x71xf32>
    %12 = vector.extract_strided_slice %3 {offsets = [0, 0], sizes = [4, 71], strides = [1, 1]} : vector<4x81xbf16> to vector<4x71xbf16>
    %c1_15 = arith.constant 1 : index
    %c0_16 = arith.constant 0 : index
    %c0_17 = arith.constant 0 : index
    %13 = vector.load %arg3[%c1_15, %c0_16, %c0_17] : memref<9x8x4xbf16, #tpu.memory_space<vmem>>, vector<1x8x4xbf16>
    %14 = vector.shape_cast %13 : vector<1x8x4xbf16> to vector<8x4xbf16>
    %cst_18 = arith.constant dense<0.000000e+00> : vector<8x71xf32>
    %15 = tpu.matmul %14, %12, %cst_18 {dimension_numbers = #tpu.dot_dimension_numbers<[1], [0], [0], [1], [0, 0, 1, 1], [], []>} : vector<8x4xbf16>, vector<4x71xbf16>, vector<8x71xf32> -> vector<8x71xf32>
    %16 = arith.addf %11, %15 : vector<8x71xf32>
    %17 = vector.extract_strided_slice %1 {offsets = [0, 1], sizes = [4, 71], strides = [1, 1]} : vector<4x81xbf16> to vector<4x71xbf16>
    %c2_19 = arith.constant 2 : index
    %c0_20 = arith.constant 0 : index
    %c0_21 = arith.constant 0 : index
    %18 = vector.load %arg3[%c2_19, %c0_20, %c0_21] : memref<9x8x4xbf16, #tpu.memory_space<vmem>>, vector<1x8x4xbf16>
    %19 = vector.shape_cast %18 : vector<1x8x4xbf16> to vector<8x4xbf16>
    %cst_22 = arith.constant dense<0.000000e+00> : vector<8x71xf32>
    %20 = tpu.matmul %19, %17, %cst_22 {dimension_numbers = #tpu.dot_dimension_numbers<[1], [0], [0], [1], [0, 0, 1, 1], [], []>} : vector<8x4xbf16>, vector<4x71xbf16>, vector<8x71xf32> -> vector<8x71xf32>
    %21 = arith.addf %16, %20 : vector<8x71xf32>
    %22 = vector.extract_strided_slice %5 {offsets = [0, 0], sizes = [4, 71], strides = [1, 1]} : vector<4x81xbf16> to vector<4x71xbf16>
    %c3_23 = arith.constant 3 : index
    %c0_24 = arith.constant 0 : index
    %c0_25 = arith.constant 0 : index
    %23 = vector.load %arg3[%c3_23, %c0_24, %c0_25] : memref<9x8x4xbf16, #tpu.memory_space<vmem>>, vector<1x8x4xbf16>
    %24 = vector.shape_cast %23 : vector<1x8x4xbf16> to vector<8x4xbf16>
    %cst_26 = arith.constant dense<0.000000e+00> : vector<8x71xf32>
    %25 = tpu.matmul %24, %22, %cst_26 {dimension_numbers = #tpu.dot_dimension_numbers<[1], [0], [0], [1], [0, 0, 1, 1], [], []>} : vector<8x4xbf16>, vector<4x71xbf16>, vector<8x71xf32> -> vector<8x71xf32>
    %26 = arith.addf %21, %25 : vector<8x71xf32>
    %27 = vector.extract_strided_slice %7 {offsets = [0, 0], sizes = [4, 71], strides = [1, 1]} : vector<4x81xbf16> to vector<4x71xbf16>
    %c4 = arith.constant 4 : index
    %c0_27 = arith.constant 0 : index
    %c0_28 = arith.constant 0 : index
    %28 = vector.load %arg3[%c4, %c0_27, %c0_28] : memref<9x8x4xbf16, #tpu.memory_space<vmem>>, vector<1x8x4xbf16>
    %29 = vector.shape_cast %28 : vector<1x8x4xbf16> to vector<8x4xbf16>
    %cst_29 = arith.constant dense<0.000000e+00> : vector<8x71xf32>
    %30 = tpu.matmul %29, %27, %cst_29 {dimension_numbers = #tpu.dot_dimension_numbers<[1], [0], [0], [1], [0, 0, 1, 1], [], []>} : vector<8x4xbf16>, vector<4x71xbf16>, vector<8x71xf32> -> vector<8x71xf32>
    %31 = arith.addf %26, %30 : vector<8x71xf32>
    %32 = vector.extract_strided_slice %5 {offsets = [0, 1], sizes = [4, 71], strides = [1, 1]} : vector<4x81xbf16> to vector<4x71xbf16>
    %c5 = arith.constant 5 : index
    %c0_30 = arith.constant 0 : index
    %c0_31 = arith.constant 0 : index
    %33 = vector.load %arg3[%c5, %c0_30, %c0_31] : memref<9x8x4xbf16, #tpu.memory_space<vmem>>, vector<1x8x4xbf16>
    %34 = vector.shape_cast %33 : vector<1x8x4xbf16> to vector<8x4xbf16>
    %cst_32 = arith.constant dense<0.000000e+00> : vector<8x71xf32>
    %35 = tpu.matmul %34, %32, %cst_32 {dimension_numbers = #tpu.dot_dimension_numbers<[1], [0], [0], [1], [0, 0, 1, 1], [], []>} : vector<8x4xbf16>, vector<4x71xbf16>, vector<8x71xf32> -> vector<8x71xf32>
    %36 = arith.addf %31, %35 : vector<8x71xf32>
    %37 = vector.extract_strided_slice %1 {offsets = [0, 9], sizes = [4, 71], strides = [1, 1]} : vector<4x81xbf16> to vector<4x71xbf16>
    %c6 = arith.constant 6 : index
    %c0_33 = arith.constant 0 : index
    %c0_34 = arith.constant 0 : index
    %38 = vector.load %arg3[%c6, %c0_33, %c0_34] : memref<9x8x4xbf16, #tpu.memory_space<vmem>>, vector<1x8x4xbf16>
    %39 = vector.shape_cast %38 : vector<1x8x4xbf16> to vector<8x4xbf16>
    %cst_35 = arith.constant dense<0.000000e+00> : vector<8x71xf32>
    %40 = tpu.matmul %39, %37, %cst_35 {dimension_numbers = #tpu.dot_dimension_numbers<[1], [0], [0], [1], [0, 0, 1, 1], [], []>} : vector<8x4xbf16>, vector<4x71xbf16>, vector<8x71xf32> -> vector<8x71xf32>
    %41 = arith.addf %36, %40 : vector<8x71xf32>
    %42 = vector.extract_strided_slice %3 {offsets = [0, 9], sizes = [4, 71], strides = [1, 1]} : vector<4x81xbf16> to vector<4x71xbf16>
    %c7 = arith.constant 7 : index
    %c0_36 = arith.constant 0 : index
    %c0_37 = arith.constant 0 : index
    %43 = vector.load %arg3[%c7, %c0_36, %c0_37] : memref<9x8x4xbf16, #tpu.memory_space<vmem>>, vector<1x8x4xbf16>
    %44 = vector.shape_cast %43 : vector<1x8x4xbf16> to vector<8x4xbf16>
    %cst_38 = arith.constant dense<0.000000e+00> : vector<8x71xf32>
    %45 = tpu.matmul %44, %42, %cst_38 {dimension_numbers = #tpu.dot_dimension_numbers<[1], [0], [0], [1], [0, 0, 1, 1], [], []>} : vector<8x4xbf16>, vector<4x71xbf16>, vector<8x71xf32> -> vector<8x71xf32>
    %46 = arith.addf %41, %45 : vector<8x71xf32>
    %47 = vector.extract_strided_slice %1 {offsets = [0, 10], sizes = [4, 71], strides = [1, 1]} : vector<4x81xbf16> to vector<4x71xbf16>
    %c8 = arith.constant 8 : index
    %c0_39 = arith.constant 0 : index
    %c0_40 = arith.constant 0 : index
    %48 = vector.load %arg3[%c8, %c0_39, %c0_40] : memref<9x8x4xbf16, #tpu.memory_space<vmem>>, vector<1x8x4xbf16>
    %49 = vector.shape_cast %48 : vector<1x8x4xbf16> to vector<8x4xbf16>
    %cst_41 = arith.constant dense<0.000000e+00> : vector<8x71xf32>
    %50 = tpu.matmul %49, %47, %cst_41 {dimension_numbers = #tpu.dot_dimension_numbers<[1], [0], [0], [1], [0, 0, 1, 1], [], []>} : vector<8x4xbf16>, vector<4x71xbf16>, vector<8x71xf32> -> vector<8x71xf32>
    %51 = arith.addf %46, %50 : vector<8x71xf32>
    %c0_42 = arith.constant 0 : index
    %c0_43 = arith.constant 0 : index
    %52 = vector.load %arg11[%c0_42, %c0_43] : memref<1x71xf32, #tpu.memory_space<vmem>>, vector<1x71xf32>
    %c0_44 = arith.constant 0 : index
    %c0_45 = arith.constant 0 : index
    %53 = vector.load %arg1[%c0_44, %c0_45] : memref<1x4xf32, #tpu.memory_space<vmem>>, vector<1x1xf32>
    %54 = vector.broadcast %52 : vector<1x71xf32> to vector<8x71xf32>
    %55 = arith.mulf %51, %54 : vector<8x71xf32>
    %cst_46 = arith.constant dense<0.000000e+00> : vector<8xf32>
    %56 = vector.multi_reduction <add>, %55, %cst_46 [1] : vector<8x71xf32> to vector<8xf32>
    %57 = vector.shape_cast %56 : vector<8xf32> to vector<8x1xf32>
    %58 = arith.mulf %55, %55 : vector<8x71xf32>
    %cst_47 = arith.constant dense<0.000000e+00> : vector<8xf32>
    %59 = vector.multi_reduction <add>, %58, %cst_47 [1] : vector<8x71xf32> to vector<8xf32>
    %60 = vector.shape_cast %59 : vector<8xf32> to vector<8x1xf32>
    %cst_48 = arith.constant 6.400000e+01 : f32
    %61 = vector.broadcast %cst_48 : f32 to vector<8x1xf32>
    %62 = arith.divf %57, %61 : vector<8x1xf32>
    %cst_49 = arith.constant 6.400000e+01 : f32
    %63 = vector.broadcast %cst_49 : f32 to vector<8x1xf32>
    %64 = arith.divf %60, %63 : vector<8x1xf32>
    %65 = arith.mulf %62, %62 : vector<8x1xf32>
    %66 = arith.subf %64, %65 : vector<8x1xf32>
    %67 = vector.broadcast %62 : vector<8x1xf32> to vector<8x71xf32>
    %68 = arith.subf %51, %67 : vector<8x71xf32>
    %cst_50 = arith.constant 9.99999974E-6 : f32
    %69 = vector.broadcast %cst_50 : f32 to vector<8x1xf32>
    %70 = arith.addf %66, %69 : vector<8x1xf32>
    %71 = math.rsqrt %70 : vector<8x1xf32>
    %72 = vector.broadcast %71 : vector<8x1xf32> to vector<8x71xf32>
    %73 = arith.mulf %68, %72 : vector<8x71xf32>
    %cst_51 = arith.constant 0.000000e+00 : f32
    %74 = vector.broadcast %cst_51 : f32 to vector<8x71xf32>
    %75 = arith.cmpf oge, %73, %74 : vector<8x71xf32>
    %76 = vector.broadcast %53 : vector<1x1xf32> to vector<8x71xf32>
    %77 = arith.mulf %76, %73 : vector<8x71xf32>
    %78 = arith.select %75, %73, %77 : vector<8x71xi1>, vector<8x71xf32>
    %c0_52 = arith.constant 0 : index
    %c0_53 = arith.constant 0 : index
    %79 = vector.load %arg14[%c0_52, %c0_53] : memref<71x100xf32, #tpu.memory_space<vmem>>, vector<71x100xf32>
    %cst_54 = arith.constant dense<0.000000e+00> : vector<8x100xf32>
    %80 = tpu.matmul %78, %79, %cst_54 {dimension_numbers = #tpu.dot_dimension_numbers<[1], [0], [0], [1], [0, 0, 1, 1], [], []>} : vector<8x71xf32>, vector<71x100xf32>, vector<8x100xf32> -> vector<8x100xf32>
    %c0_55 = arith.constant 0 : index
    %c0_56 = arith.constant 0 : index
    %81 = vector.load %arg15[%c0_55, %c0_56] : memref<71x100xf32, #tpu.memory_space<vmem>>, vector<71x100xf32>
    %cst_57 = arith.constant dense<0.000000e+00> : vector<8x100xf32>
    %82 = tpu.matmul %78, %81, %cst_57 {dimension_numbers = #tpu.dot_dimension_numbers<[1], [0], [0], [1], [0, 0, 1, 1], [], []>} : vector<8x71xf32>, vector<71x100xf32>, vector<8x100xf32> -> vector<8x100xf32>
    %83 = arith.truncf %82 : vector<8x100xf32> to vector<8x100xbf16>
    %84 = vector.extract_strided_slice %83 {offsets = [0, 0], sizes = [8, 25], strides = [1, 1]} : vector<8x100xbf16> to vector<8x25xbf16>
    %85 = vector.extract_strided_slice %83 {offsets = [0, 25], sizes = [8, 25], strides = [1, 1]} : vector<8x100xbf16> to vector<8x25xbf16>
    %86 = vector.extract_strided_slice %83 {offsets = [0, 50], sizes = [8, 25], strides = [1, 1]} : vector<8x100xbf16> to vector<8x25xbf16>
    %87 = vector.extract_strided_slice %83 {offsets = [0, 75], sizes = [8, 25], strides = [1, 1]} : vector<8x100xbf16> to vector<8x25xbf16>
    %88 = vector.extract_strided_slice %84 {offsets = [0, 0], sizes = [8, 19], strides = [1, 1]} : vector<8x25xbf16> to vector<8x19xbf16>
    %c0_58 = arith.constant 0 : index
    %c0_59 = arith.constant 0 : index
    %c0_60 = arith.constant 0 : index
    %89 = vector.load %arg4[%c0_58, %c0_59, %c0_60] : memref<9x16x8xbf16, #tpu.memory_space<vmem>>, vector<1x16x8xbf16>
    %90 = vector.shape_cast %89 : vector<1x16x8xbf16> to vector<16x8xbf16>
    %cst_61 = arith.constant dense<0.000000e+00> : vector<16x19xf32>
    %91 = tpu.matmul %90, %88, %cst_61 {dimension_numbers = #tpu.dot_dimension_numbers<[1], [0], [0], [1], [0, 0, 1, 1], [], []>} : vector<16x8xbf16>, vector<8x19xbf16>, vector<16x19xf32> -> vector<16x19xf32>
    %92 = vector.extract_strided_slice %85 {offsets = [0, 0], sizes = [8, 19], strides = [1, 1]} : vector<8x25xbf16> to vector<8x19xbf16>
    %c1_62 = arith.constant 1 : index
    %c0_63 = arith.constant 0 : index
    %c0_64 = arith.constant 0 : index
    %93 = vector.load %arg4[%c1_62, %c0_63, %c0_64] : memref<9x16x8xbf16, #tpu.memory_space<vmem>>, vector<1x16x8xbf16>
    %94 = vector.shape_cast %93 : vector<1x16x8xbf16> to vector<16x8xbf16>
    %cst_65 = arith.constant dense<0.000000e+00> : vector<16x19xf32>
    %95 = tpu.matmul %94, %92, %cst_65 {dimension_numbers = #tpu.dot_dimension_numbers<[1], [0], [0], [1], [0, 0, 1, 1], [], []>} : vector<16x8xbf16>, vector<8x19xbf16>, vector<16x19xf32> -> vector<16x19xf32>
    %96 = arith.addf %91, %95 : vector<16x19xf32>
    %97 = vector.extract_strided_slice %84 {offsets = [0, 1], sizes = [8, 19], strides = [1, 1]} : vector<8x25xbf16> to vector<8x19xbf16>
    %c2_66 = arith.constant 2 : index
    %c0_67 = arith.constant 0 : index
    %c0_68 = arith.constant 0 : index
    %98 = vector.load %arg4[%c2_66, %c0_67, %c0_68] : memref<9x16x8xbf16, #tpu.memory_space<vmem>>, vector<1x16x8xbf16>
    %99 = vector.shape_cast %98 : vector<1x16x8xbf16> to vector<16x8xbf16>
    %cst_69 = arith.constant dense<0.000000e+00> : vector<16x19xf32>
    %100 = tpu.matmul %99, %97, %cst_69 {dimension_numbers = #tpu.dot_dimension_numbers<[1], [0], [0], [1], [0, 0, 1, 1], [], []>} : vector<16x8xbf16>, vector<8x19xbf16>, vector<16x19xf32> -> vector<16x19xf32>
    %101 = arith.addf %96, %100 : vector<16x19xf32>
    %102 = vector.extract_strided_slice %86 {offsets = [0, 0], sizes = [8, 19], strides = [1, 1]} : vector<8x25xbf16> to vector<8x19xbf16>
    %c3_70 = arith.constant 3 : index
    %c0_71 = arith.constant 0 : index
    %c0_72 = arith.constant 0 : index
    %103 = vector.load %arg4[%c3_70, %c0_71, %c0_72] : memref<9x16x8xbf16, #tpu.memory_space<vmem>>, vector<1x16x8xbf16>
    %104 = vector.shape_cast %103 : vector<1x16x8xbf16> to vector<16x8xbf16>
    %cst_73 = arith.constant dense<0.000000e+00> : vector<16x19xf32>
    %105 = tpu.matmul %104, %102, %cst_73 {dimension_numbers = #tpu.dot_dimension_numbers<[1], [0], [0], [1], [0, 0, 1, 1], [], []>} : vector<16x8xbf16>, vector<8x19xbf16>, vector<16x19xf32> -> vector<16x19xf32>
    %106 = arith.addf %101, %105 : vector<16x19xf32>
    %107 = vector.extract_strided_slice %87 {offsets = [0, 0], sizes = [8, 19], strides = [1, 1]} : vector<8x25xbf16> to vector<8x19xbf16>
    %c4_74 = arith.constant 4 : index
    %c0_75 = arith.constant 0 : index
    %c0_76 = arith.constant 0 : index
    %108 = vector.load %arg4[%c4_74, %c0_75, %c0_76] : memref<9x16x8xbf16, #tpu.memory_space<vmem>>, vector<1x16x8xbf16>
    %109 = vector.shape_cast %108 : vector<1x16x8xbf16> to vector<16x8xbf16>
    %cst_77 = arith.constant dense<0.000000e+00> : vector<16x19xf32>
    %110 = tpu.matmul %109, %107, %cst_77 {dimension_numbers = #tpu.dot_dimension_numbers<[1], [0], [0], [1], [0, 0, 1, 1], [], []>} : vector<16x8xbf16>, vector<8x19xbf16>, vector<16x19xf32> -> vector<16x19xf32>
    %111 = arith.addf %106, %110 : vector<16x19xf32>
    %112 = vector.extract_strided_slice %86 {offsets = [0, 1], sizes = [8, 19], strides = [1, 1]} : vector<8x25xbf16> to vector<8x19xbf16>
    %c5_78 = arith.constant 5 : index
    %c0_79 = arith.constant 0 : index
    %c0_80 = arith.constant 0 : index
    %113 = vector.load %arg4[%c5_78, %c0_79, %c0_80] : memref<9x16x8xbf16, #tpu.memory_space<vmem>>, vector<1x16x8xbf16>
    %114 = vector.shape_cast %113 : vector<1x16x8xbf16> to vector<16x8xbf16>
    %cst_81 = arith.constant dense<0.000000e+00> : vector<16x19xf32>
    %115 = tpu.matmul %114, %112, %cst_81 {dimension_numbers = #tpu.dot_dimension_numbers<[1], [0], [0], [1], [0, 0, 1, 1], [], []>} : vector<16x8xbf16>, vector<8x19xbf16>, vector<16x19xf32> -> vector<16x19xf32>
    %116 = arith.addf %111, %115 : vector<16x19xf32>
    %117 = vector.extract_strided_slice %84 {offsets = [0, 5], sizes = [8, 19], strides = [1, 1]} : vector<8x25xbf16> to vector<8x19xbf16>
    %c6_82 = arith.constant 6 : index
    %c0_83 = arith.constant 0 : index
    %c0_84 = arith.constant 0 : index
    %118 = vector.load %arg4[%c6_82, %c0_83, %c0_84] : memref<9x16x8xbf16, #tpu.memory_space<vmem>>, vector<1x16x8xbf16>
    %119 = vector.shape_cast %118 : vector<1x16x8xbf16> to vector<16x8xbf16>
    %cst_85 = arith.constant dense<0.000000e+00> : vector<16x19xf32>
    %120 = tpu.matmul %119, %117, %cst_85 {dimension_numbers = #tpu.dot_dimension_numbers<[1], [0], [0], [1], [0, 0, 1, 1], [], []>} : vector<16x8xbf16>, vector<8x19xbf16>, vector<16x19xf32> -> vector<16x19xf32>
    %121 = arith.addf %116, %120 : vector<16x19xf32>
    %122 = vector.extract_strided_slice %85 {offsets = [0, 5], sizes = [8, 19], strides = [1, 1]} : vector<8x25xbf16> to vector<8x19xbf16>
    %c7_86 = arith.constant 7 : index
    %c0_87 = arith.constant 0 : index
    %c0_88 = arith.constant 0 : index
    %123 = vector.load %arg4[%c7_86, %c0_87, %c0_88] : memref<9x16x8xbf16, #tpu.memory_space<vmem>>, vector<1x16x8xbf16>
    %124 = vector.shape_cast %123 : vector<1x16x8xbf16> to vector<16x8xbf16>
    %cst_89 = arith.constant dense<0.000000e+00> : vector<16x19xf32>
    %125 = tpu.matmul %124, %122, %cst_89 {dimension_numbers = #tpu.dot_dimension_numbers<[1], [0], [0], [1], [0, 0, 1, 1], [], []>} : vector<16x8xbf16>, vector<8x19xbf16>, vector<16x19xf32> -> vector<16x19xf32>
    %126 = arith.addf %121, %125 : vector<16x19xf32>
    %127 = vector.extract_strided_slice %84 {offsets = [0, 6], sizes = [8, 19], strides = [1, 1]} : vector<8x25xbf16> to vector<8x19xbf16>
    %c8_90 = arith.constant 8 : index
    %c0_91 = arith.constant 0 : index
    %c0_92 = arith.constant 0 : index
    %128 = vector.load %arg4[%c8_90, %c0_91, %c0_92] : memref<9x16x8xbf16, #tpu.memory_space<vmem>>, vector<1x16x8xbf16>
    %129 = vector.shape_cast %128 : vector<1x16x8xbf16> to vector<16x8xbf16>
    %cst_93 = arith.constant dense<0.000000e+00> : vector<16x19xf32>
    %130 = tpu.matmul %129, %127, %cst_93 {dimension_numbers = #tpu.dot_dimension_numbers<[1], [0], [0], [1], [0, 0, 1, 1], [], []>} : vector<16x8xbf16>, vector<8x19xbf16>, vector<16x19xf32> -> vector<16x19xf32>
    %131 = arith.addf %126, %130 : vector<16x19xf32>
    %c0_94 = arith.constant 0 : index
    %c0_95 = arith.constant 0 : index
    %132 = vector.load %arg12[%c0_94, %c0_95] : memref<1x19xf32, #tpu.memory_space<vmem>>, vector<1x19xf32>
    %c0_96 = arith.constant 0 : index
    %c1_97 = arith.constant 1 : index
    %133 = vector.load %arg1[%c0_96, %c1_97] : memref<1x4xf32, #tpu.memory_space<vmem>>, vector<1x1xf32>
    %134 = vector.broadcast %132 : vector<1x19xf32> to vector<16x19xf32>
    %135 = arith.mulf %131, %134 : vector<16x19xf32>
    %cst_98 = arith.constant dense<0.000000e+00> : vector<16xf32>
    %136 = vector.multi_reduction <add>, %135, %cst_98 [1] : vector<16x19xf32> to vector<16xf32>
    %137 = vector.shape_cast %136 : vector<16xf32> to vector<16x1xf32>
    %138 = arith.mulf %135, %135 : vector<16x19xf32>
    %cst_99 = arith.constant dense<0.000000e+00> : vector<16xf32>
    %139 = vector.multi_reduction <add>, %138, %cst_99 [1] : vector<16x19xf32> to vector<16xf32>
    %140 = vector.shape_cast %139 : vector<16xf32> to vector<16x1xf32>
    %cst_100 = arith.constant 1.600000e+01 : f32
    %141 = vector.broadcast %cst_100 : f32 to vector<16x1xf32>
    %142 = arith.divf %137, %141 : vector<16x1xf32>
    %cst_101 = arith.constant 1.600000e+01 : f32
    %143 = vector.broadcast %cst_101 : f32 to vector<16x1xf32>
    %144 = arith.divf %140, %143 : vector<16x1xf32>
    %145 = arith.mulf %142, %142 : vector<16x1xf32>
    %146 = arith.subf %144, %145 : vector<16x1xf32>
    %147 = vector.broadcast %142 : vector<16x1xf32> to vector<16x19xf32>
    %148 = arith.subf %131, %147 : vector<16x19xf32>
    %cst_102 = arith.constant 9.99999974E-6 : f32
    %149 = vector.broadcast %cst_102 : f32 to vector<16x1xf32>
    %150 = arith.addf %146, %149 : vector<16x1xf32>
    %151 = math.rsqrt %150 : vector<16x1xf32>
    %152 = vector.broadcast %151 : vector<16x1xf32> to vector<16x19xf32>
    %153 = arith.mulf %148, %152 : vector<16x19xf32>
    %cst_103 = arith.constant 0.000000e+00 : f32
    %154 = vector.broadcast %cst_103 : f32 to vector<16x19xf32>
    %155 = arith.cmpf oge, %153, %154 : vector<16x19xf32>
    %156 = vector.broadcast %133 : vector<1x1xf32> to vector<16x19xf32>
    %157 = arith.mulf %156, %153 : vector<16x19xf32>
    %158 = arith.select %155, %153, %157 : vector<16x19xi1>, vector<16x19xf32>
    %c0_104 = arith.constant 0 : index
    %c0_105 = arith.constant 0 : index
    %159 = vector.load %arg16[%c0_104, %c0_105] : memref<19x36xf32, #tpu.memory_space<vmem>>, vector<19x36xf32>
    %cst_106 = arith.constant dense<0.000000e+00> : vector<16x36xf32>
    %160 = tpu.matmul %158, %159, %cst_106 {dimension_numbers = #tpu.dot_dimension_numbers<[1], [0], [0], [1], [0, 0, 1, 1], [], []>} : vector<16x19xf32>, vector<19x36xf32>, vector<16x36xf32> -> vector<16x36xf32>
    %161 = arith.truncf %160 : vector<16x36xf32> to vector<16x36xbf16>
    %c0_107 = arith.constant 0 : index
    %c0_108 = arith.constant 0 : index
    %c0_109 = arith.constant 0 : index
    %162 = vector.load %arg5[%c0_107, %c0_108, %c0_109] : memref<9x32x16xbf16, #tpu.memory_space<vmem>>, vector<1x32x16xbf16>
    %163 = vector.shape_cast %162 : vector<1x32x16xbf16> to vector<32x16xbf16>
    %164 = vector.extract_strided_slice %161 {offsets = [0, 0], sizes = [16, 22], strides = [1, 1]} : vector<16x36xbf16> to vector<16x22xbf16>
    %cst_110 = arith.constant dense<0.000000e+00> : vector<32x22xf32>
    %165 = tpu.matmul %163, %164, %cst_110 {dimension_numbers = #tpu.dot_dimension_numbers<[1], [0], [0], [1], [0, 0, 1, 1], [], []>} : vector<32x16xbf16>, vector<16x22xbf16>, vector<32x22xf32> -> vector<32x22xf32>
    %c1_111 = arith.constant 1 : index
    %c0_112 = arith.constant 0 : index
    %c0_113 = arith.constant 0 : index
    %166 = vector.load %arg5[%c1_111, %c0_112, %c0_113] : memref<9x32x16xbf16, #tpu.memory_space<vmem>>, vector<1x32x16xbf16>
    %167 = vector.shape_cast %166 : vector<1x32x16xbf16> to vector<32x16xbf16>
    %168 = vector.extract_strided_slice %161 {offsets = [0, 1], sizes = [16, 22], strides = [1, 1]} : vector<16x36xbf16> to vector<16x22xbf16>
    %cst_114 = arith.constant dense<0.000000e+00> : vector<32x22xf32>
    %169 = tpu.matmul %167, %168, %cst_114 {dimension_numbers = #tpu.dot_dimension_numbers<[1], [0], [0], [1], [0, 0, 1, 1], [], []>} : vector<32x16xbf16>, vector<16x22xbf16>, vector<32x22xf32> -> vector<32x22xf32>
    %170 = arith.addf %165, %169 : vector<32x22xf32>
    %c2_115 = arith.constant 2 : index
    %c0_116 = arith.constant 0 : index
    %c0_117 = arith.constant 0 : index
    %171 = vector.load %arg5[%c2_115, %c0_116, %c0_117] : memref<9x32x16xbf16, #tpu.memory_space<vmem>>, vector<1x32x16xbf16>
    %172 = vector.shape_cast %171 : vector<1x32x16xbf16> to vector<32x16xbf16>
    %173 = vector.extract_strided_slice %161 {offsets = [0, 2], sizes = [16, 22], strides = [1, 1]} : vector<16x36xbf16> to vector<16x22xbf16>
    %cst_118 = arith.constant dense<0.000000e+00> : vector<32x22xf32>
    %174 = tpu.matmul %172, %173, %cst_118 {dimension_numbers = #tpu.dot_dimension_numbers<[1], [0], [0], [1], [0, 0, 1, 1], [], []>} : vector<32x16xbf16>, vector<16x22xbf16>, vector<32x22xf32> -> vector<32x22xf32>
    %175 = arith.addf %170, %174 : vector<32x22xf32>
    %c3_119 = arith.constant 3 : index
    %c0_120 = arith.constant 0 : index
    %c0_121 = arith.constant 0 : index
    %176 = vector.load %arg5[%c3_119, %c0_120, %c0_121] : memref<9x32x16xbf16, #tpu.memory_space<vmem>>, vector<1x32x16xbf16>
    %177 = vector.shape_cast %176 : vector<1x32x16xbf16> to vector<32x16xbf16>
    %178 = vector.extract_strided_slice %161 {offsets = [0, 6], sizes = [16, 22], strides = [1, 1]} : vector<16x36xbf16> to vector<16x22xbf16>
    %cst_122 = arith.constant dense<0.000000e+00> : vector<32x22xf32>
    %179 = tpu.matmul %177, %178, %cst_122 {dimension_numbers = #tpu.dot_dimension_numbers<[1], [0], [0], [1], [0, 0, 1, 1], [], []>} : vector<32x16xbf16>, vector<16x22xbf16>, vector<32x22xf32> -> vector<32x22xf32>
    %180 = arith.addf %175, %179 : vector<32x22xf32>
    %c4_123 = arith.constant 4 : index
    %c0_124 = arith.constant 0 : index
    %c0_125 = arith.constant 0 : index
    %181 = vector.load %arg5[%c4_123, %c0_124, %c0_125] : memref<9x32x16xbf16, #tpu.memory_space<vmem>>, vector<1x32x16xbf16>
    %182 = vector.shape_cast %181 : vector<1x32x16xbf16> to vector<32x16xbf16>
    %183 = vector.extract_strided_slice %161 {offsets = [0, 7], sizes = [16, 22], strides = [1, 1]} : vector<16x36xbf16> to vector<16x22xbf16>
    %cst_126 = arith.constant dense<0.000000e+00> : vector<32x22xf32>
    %184 = tpu.matmul %182, %183, %cst_126 {dimension_numbers = #tpu.dot_dimension_numbers<[1], [0], [0], [1], [0, 0, 1, 1], [], []>} : vector<32x16xbf16>, vector<16x22xbf16>, vector<32x22xf32> -> vector<32x22xf32>
    %185 = arith.addf %180, %184 : vector<32x22xf32>
    %c5_127 = arith.constant 5 : index
    %c0_128 = arith.constant 0 : index
    %c0_129 = arith.constant 0 : index
    %186 = vector.load %arg5[%c5_127, %c0_128, %c0_129] : memref<9x32x16xbf16, #tpu.memory_space<vmem>>, vector<1x32x16xbf16>
    %187 = vector.shape_cast %186 : vector<1x32x16xbf16> to vector<32x16xbf16>
    %188 = vector.extract_strided_slice %161 {offsets = [0, 8], sizes = [16, 22], strides = [1, 1]} : vector<16x36xbf16> to vector<16x22xbf16>
    %cst_130 = arith.constant dense<0.000000e+00> : vector<32x22xf32>
    %189 = tpu.matmul %187, %188, %cst_130 {dimension_numbers = #tpu.dot_dimension_numbers<[1], [0], [0], [1], [0, 0, 1, 1], [], []>} : vector<32x16xbf16>, vector<16x22xbf16>, vector<32x22xf32> -> vector<32x22xf32>
    %190 = arith.addf %185, %189 : vector<32x22xf32>
    %c6_131 = arith.constant 6 : index
    %c0_132 = arith.constant 0 : index
    %c0_133 = arith.constant 0 : index
    %191 = vector.load %arg5[%c6_131, %c0_132, %c0_133] : memref<9x32x16xbf16, #tpu.memory_space<vmem>>, vector<1x32x16xbf16>
    %192 = vector.shape_cast %191 : vector<1x32x16xbf16> to vector<32x16xbf16>
    %193 = vector.extract_strided_slice %161 {offsets = [0, 12], sizes = [16, 22], strides = [1, 1]} : vector<16x36xbf16> to vector<16x22xbf16>
    %cst_134 = arith.constant dense<0.000000e+00> : vector<32x22xf32>
    %194 = tpu.matmul %192, %193, %cst_134 {dimension_numbers = #tpu.dot_dimension_numbers<[1], [0], [0], [1], [0, 0, 1, 1], [], []>} : vector<32x16xbf16>, vector<16x22xbf16>, vector<32x22xf32> -> vector<32x22xf32>
    %195 = arith.addf %190, %194 : vector<32x22xf32>
    %c7_135 = arith.constant 7 : index
    %c0_136 = arith.constant 0 : index
    %c0_137 = arith.constant 0 : index
    %196 = vector.load %arg5[%c7_135, %c0_136, %c0_137] : memref<9x32x16xbf16, #tpu.memory_space<vmem>>, vector<1x32x16xbf16>
    %197 = vector.shape_cast %196 : vector<1x32x16xbf16> to vector<32x16xbf16>
    %198 = vector.extract_strided_slice %161 {offsets = [0, 13], sizes = [16, 22], strides = [1, 1]} : vector<16x36xbf16> to vector<16x22xbf16>
    %cst_138 = arith.constant dense<0.000000e+00> : vector<32x22xf32>
    %199 = tpu.matmul %197, %198, %cst_138 {dimension_numbers = #tpu.dot_dimension_numbers<[1], [0], [0], [1], [0, 0, 1, 1], [], []>} : vector<32x16xbf16>, vector<16x22xbf16>, vector<32x22xf32> -> vector<32x22xf32>
    %200 = arith.addf %195, %199 : vector<32x22xf32>
    %c8_139 = arith.constant 8 : index
    %c0_140 = arith.constant 0 : index
    %c0_141 = arith.constant 0 : index
    %201 = vector.load %arg5[%c8_139, %c0_140, %c0_141] : memref<9x32x16xbf16, #tpu.memory_space<vmem>>, vector<1x32x16xbf16>
    %202 = vector.shape_cast %201 : vector<1x32x16xbf16> to vector<32x16xbf16>
    %203 = vector.extract_strided_slice %161 {offsets = [0, 14], sizes = [16, 22], strides = [1, 1]} : vector<16x36xbf16> to vector<16x22xbf16>
    %cst_142 = arith.constant dense<0.000000e+00> : vector<32x22xf32>
    %204 = tpu.matmul %202, %203, %cst_142 {dimension_numbers = #tpu.dot_dimension_numbers<[1], [0], [0], [1], [0, 0, 1, 1], [], []>} : vector<32x16xbf16>, vector<16x22xbf16>, vector<32x22xf32> -> vector<32x22xf32>
    %205 = arith.addf %200, %204 : vector<32x22xf32>
    %c0_143 = arith.constant 0 : index
    %c0_144 = arith.constant 0 : index
    %206 = vector.load %arg13[%c0_143, %c0_144] : memref<1x22xf32, #tpu.memory_space<vmem>>, vector<1x22xf32>
    %c0_145 = arith.constant 0 : index
    %c2_146 = arith.constant 2 : index
    %207 = vector.load %arg1[%c0_145, %c2_146] : memref<1x4xf32, #tpu.memory_space<vmem>>, vector<1x1xf32>
    %208 = vector.broadcast %206 : vector<1x22xf32> to vector<32x22xf32>
    %209 = arith.mulf %205, %208 : vector<32x22xf32>
    %cst_147 = arith.constant dense<0.000000e+00> : vector<32xf32>
    %210 = vector.multi_reduction <add>, %209, %cst_147 [1] : vector<32x22xf32> to vector<32xf32>
    %211 = vector.shape_cast %210 : vector<32xf32> to vector<32x1xf32>
    %212 = arith.mulf %209, %209 : vector<32x22xf32>
    %cst_148 = arith.constant dense<0.000000e+00> : vector<32xf32>
    %213 = vector.multi_reduction <add>, %212, %cst_148 [1] : vector<32x22xf32> to vector<32xf32>
    %214 = vector.shape_cast %213 : vector<32xf32> to vector<32x1xf32>
    %cst_149 = arith.constant 1.600000e+01 : f32
    %215 = vector.broadcast %cst_149 : f32 to vector<32x1xf32>
    %216 = arith.divf %211, %215 : vector<32x1xf32>
    %cst_150 = arith.constant 1.600000e+01 : f32
    %217 = vector.broadcast %cst_150 : f32 to vector<32x1xf32>
    %218 = arith.divf %214, %217 : vector<32x1xf32>
    %219 = arith.mulf %216, %216 : vector<32x1xf32>
    %220 = arith.subf %218, %219 : vector<32x1xf32>
    %221 = vector.broadcast %216 : vector<32x1xf32> to vector<32x22xf32>
    %222 = arith.subf %205, %221 : vector<32x22xf32>
    %cst_151 = arith.constant 9.99999974E-6 : f32
    %223 = vector.broadcast %cst_151 : f32 to vector<32x1xf32>
    %224 = arith.addf %220, %223 : vector<32x1xf32>
    %225 = math.rsqrt %224 : vector<32x1xf32>
    %226 = vector.broadcast %225 : vector<32x1xf32> to vector<32x22xf32>
    %227 = arith.mulf %222, %226 : vector<32x22xf32>
    %cst_152 = arith.constant 0.000000e+00 : f32
    %228 = vector.broadcast %cst_152 : f32 to vector<32x22xf32>
    %229 = arith.cmpf oge, %227, %228 : vector<32x22xf32>
    %230 = vector.broadcast %207 : vector<1x1xf32> to vector<32x22xf32>
    %231 = arith.mulf %230, %227 : vector<32x22xf32>
    %232 = arith.select %229, %227, %231 : vector<32x22xi1>, vector<32x22xf32>
    %c0_153 = arith.constant 0 : index
    %c0_154 = arith.constant 0 : index
    %233 = vector.load %arg17[%c0_153, %c0_154] : memref<22x36xf32, #tpu.memory_space<vmem>>, vector<22x36xf32>
    %cst_155 = arith.constant dense<0.000000e+00> : vector<32x36xf32>
    %234 = tpu.matmul %232, %233, %cst_155 {dimension_numbers = #tpu.dot_dimension_numbers<[1], [0], [0], [1], [0, 0, 1, 1], [], []>} : vector<32x22xf32>, vector<22x36xf32>, vector<32x36xf32> -> vector<32x36xf32>
    %235 = arith.truncf %234 : vector<32x36xf32> to vector<32x36xbf16>
    %c0_156 = arith.constant 0 : index
    %c0_157 = arith.constant 0 : index
    %236 = vector.load %arg13[%c0_156, %c0_157] : memref<1x22xf32, #tpu.memory_space<vmem>>, vector<1x22xf32>
    %cst_158 = arith.constant 0.000000e+00 : f32
    %237 = vector.broadcast %cst_158 : f32 to vector<8x1xf32>
    %cst_159 = arith.constant 0.000000e+00 : f32
    %238 = vector.broadcast %cst_159 : f32 to vector<8x1xf32>
    %c4_160 = arith.constant 4 : index
    %c0_161 = arith.constant 0 : index
    %c0_162 = arith.constant 0 : index
    %239 = vector.load %arg6[%c4_160, %c0_161, %c0_162] : memref<9x8x16xbf16, #tpu.memory_space<vmem>>, vector<1x8x16xbf16>
    %240 = vector.shape_cast %239 : vector<1x8x16xbf16> to vector<8x16xbf16>
    %241 = vector.extract_strided_slice %161 {offsets = [0, 7], sizes = [16, 22], strides = [1, 1]} : vector<16x36xbf16> to vector<16x22xbf16>
    %cst_163 = arith.constant dense<0.000000e+00> : vector<8x22xf32>
    %242 = tpu.matmul %240, %241, %cst_163 {dimension_numbers = #tpu.dot_dimension_numbers<[1], [0], [0], [1], [0, 0, 1, 1], [], []>} : vector<8x16xbf16>, vector<16x22xbf16>, vector<8x22xf32> -> vector<8x22xf32>
    %c4_164 = arith.constant 4 : index
    %c0_165 = arith.constant 0 : index
    %c0_166 = arith.constant 0 : index
    %243 = vector.load %arg7[%c4_164, %c0_165, %c0_166] : memref<9x8x32xbf16, #tpu.memory_space<vmem>>, vector<1x8x32xbf16>
    %244 = vector.shape_cast %243 : vector<1x8x32xbf16> to vector<8x32xbf16>
    %245 = vector.extract_strided_slice %235 {offsets = [0, 7], sizes = [32, 22], strides = [1, 1]} : vector<32x36xbf16> to vector<32x22xbf16>
    %cst_167 = arith.constant dense<0.000000e+00> : vector<8x22xf32>
    %246 = tpu.matmul %244, %245, %cst_167 {dimension_numbers = #tpu.dot_dimension_numbers<[1], [0], [0], [1], [0, 0, 1, 1], [], []>} : vector<8x32xbf16>, vector<32x22xbf16>, vector<8x22xf32> -> vector<8x22xf32>
    %247 = arith.addf %242, %246 : vector<8x22xf32>
    %248 = vector.broadcast %236 : vector<1x22xf32> to vector<8x22xf32>
    %249 = arith.mulf %247, %248 : vector<8x22xf32>
    %cst_168 = arith.constant dense<0.000000e+00> : vector<8xf32>
    %250 = vector.multi_reduction <add>, %249, %cst_168 [1] : vector<8x22xf32> to vector<8xf32>
    %251 = vector.shape_cast %250 : vector<8xf32> to vector<8x1xf32>
    %252 = arith.addf %237, %251 : vector<8x1xf32>
    %253 = arith.mulf %249, %249 : vector<8x22xf32>
    %cst_169 = arith.constant dense<0.000000e+00> : vector<8xf32>
    %254 = vector.multi_reduction <add>, %253, %cst_169 [1] : vector<8x22xf32> to vector<8xf32>
    %255 = vector.shape_cast %254 : vector<8xf32> to vector<8x1xf32>
    %256 = arith.addf %238, %255 : vector<8x1xf32>
    %c3_170 = arith.constant 3 : index
    %c0_171 = arith.constant 0 : index
    %c0_172 = arith.constant 0 : index
    %257 = vector.load %arg6[%c3_170, %c0_171, %c0_172] : memref<9x8x16xbf16, #tpu.memory_space<vmem>>, vector<1x8x16xbf16>
    %258 = vector.shape_cast %257 : vector<1x8x16xbf16> to vector<8x16xbf16>
    %259 = vector.extract_strided_slice %161 {offsets = [0, 8], sizes = [16, 22], strides = [1, 1]} : vector<16x36xbf16> to vector<16x22xbf16>
    %cst_173 = arith.constant dense<0.000000e+00> : vector<8x22xf32>
    %260 = tpu.matmul %258, %259, %cst_173 {dimension_numbers = #tpu.dot_dimension_numbers<[1], [0], [0], [1], [0, 0, 1, 1], [], []>} : vector<8x16xbf16>, vector<16x22xbf16>, vector<8x22xf32> -> vector<8x22xf32>
    %c3_174 = arith.constant 3 : index
    %c0_175 = arith.constant 0 : index
    %c0_176 = arith.constant 0 : index
    %261 = vector.load %arg7[%c3_174, %c0_175, %c0_176] : memref<9x8x32xbf16, #tpu.memory_space<vmem>>, vector<1x8x32xbf16>
    %262 = vector.shape_cast %261 : vector<1x8x32xbf16> to vector<8x32xbf16>
    %263 = vector.extract_strided_slice %235 {offsets = [0, 8], sizes = [32, 22], strides = [1, 1]} : vector<32x36xbf16> to vector<32x22xbf16>
    %cst_177 = arith.constant dense<0.000000e+00> : vector<8x22xf32>
    %264 = tpu.matmul %262, %263, %cst_177 {dimension_numbers = #tpu.dot_dimension_numbers<[1], [0], [0], [1], [0, 0, 1, 1], [], []>} : vector<8x32xbf16>, vector<32x22xbf16>, vector<8x22xf32> -> vector<8x22xf32>
    %265 = arith.addf %260, %264 : vector<8x22xf32>
    %c5_178 = arith.constant 5 : index
    %c0_179 = arith.constant 0 : index
    %c0_180 = arith.constant 0 : index
    %266 = vector.load %arg6[%c5_178, %c0_179, %c0_180] : memref<9x8x16xbf16, #tpu.memory_space<vmem>>, vector<1x8x16xbf16>
    %267 = vector.shape_cast %266 : vector<1x8x16xbf16> to vector<8x16xbf16>
    %268 = vector.extract_strided_slice %161 {offsets = [0, 7], sizes = [16, 22], strides = [1, 1]} : vector<16x36xbf16> to vector<16x22xbf16>
    %cst_181 = arith.constant dense<0.000000e+00> : vector<8x22xf32>
    %269 = tpu.matmul %267, %268, %cst_181 {dimension_numbers = #tpu.dot_dimension_numbers<[1], [0], [0], [1], [0, 0, 1, 1], [], []>} : vector<8x16xbf16>, vector<16x22xbf16>, vector<8x22xf32> -> vector<8x22xf32>
    %c5_182 = arith.constant 5 : index
    %c0_183 = arith.constant 0 : index
    %c0_184 = arith.constant 0 : index
    %270 = vector.load %arg7[%c5_182, %c0_183, %c0_184] : memref<9x8x32xbf16, #tpu.memory_space<vmem>>, vector<1x8x32xbf16>
    %271 = vector.shape_cast %270 : vector<1x8x32xbf16> to vector<8x32xbf16>
    %272 = vector.extract_strided_slice %235 {offsets = [0, 7], sizes = [32, 22], strides = [1, 1]} : vector<32x36xbf16> to vector<32x22xbf16>
    %cst_185 = arith.constant dense<0.000000e+00> : vector<8x22xf32>
    %273 = tpu.matmul %271, %272, %cst_185 {dimension_numbers = #tpu.dot_dimension_numbers<[1], [0], [0], [1], [0, 0, 1, 1], [], []>} : vector<8x32xbf16>, vector<32x22xbf16>, vector<8x22xf32> -> vector<8x22xf32>
    %274 = arith.addf %269, %273 : vector<8x22xf32>
    %275 = arith.addf %265, %274 : vector<8x22xf32>
    %276 = vector.broadcast %236 : vector<1x22xf32> to vector<8x22xf32>
    %277 = arith.mulf %275, %276 : vector<8x22xf32>
    %cst_186 = arith.constant dense<0.000000e+00> : vector<8xf32>
    %278 = vector.multi_reduction <add>, %277, %cst_186 [1] : vector<8x22xf32> to vector<8xf32>
    %279 = vector.shape_cast %278 : vector<8xf32> to vector<8x1xf32>
    %280 = arith.addf %252, %279 : vector<8x1xf32>
    %281 = arith.mulf %277, %277 : vector<8x22xf32>
    %cst_187 = arith.constant dense<0.000000e+00> : vector<8xf32>
    %282 = vector.multi_reduction <add>, %281, %cst_187 [1] : vector<8x22xf32> to vector<8xf32>
    %283 = vector.shape_cast %282 : vector<8xf32> to vector<8x1xf32>
    %284 = arith.addf %256, %283 : vector<8x1xf32>
    %c1_188 = arith.constant 1 : index
    %c0_189 = arith.constant 0 : index
    %c0_190 = arith.constant 0 : index
    %285 = vector.load %arg6[%c1_188, %c0_189, %c0_190] : memref<9x8x16xbf16, #tpu.memory_space<vmem>>, vector<1x8x16xbf16>
    %286 = vector.shape_cast %285 : vector<1x8x16xbf16> to vector<8x16xbf16>
    %287 = vector.extract_strided_slice %161 {offsets = [0, 13], sizes = [16, 22], strides = [1, 1]} : vector<16x36xbf16> to vector<16x22xbf16>
    %cst_191 = arith.constant dense<0.000000e+00> : vector<8x22xf32>
    %288 = tpu.matmul %286, %287, %cst_191 {dimension_numbers = #tpu.dot_dimension_numbers<[1], [0], [0], [1], [0, 0, 1, 1], [], []>} : vector<8x16xbf16>, vector<16x22xbf16>, vector<8x22xf32> -> vector<8x22xf32>
    %c1_192 = arith.constant 1 : index
    %c0_193 = arith.constant 0 : index
    %c0_194 = arith.constant 0 : index
    %289 = vector.load %arg7[%c1_192, %c0_193, %c0_194] : memref<9x8x32xbf16, #tpu.memory_space<vmem>>, vector<1x8x32xbf16>
    %290 = vector.shape_cast %289 : vector<1x8x32xbf16> to vector<8x32xbf16>
    %291 = vector.extract_strided_slice %235 {offsets = [0, 13], sizes = [32, 22], strides = [1, 1]} : vector<32x36xbf16> to vector<32x22xbf16>
    %cst_195 = arith.constant dense<0.000000e+00> : vector<8x22xf32>
    %292 = tpu.matmul %290, %291, %cst_195 {dimension_numbers = #tpu.dot_dimension_numbers<[1], [0], [0], [1], [0, 0, 1, 1], [], []>} : vector<8x32xbf16>, vector<32x22xbf16>, vector<8x22xf32> -> vector<8x22xf32>
    %293 = arith.addf %288, %292 : vector<8x22xf32>
    %c7_196 = arith.constant 7 : index
    %c0_197 = arith.constant 0 : index
    %c0_198 = arith.constant 0 : index
    %294 = vector.load %arg6[%c7_196, %c0_197, %c0_198] : memref<9x8x16xbf16, #tpu.memory_space<vmem>>, vector<1x8x16xbf16>
    %295 = vector.shape_cast %294 : vector<1x8x16xbf16> to vector<8x16xbf16>
    %296 = vector.extract_strided_slice %161 {offsets = [0, 7], sizes = [16, 22], strides = [1, 1]} : vector<16x36xbf16> to vector<16x22xbf16>
    %cst_199 = arith.constant dense<0.000000e+00> : vector<8x22xf32>
    %297 = tpu.matmul %295, %296, %cst_199 {dimension_numbers = #tpu.dot_dimension_numbers<[1], [0], [0], [1], [0, 0, 1, 1], [], []>} : vector<8x16xbf16>, vector<16x22xbf16>, vector<8x22xf32> -> vector<8x22xf32>
    %c7_200 = arith.constant 7 : index
    %c0_201 = arith.constant 0 : index
    %c0_202 = arith.constant 0 : index
    %298 = vector.load %arg7[%c7_200, %c0_201, %c0_202] : memref<9x8x32xbf16, #tpu.memory_space<vmem>>, vector<1x8x32xbf16>
    %299 = vector.shape_cast %298 : vector<1x8x32xbf16> to vector<8x32xbf16>
    %300 = vector.extract_strided_slice %235 {offsets = [0, 7], sizes = [32, 22], strides = [1, 1]} : vector<32x36xbf16> to vector<32x22xbf16>
    %cst_203 = arith.constant dense<0.000000e+00> : vector<8x22xf32>
    %301 = tpu.matmul %299, %300, %cst_203 {dimension_numbers = #tpu.dot_dimension_numbers<[1], [0], [0], [1], [0, 0, 1, 1], [], []>} : vector<8x32xbf16>, vector<32x22xbf16>, vector<8x22xf32> -> vector<8x22xf32>
    %302 = arith.addf %297, %301 : vector<8x22xf32>
    %303 = arith.addf %293, %302 : vector<8x22xf32>
    %304 = vector.broadcast %236 : vector<1x22xf32> to vector<8x22xf32>
    %305 = arith.mulf %303, %304 : vector<8x22xf32>
    %cst_204 = arith.constant dense<0.000000e+00> : vector<8xf32>
    %306 = vector.multi_reduction <add>, %305, %cst_204 [1] : vector<8x22xf32> to vector<8xf32>
    %307 = vector.shape_cast %306 : vector<8xf32> to vector<8x1xf32>
    %308 = arith.addf %280, %307 : vector<8x1xf32>
    %309 = arith.mulf %305, %305 : vector<8x22xf32>
    %cst_205 = arith.constant dense<0.000000e+00> : vector<8xf32>
    %310 = vector.multi_reduction <add>, %309, %cst_205 [1] : vector<8x22xf32> to vector<8xf32>
    %311 = vector.shape_cast %310 : vector<8xf32> to vector<8x1xf32>
    %312 = arith.addf %284, %311 : vector<8x1xf32>
    %c0_206 = arith.constant 0 : index
    %c0_207 = arith.constant 0 : index
    %c0_208 = arith.constant 0 : index
    %313 = vector.load %arg6[%c0_206, %c0_207, %c0_208] : memref<9x8x16xbf16, #tpu.memory_space<vmem>>, vector<1x8x16xbf16>
    %314 = vector.shape_cast %313 : vector<1x8x16xbf16> to vector<8x16xbf16>
    %315 = vector.extract_strided_slice %161 {offsets = [0, 14], sizes = [16, 22], strides = [1, 1]} : vector<16x36xbf16> to vector<16x22xbf16>
    %cst_209 = arith.constant dense<0.000000e+00> : vector<8x22xf32>
    %316 = tpu.matmul %314, %315, %cst_209 {dimension_numbers = #tpu.dot_dimension_numbers<[1], [0], [0], [1], [0, 0, 1, 1], [], []>} : vector<8x16xbf16>, vector<16x22xbf16>, vector<8x22xf32> -> vector<8x22xf32>
    %c0_210 = arith.constant 0 : index
    %c0_211 = arith.constant 0 : index
    %c0_212 = arith.constant 0 : index
    %317 = vector.load %arg7[%c0_210, %c0_211, %c0_212] : memref<9x8x32xbf16, #tpu.memory_space<vmem>>, vector<1x8x32xbf16>
    %318 = vector.shape_cast %317 : vector<1x8x32xbf16> to vector<8x32xbf16>
    %319 = vector.extract_strided_slice %235 {offsets = [0, 14], sizes = [32, 22], strides = [1, 1]} : vector<32x36xbf16> to vector<32x22xbf16>
    %cst_213 = arith.constant dense<0.000000e+00> : vector<8x22xf32>
    %320 = tpu.matmul %318, %319, %cst_213 {dimension_numbers = #tpu.dot_dimension_numbers<[1], [0], [0], [1], [0, 0, 1, 1], [], []>} : vector<8x32xbf16>, vector<32x22xbf16>, vector<8x22xf32> -> vector<8x22xf32>
    %321 = arith.addf %316, %320 : vector<8x22xf32>
    %c2_214 = arith.constant 2 : index
    %c0_215 = arith.constant 0 : index
    %c0_216 = arith.constant 0 : index
    %322 = vector.load %arg6[%c2_214, %c0_215, %c0_216] : memref<9x8x16xbf16, #tpu.memory_space<vmem>>, vector<1x8x16xbf16>
    %323 = vector.shape_cast %322 : vector<1x8x16xbf16> to vector<8x16xbf16>
    %324 = vector.extract_strided_slice %161 {offsets = [0, 13], sizes = [16, 22], strides = [1, 1]} : vector<16x36xbf16> to vector<16x22xbf16>
    %cst_217 = arith.constant dense<0.000000e+00> : vector<8x22xf32>
    %325 = tpu.matmul %323, %324, %cst_217 {dimension_numbers = #tpu.dot_dimension_numbers<[1], [0], [0], [1], [0, 0, 1, 1], [], []>} : vector<8x16xbf16>, vector<16x22xbf16>, vector<8x22xf32> -> vector<8x22xf32>
    %c2_218 = arith.constant 2 : index
    %c0_219 = arith.constant 0 : index
    %c0_220 = arith.constant 0 : index
    %326 = vector.load %arg7[%c2_218, %c0_219, %c0_220] : memref<9x8x32xbf16, #tpu.memory_space<vmem>>, vector<1x8x32xbf16>
    %327 = vector.shape_cast %326 : vector<1x8x32xbf16> to vector<8x32xbf16>
    %328 = vector.extract_strided_slice %235 {offsets = [0, 13], sizes = [32, 22], strides = [1, 1]} : vector<32x36xbf16> to vector<32x22xbf16>
    %cst_221 = arith.constant dense<0.000000e+00> : vector<8x22xf32>
    %329 = tpu.matmul %327, %328, %cst_221 {dimension_numbers = #tpu.dot_dimension_numbers<[1], [0], [0], [1], [0, 0, 1, 1], [], []>} : vector<8x32xbf16>, vector<32x22xbf16>, vector<8x22xf32> -> vector<8x22xf32>
    %330 = arith.addf %325, %329 : vector<8x22xf32>
    %331 = arith.addf %321, %330 : vector<8x22xf32>
    %c6_222 = arith.constant 6 : index
    %c0_223 = arith.constant 0 : index
    %c0_224 = arith.constant 0 : index
    %332 = vector.load %arg6[%c6_222, %c0_223, %c0_224] : memref<9x8x16xbf16, #tpu.memory_space<vmem>>, vector<1x8x16xbf16>
    %333 = vector.shape_cast %332 : vector<1x8x16xbf16> to vector<8x16xbf16>
    %334 = vector.extract_strided_slice %161 {offsets = [0, 8], sizes = [16, 22], strides = [1, 1]} : vector<16x36xbf16> to vector<16x22xbf16>
    %cst_225 = arith.constant dense<0.000000e+00> : vector<8x22xf32>
    %335 = tpu.matmul %333, %334, %cst_225 {dimension_numbers = #tpu.dot_dimension_numbers<[1], [0], [0], [1], [0, 0, 1, 1], [], []>} : vector<8x16xbf16>, vector<16x22xbf16>, vector<8x22xf32> -> vector<8x22xf32>
    %c6_226 = arith.constant 6 : index
    %c0_227 = arith.constant 0 : index
    %c0_228 = arith.constant 0 : index
    %336 = vector.load %arg7[%c6_226, %c0_227, %c0_228] : memref<9x8x32xbf16, #tpu.memory_space<vmem>>, vector<1x8x32xbf16>
    %337 = vector.shape_cast %336 : vector<1x8x32xbf16> to vector<8x32xbf16>
    %338 = vector.extract_strided_slice %235 {offsets = [0, 8], sizes = [32, 22], strides = [1, 1]} : vector<32x36xbf16> to vector<32x22xbf16>
    %cst_229 = arith.constant dense<0.000000e+00> : vector<8x22xf32>
    %339 = tpu.matmul %337, %338, %cst_229 {dimension_numbers = #tpu.dot_dimension_numbers<[1], [0], [0], [1], [0, 0, 1, 1], [], []>} : vector<8x32xbf16>, vector<32x22xbf16>, vector<8x22xf32> -> vector<8x22xf32>
    %340 = arith.addf %335, %339 : vector<8x22xf32>
    %341 = arith.addf %331, %340 : vector<8x22xf32>
    %c8_230 = arith.constant 8 : index
    %c0_231 = arith.constant 0 : index
    %c0_232 = arith.constant 0 : index
    %342 = vector.load %arg6[%c8_230, %c0_231, %c0_232] : memref<9x8x16xbf16, #tpu.memory_space<vmem>>, vector<1x8x16xbf16>
    %343 = vector.shape_cast %342 : vector<1x8x16xbf16> to vector<8x16xbf16>
    %344 = vector.extract_strided_slice %161 {offsets = [0, 7], sizes = [16, 22], strides = [1, 1]} : vector<16x36xbf16> to vector<16x22xbf16>
    %cst_233 = arith.constant dense<0.000000e+00> : vector<8x22xf32>
    %345 = tpu.matmul %343, %344, %cst_233 {dimension_numbers = #tpu.dot_dimension_numbers<[1], [0], [0], [1], [0, 0, 1, 1], [], []>} : vector<8x16xbf16>, vector<16x22xbf16>, vector<8x22xf32> -> vector<8x22xf32>
    %c8_234 = arith.constant 8 : index
    %c0_235 = arith.constant 0 : index
    %c0_236 = arith.constant 0 : index
    %346 = vector.load %arg7[%c8_234, %c0_235, %c0_236] : memref<9x8x32xbf16, #tpu.memory_space<vmem>>, vector<1x8x32xbf16>
    %347 = vector.shape_cast %346 : vector<1x8x32xbf16> to vector<8x32xbf16>
    %348 = vector.extract_strided_slice %235 {offsets = [0, 7], sizes = [32, 22], strides = [1, 1]} : vector<32x36xbf16> to vector<32x22xbf16>
    %cst_237 = arith.constant dense<0.000000e+00> : vector<8x22xf32>
    %349 = tpu.matmul %347, %348, %cst_237 {dimension_numbers = #tpu.dot_dimension_numbers<[1], [0], [0], [1], [0, 0, 1, 1], [], []>} : vector<8x32xbf16>, vector<32x22xbf16>, vector<8x22xf32> -> vector<8x22xf32>
    %350 = arith.addf %345, %349 : vector<8x22xf32>
    %351 = arith.addf %341, %350 : vector<8x22xf32>
    %352 = vector.broadcast %236 : vector<1x22xf32> to vector<8x22xf32>
    %353 = arith.mulf %351, %352 : vector<8x22xf32>
    %cst_238 = arith.constant dense<0.000000e+00> : vector<8xf32>
    %354 = vector.multi_reduction <add>, %353, %cst_238 [1] : vector<8x22xf32> to vector<8xf32>
    %355 = vector.shape_cast %354 : vector<8xf32> to vector<8x1xf32>
    %356 = arith.addf %308, %355 : vector<8x1xf32>
    %357 = arith.mulf %353, %353 : vector<8x22xf32>
    %cst_239 = arith.constant dense<0.000000e+00> : vector<8xf32>
    %358 = vector.multi_reduction <add>, %357, %cst_239 [1] : vector<8x22xf32> to vector<8xf32>
    %359 = vector.shape_cast %358 : vector<8xf32> to vector<8x1xf32>
    %360 = arith.addf %312, %359 : vector<8x1xf32>
    %cst_240 = arith.constant 6.400000e+01 : f32
    %361 = vector.broadcast %cst_240 : f32 to vector<8x1xf32>
    %362 = arith.divf %356, %361 : vector<8x1xf32>
    %cst_241 = arith.constant 6.400000e+01 : f32
    %363 = vector.broadcast %cst_241 : f32 to vector<8x1xf32>
    %364 = arith.divf %360, %363 : vector<8x1xf32>
    %365 = arith.mulf %362, %362 : vector<8x1xf32>
    %366 = arith.subf %364, %365 : vector<8x1xf32>
    %cst_242 = arith.constant 9.99999974E-6 : f32
    %367 = vector.broadcast %cst_242 : f32 to vector<8x1xf32>
    %368 = arith.addf %366, %367 : vector<8x1xf32>
    %369 = math.rsqrt %368 : vector<8x1xf32>
    %c0_243 = arith.constant 0 : index
    %c3_244 = arith.constant 3 : index
    %370 = vector.load %arg1[%c0_243, %c3_244] : memref<1x4xf32, #tpu.memory_space<vmem>>, vector<1x1xf32>
    %cst_245 = arith.constant 0.000000e+00 : f32
    %371 = vector.broadcast %cst_245 : f32 to vector<8x100xf32>
    %372 = vector.broadcast %362 : vector<8x1xf32> to vector<8x22xf32>
    %373 = arith.subf %247, %372 : vector<8x22xf32>
    %374 = vector.broadcast %369 : vector<8x1xf32> to vector<8x22xf32>
    %375 = arith.mulf %373, %374 : vector<8x22xf32>
    %cst_246 = arith.constant 0.000000e+00 : f32
    %376 = vector.broadcast %cst_246 : f32 to vector<8x22xf32>
    %377 = arith.cmpf oge, %375, %376 : vector<8x22xf32>
    %378 = vector.broadcast %370 : vector<1x1xf32> to vector<8x22xf32>
    %379 = arith.mulf %378, %375 : vector<8x22xf32>
    %380 = arith.select %377, %375, %379 : vector<8x22xi1>, vector<8x22xf32>
    %c0_247 = arith.constant 0 : index
    %c0_248 = arith.constant 0 : index
    %c0_249 = arith.constant 0 : index
    %381 = vector.load %arg18[%c0_247, %c0_248, %c0_249] : memref<4x22x100xf32, #tpu.memory_space<vmem>>, vector<1x22x100xf32>
    %382 = vector.shape_cast %381 : vector<1x22x100xf32> to vector<22x100xf32>
    %cst_250 = arith.constant dense<0.000000e+00> : vector<8x100xf32>
    %383 = tpu.matmul %380, %382, %cst_250 {dimension_numbers = #tpu.dot_dimension_numbers<[1], [0], [0], [1], [0, 0, 1, 1], [], []>} : vector<8x22xf32>, vector<22x100xf32>, vector<8x100xf32> -> vector<8x100xf32>
    %384 = arith.addf %371, %383 : vector<8x100xf32>
    %385 = vector.broadcast %362 : vector<8x1xf32> to vector<8x22xf32>
    %386 = arith.subf %275, %385 : vector<8x22xf32>
    %387 = vector.broadcast %369 : vector<8x1xf32> to vector<8x22xf32>
    %388 = arith.mulf %386, %387 : vector<8x22xf32>
    %cst_251 = arith.constant 0.000000e+00 : f32
    %389 = vector.broadcast %cst_251 : f32 to vector<8x22xf32>
    %390 = arith.cmpf oge, %388, %389 : vector<8x22xf32>
    %391 = vector.broadcast %370 : vector<1x1xf32> to vector<8x22xf32>
    %392 = arith.mulf %391, %388 : vector<8x22xf32>
    %393 = arith.select %390, %388, %392 : vector<8x22xi1>, vector<8x22xf32>
    %c1_252 = arith.constant 1 : index
    %c0_253 = arith.constant 0 : index
    %c0_254 = arith.constant 0 : index
    %394 = vector.load %arg18[%c1_252, %c0_253, %c0_254] : memref<4x22x100xf32, #tpu.memory_space<vmem>>, vector<1x22x100xf32>
    %395 = vector.shape_cast %394 : vector<1x22x100xf32> to vector<22x100xf32>
    %cst_255 = arith.constant dense<0.000000e+00> : vector<8x100xf32>
    %396 = tpu.matmul %393, %395, %cst_255 {dimension_numbers = #tpu.dot_dimension_numbers<[1], [0], [0], [1], [0, 0, 1, 1], [], []>} : vector<8x22xf32>, vector<22x100xf32>, vector<8x100xf32> -> vector<8x100xf32>
    %397 = arith.addf %384, %396 : vector<8x100xf32>
    %398 = vector.broadcast %362 : vector<8x1xf32> to vector<8x22xf32>
    %399 = arith.subf %303, %398 : vector<8x22xf32>
    %400 = vector.broadcast %369 : vector<8x1xf32> to vector<8x22xf32>
    %401 = arith.mulf %399, %400 : vector<8x22xf32>
    %cst_256 = arith.constant 0.000000e+00 : f32
    %402 = vector.broadcast %cst_256 : f32 to vector<8x22xf32>
    %403 = arith.cmpf oge, %401, %402 : vector<8x22xf32>
    %404 = vector.broadcast %370 : vector<1x1xf32> to vector<8x22xf32>
    %405 = arith.mulf %404, %401 : vector<8x22xf32>
    %406 = arith.select %403, %401, %405 : vector<8x22xi1>, vector<8x22xf32>
    %c2_257 = arith.constant 2 : index
    %c0_258 = arith.constant 0 : index
    %c0_259 = arith.constant 0 : index
    %407 = vector.load %arg18[%c2_257, %c0_258, %c0_259] : memref<4x22x100xf32, #tpu.memory_space<vmem>>, vector<1x22x100xf32>
    %408 = vector.shape_cast %407 : vector<1x22x100xf32> to vector<22x100xf32>
    %cst_260 = arith.constant dense<0.000000e+00> : vector<8x100xf32>
    %409 = tpu.matmul %406, %408, %cst_260 {dimension_numbers = #tpu.dot_dimension_numbers<[1], [0], [0], [1], [0, 0, 1, 1], [], []>} : vector<8x22xf32>, vector<22x100xf32>, vector<8x100xf32> -> vector<8x100xf32>
    %410 = arith.addf %397, %409 : vector<8x100xf32>
    %411 = vector.broadcast %362 : vector<8x1xf32> to vector<8x22xf32>
    %412 = arith.subf %351, %411 : vector<8x22xf32>
    %413 = vector.broadcast %369 : vector<8x1xf32> to vector<8x22xf32>
    %414 = arith.mulf %412, %413 : vector<8x22xf32>
    %cst_261 = arith.constant 0.000000e+00 : f32
    %415 = vector.broadcast %cst_261 : f32 to vector<8x22xf32>
    %416 = arith.cmpf oge, %414, %415 : vector<8x22xf32>
    %417 = vector.broadcast %370 : vector<1x1xf32> to vector<8x22xf32>
    %418 = arith.mulf %417, %414 : vector<8x22xf32>
    %419 = arith.select %416, %414, %418 : vector<8x22xi1>, vector<8x22xf32>
    %c3_262 = arith.constant 3 : index
    %c0_263 = arith.constant 0 : index
    %c0_264 = arith.constant 0 : index
    %420 = vector.load %arg18[%c3_262, %c0_263, %c0_264] : memref<4x22x100xf32, #tpu.memory_space<vmem>>, vector<1x22x100xf32>
    %421 = vector.shape_cast %420 : vector<1x22x100xf32> to vector<22x100xf32>
    %cst_265 = arith.constant dense<0.000000e+00> : vector<8x100xf32>
    %422 = tpu.matmul %419, %421, %cst_265 {dimension_numbers = #tpu.dot_dimension_numbers<[1], [0], [0], [1], [0, 0, 1, 1], [], []>} : vector<8x22xf32>, vector<22x100xf32>, vector<8x100xf32> -> vector<8x100xf32>
    %423 = arith.addf %410, %422 : vector<8x100xf32>
    %424 = arith.truncf %80 : vector<8x100xf32> to vector<8x100xbf16>
    %425 = arith.truncf %423 : vector<8x100xf32> to vector<8x100xbf16>
    %cst_266 = arith.constant 0.000000e+00 : f32
    %426 = vector.broadcast %cst_266 : f32 to vector<2x256xf32>
    %c4_267 = arith.constant 4 : index
    %c0_268 = arith.constant 0 : index
    %c0_269 = arith.constant 0 : index
    %427 = vector.load %arg8[%c4_267, %c0_268, %c0_269] : memref<9x2x8xbf16, #tpu.memory_space<vmem>>, vector<1x2x8xbf16>
    %428 = vector.shape_cast %427 : vector<1x2x8xbf16> to vector<2x8xbf16>
    %429 = vector.extract_strided_slice %424 {offsets = [0, 11], sizes = [8, 78], strides = [1, 1]} : vector<8x100xbf16> to vector<8x78xbf16>
    %cst_270 = arith.constant dense<0.000000e+00> : vector<2x78xf32>
    %430 = tpu.matmul %428, %429, %cst_270 {dimension_numbers = #tpu.dot_dimension_numbers<[1], [0], [0], [1], [0, 0, 1, 1], [], []>} : vector<2x8xbf16>, vector<8x78xbf16>, vector<2x78xf32> -> vector<2x78xf32>
    %c4_271 = arith.constant 4 : index
    %c0_272 = arith.constant 0 : index
    %c0_273 = arith.constant 0 : index
    %431 = vector.load %arg9[%c4_271, %c0_272, %c0_273] : memref<9x2x8xbf16, #tpu.memory_space<vmem>>, vector<1x2x8xbf16>
    %432 = vector.shape_cast %431 : vector<1x2x8xbf16> to vector<2x8xbf16>
    %433 = vector.extract_strided_slice %425 {offsets = [0, 11], sizes = [8, 78], strides = [1, 1]} : vector<8x100xbf16> to vector<8x78xbf16>
    %cst_274 = arith.constant dense<0.000000e+00> : vector<2x78xf32>
    %434 = tpu.matmul %432, %433, %cst_274 {dimension_numbers = #tpu.dot_dimension_numbers<[1], [0], [0], [1], [0, 0, 1, 1], [], []>} : vector<2x8xbf16>, vector<8x78xbf16>, vector<2x78xf32> -> vector<2x78xf32>
    %435 = arith.addf %430, %434 : vector<2x78xf32>
    %c0_275 = arith.constant 0 : index
    %c0_276 = arith.constant 0 : index
    %c0_277 = arith.constant 0 : index
    %436 = vector.load %arg19[%c0_275, %c0_276, %c0_277] : memref<4x78x256xf32, #tpu.memory_space<vmem>>, vector<1x78x256xf32>
    %437 = vector.shape_cast %436 : vector<1x78x256xf32> to vector<78x256xf32>
    %cst_278 = arith.constant dense<0.000000e+00> : vector<2x256xf32>
    %438 = tpu.matmul %435, %437, %cst_278 {dimension_numbers = #tpu.dot_dimension_numbers<[1], [0], [0], [1], [0, 0, 1, 1], [], []>} : vector<2x78xf32>, vector<78x256xf32>, vector<2x256xf32> -> vector<2x256xf32>
    %439 = arith.addf %426, %438 : vector<2x256xf32>
    %c3_279 = arith.constant 3 : index
    %c0_280 = arith.constant 0 : index
    %c0_281 = arith.constant 0 : index
    %440 = vector.load %arg8[%c3_279, %c0_280, %c0_281] : memref<9x2x8xbf16, #tpu.memory_space<vmem>>, vector<1x2x8xbf16>
    %441 = vector.shape_cast %440 : vector<1x2x8xbf16> to vector<2x8xbf16>
    %442 = vector.extract_strided_slice %424 {offsets = [0, 12], sizes = [8, 78], strides = [1, 1]} : vector<8x100xbf16> to vector<8x78xbf16>
    %cst_282 = arith.constant dense<0.000000e+00> : vector<2x78xf32>
    %443 = tpu.matmul %441, %442, %cst_282 {dimension_numbers = #tpu.dot_dimension_numbers<[1], [0], [0], [1], [0, 0, 1, 1], [], []>} : vector<2x8xbf16>, vector<8x78xbf16>, vector<2x78xf32> -> vector<2x78xf32>
    %c3_283 = arith.constant 3 : index
    %c0_284 = arith.constant 0 : index
    %c0_285 = arith.constant 0 : index
    %444 = vector.load %arg9[%c3_283, %c0_284, %c0_285] : memref<9x2x8xbf16, #tpu.memory_space<vmem>>, vector<1x2x8xbf16>
    %445 = vector.shape_cast %444 : vector<1x2x8xbf16> to vector<2x8xbf16>
    %446 = vector.extract_strided_slice %425 {offsets = [0, 12], sizes = [8, 78], strides = [1, 1]} : vector<8x100xbf16> to vector<8x78xbf16>
    %cst_286 = arith.constant dense<0.000000e+00> : vector<2x78xf32>
    %447 = tpu.matmul %445, %446, %cst_286 {dimension_numbers = #tpu.dot_dimension_numbers<[1], [0], [0], [1], [0, 0, 1, 1], [], []>} : vector<2x8xbf16>, vector<8x78xbf16>, vector<2x78xf32> -> vector<2x78xf32>
    %448 = arith.addf %443, %447 : vector<2x78xf32>
    %c5_287 = arith.constant 5 : index
    %c0_288 = arith.constant 0 : index
    %c0_289 = arith.constant 0 : index
    %449 = vector.load %arg8[%c5_287, %c0_288, %c0_289] : memref<9x2x8xbf16, #tpu.memory_space<vmem>>, vector<1x2x8xbf16>
    %450 = vector.shape_cast %449 : vector<1x2x8xbf16> to vector<2x8xbf16>
    %451 = vector.extract_strided_slice %424 {offsets = [0, 11], sizes = [8, 78], strides = [1, 1]} : vector<8x100xbf16> to vector<8x78xbf16>
    %cst_290 = arith.constant dense<0.000000e+00> : vector<2x78xf32>
    %452 = tpu.matmul %450, %451, %cst_290 {dimension_numbers = #tpu.dot_dimension_numbers<[1], [0], [0], [1], [0, 0, 1, 1], [], []>} : vector<2x8xbf16>, vector<8x78xbf16>, vector<2x78xf32> -> vector<2x78xf32>
    %c5_291 = arith.constant 5 : index
    %c0_292 = arith.constant 0 : index
    %c0_293 = arith.constant 0 : index
    %453 = vector.load %arg9[%c5_291, %c0_292, %c0_293] : memref<9x2x8xbf16, #tpu.memory_space<vmem>>, vector<1x2x8xbf16>
    %454 = vector.shape_cast %453 : vector<1x2x8xbf16> to vector<2x8xbf16>
    %455 = vector.extract_strided_slice %425 {offsets = [0, 11], sizes = [8, 78], strides = [1, 1]} : vector<8x100xbf16> to vector<8x78xbf16>
    %cst_294 = arith.constant dense<0.000000e+00> : vector<2x78xf32>
    %456 = tpu.matmul %454, %455, %cst_294 {dimension_numbers = #tpu.dot_dimension_numbers<[1], [0], [0], [1], [0, 0, 1, 1], [], []>} : vector<2x8xbf16>, vector<8x78xbf16>, vector<2x78xf32> -> vector<2x78xf32>
    %457 = arith.addf %452, %456 : vector<2x78xf32>
    %458 = arith.addf %448, %457 : vector<2x78xf32>
    %c1_295 = arith.constant 1 : index
    %c0_296 = arith.constant 0 : index
    %c0_297 = arith.constant 0 : index
    %459 = vector.load %arg19[%c1_295, %c0_296, %c0_297] : memref<4x78x256xf32, #tpu.memory_space<vmem>>, vector<1x78x256xf32>
    %460 = vector.shape_cast %459 : vector<1x78x256xf32> to vector<78x256xf32>
    %cst_298 = arith.constant dense<0.000000e+00> : vector<2x256xf32>
    %461 = tpu.matmul %458, %460, %cst_298 {dimension_numbers = #tpu.dot_dimension_numbers<[1], [0], [0], [1], [0, 0, 1, 1], [], []>} : vector<2x78xf32>, vector<78x256xf32>, vector<2x256xf32> -> vector<2x256xf32>
    %462 = arith.addf %439, %461 : vector<2x256xf32>
    %c1_299 = arith.constant 1 : index
    %c0_300 = arith.constant 0 : index
    %c0_301 = arith.constant 0 : index
    %463 = vector.load %arg8[%c1_299, %c0_300, %c0_301] : memref<9x2x8xbf16, #tpu.memory_space<vmem>>, vector<1x2x8xbf16>
    %464 = vector.shape_cast %463 : vector<1x2x8xbf16> to vector<2x8xbf16>
    %465 = vector.extract_strided_slice %424 {offsets = [0, 21], sizes = [8, 78], strides = [1, 1]} : vector<8x100xbf16> to vector<8x78xbf16>
    %cst_302 = arith.constant dense<0.000000e+00> : vector<2x78xf32>
    %466 = tpu.matmul %464, %465, %cst_302 {dimension_numbers = #tpu.dot_dimension_numbers<[1], [0], [0], [1], [0, 0, 1, 1], [], []>} : vector<2x8xbf16>, vector<8x78xbf16>, vector<2x78xf32> -> vector<2x78xf32>
    %c1_303 = arith.constant 1 : index
    %c0_304 = arith.constant 0 : index
    %c0_305 = arith.constant 0 : index
    %467 = vector.load %arg9[%c1_303, %c0_304, %c0_305] : memref<9x2x8xbf16, #tpu.memory_space<vmem>>, vector<1x2x8xbf16>
    %468 = vector.shape_cast %467 : vector<1x2x8xbf16> to vector<2x8xbf16>
    %469 = vector.extract_strided_slice %425 {offsets = [0, 21], sizes = [8, 78], strides = [1, 1]} : vector<8x100xbf16> to vector<8x78xbf16>
    %cst_306 = arith.constant dense<0.000000e+00> : vector<2x78xf32>
    %470 = tpu.matmul %468, %469, %cst_306 {dimension_numbers = #tpu.dot_dimension_numbers<[1], [0], [0], [1], [0, 0, 1, 1], [], []>} : vector<2x8xbf16>, vector<8x78xbf16>, vector<2x78xf32> -> vector<2x78xf32>
    %471 = arith.addf %466, %470 : vector<2x78xf32>
    %c7_307 = arith.constant 7 : index
    %c0_308 = arith.constant 0 : index
    %c0_309 = arith.constant 0 : index
    %472 = vector.load %arg8[%c7_307, %c0_308, %c0_309] : memref<9x2x8xbf16, #tpu.memory_space<vmem>>, vector<1x2x8xbf16>
    %473 = vector.shape_cast %472 : vector<1x2x8xbf16> to vector<2x8xbf16>
    %474 = vector.extract_strided_slice %424 {offsets = [0, 11], sizes = [8, 78], strides = [1, 1]} : vector<8x100xbf16> to vector<8x78xbf16>
    %cst_310 = arith.constant dense<0.000000e+00> : vector<2x78xf32>
    %475 = tpu.matmul %473, %474, %cst_310 {dimension_numbers = #tpu.dot_dimension_numbers<[1], [0], [0], [1], [0, 0, 1, 1], [], []>} : vector<2x8xbf16>, vector<8x78xbf16>, vector<2x78xf32> -> vector<2x78xf32>
    %c7_311 = arith.constant 7 : index
    %c0_312 = arith.constant 0 : index
    %c0_313 = arith.constant 0 : index
    %476 = vector.load %arg9[%c7_311, %c0_312, %c0_313] : memref<9x2x8xbf16, #tpu.memory_space<vmem>>, vector<1x2x8xbf16>
    %477 = vector.shape_cast %476 : vector<1x2x8xbf16> to vector<2x8xbf16>
    %478 = vector.extract_strided_slice %425 {offsets = [0, 11], sizes = [8, 78], strides = [1, 1]} : vector<8x100xbf16> to vector<8x78xbf16>
    %cst_314 = arith.constant dense<0.000000e+00> : vector<2x78xf32>
    %479 = tpu.matmul %477, %478, %cst_314 {dimension_numbers = #tpu.dot_dimension_numbers<[1], [0], [0], [1], [0, 0, 1, 1], [], []>} : vector<2x8xbf16>, vector<8x78xbf16>, vector<2x78xf32> -> vector<2x78xf32>
    %480 = arith.addf %475, %479 : vector<2x78xf32>
    %481 = arith.addf %471, %480 : vector<2x78xf32>
    %c2_315 = arith.constant 2 : index
    %c0_316 = arith.constant 0 : index
    %c0_317 = arith.constant 0 : index
    %482 = vector.load %arg19[%c2_315, %c0_316, %c0_317] : memref<4x78x256xf32, #tpu.memory_space<vmem>>, vector<1x78x256xf32>
    %483 = vector.shape_cast %482 : vector<1x78x256xf32> to vector<78x256xf32>
    %cst_318 = arith.constant dense<0.000000e+00> : vector<2x256xf32>
    %484 = tpu.matmul %481, %483, %cst_318 {dimension_numbers = #tpu.dot_dimension_numbers<[1], [0], [0], [1], [0, 0, 1, 1], [], []>} : vector<2x78xf32>, vector<78x256xf32>, vector<2x256xf32> -> vector<2x256xf32>
    %485 = arith.addf %462, %484 : vector<2x256xf32>
    %c0_319 = arith.constant 0 : index
    %c0_320 = arith.constant 0 : index
    %c0_321 = arith.constant 0 : index
    %486 = vector.load %arg8[%c0_319, %c0_320, %c0_321] : memref<9x2x8xbf16, #tpu.memory_space<vmem>>, vector<1x2x8xbf16>
    %487 = vector.shape_cast %486 : vector<1x2x8xbf16> to vector<2x8xbf16>
    %488 = vector.extract_strided_slice %424 {offsets = [0, 22], sizes = [8, 78], strides = [1, 1]} : vector<8x100xbf16> to vector<8x78xbf16>
    %cst_322 = arith.constant dense<0.000000e+00> : vector<2x78xf32>
    %489 = tpu.matmul %487, %488, %cst_322 {dimension_numbers = #tpu.dot_dimension_numbers<[1], [0], [0], [1], [0, 0, 1, 1], [], []>} : vector<2x8xbf16>, vector<8x78xbf16>, vector<2x78xf32> -> vector<2x78xf32>
    %c0_323 = arith.constant 0 : index
    %c0_324 = arith.constant 0 : index
    %c0_325 = arith.constant 0 : index
    %490 = vector.load %arg9[%c0_323, %c0_324, %c0_325] : memref<9x2x8xbf16, #tpu.memory_space<vmem>>, vector<1x2x8xbf16>
    %491 = vector.shape_cast %490 : vector<1x2x8xbf16> to vector<2x8xbf16>
    %492 = vector.extract_strided_slice %425 {offsets = [0, 22], sizes = [8, 78], strides = [1, 1]} : vector<8x100xbf16> to vector<8x78xbf16>
    %cst_326 = arith.constant dense<0.000000e+00> : vector<2x78xf32>
    %493 = tpu.matmul %491, %492, %cst_326 {dimension_numbers = #tpu.dot_dimension_numbers<[1], [0], [0], [1], [0, 0, 1, 1], [], []>} : vector<2x8xbf16>, vector<8x78xbf16>, vector<2x78xf32> -> vector<2x78xf32>
    %494 = arith.addf %489, %493 : vector<2x78xf32>
    %c2_327 = arith.constant 2 : index
    %c0_328 = arith.constant 0 : index
    %c0_329 = arith.constant 0 : index
    %495 = vector.load %arg8[%c2_327, %c0_328, %c0_329] : memref<9x2x8xbf16, #tpu.memory_space<vmem>>, vector<1x2x8xbf16>
    %496 = vector.shape_cast %495 : vector<1x2x8xbf16> to vector<2x8xbf16>
    %497 = vector.extract_strided_slice %424 {offsets = [0, 21], sizes = [8, 78], strides = [1, 1]} : vector<8x100xbf16> to vector<8x78xbf16>
    %cst_330 = arith.constant dense<0.000000e+00> : vector<2x78xf32>
    %498 = tpu.matmul %496, %497, %cst_330 {dimension_numbers = #tpu.dot_dimension_numbers<[1], [0], [0], [1], [0, 0, 1, 1], [], []>} : vector<2x8xbf16>, vector<8x78xbf16>, vector<2x78xf32> -> vector<2x78xf32>
    %c2_331 = arith.constant 2 : index
    %c0_332 = arith.constant 0 : index
    %c0_333 = arith.constant 0 : index
    %499 = vector.load %arg9[%c2_331, %c0_332, %c0_333] : memref<9x2x8xbf16, #tpu.memory_space<vmem>>, vector<1x2x8xbf16>
    %500 = vector.shape_cast %499 : vector<1x2x8xbf16> to vector<2x8xbf16>
    %501 = vector.extract_strided_slice %425 {offsets = [0, 21], sizes = [8, 78], strides = [1, 1]} : vector<8x100xbf16> to vector<8x78xbf16>
    %cst_334 = arith.constant dense<0.000000e+00> : vector<2x78xf32>
    %502 = tpu.matmul %500, %501, %cst_334 {dimension_numbers = #tpu.dot_dimension_numbers<[1], [0], [0], [1], [0, 0, 1, 1], [], []>} : vector<2x8xbf16>, vector<8x78xbf16>, vector<2x78xf32> -> vector<2x78xf32>
    %503 = arith.addf %498, %502 : vector<2x78xf32>
    %504 = arith.addf %494, %503 : vector<2x78xf32>
    %c6_335 = arith.constant 6 : index
    %c0_336 = arith.constant 0 : index
    %c0_337 = arith.constant 0 : index
    %505 = vector.load %arg8[%c6_335, %c0_336, %c0_337] : memref<9x2x8xbf16, #tpu.memory_space<vmem>>, vector<1x2x8xbf16>
    %506 = vector.shape_cast %505 : vector<1x2x8xbf16> to vector<2x8xbf16>
    %507 = vector.extract_strided_slice %424 {offsets = [0, 12], sizes = [8, 78], strides = [1, 1]} : vector<8x100xbf16> to vector<8x78xbf16>
    %cst_338 = arith.constant dense<0.000000e+00> : vector<2x78xf32>
    %508 = tpu.matmul %506, %507, %cst_338 {dimension_numbers = #tpu.dot_dimension_numbers<[1], [0], [0], [1], [0, 0, 1, 1], [], []>} : vector<2x8xbf16>, vector<8x78xbf16>, vector<2x78xf32> -> vector<2x78xf32>
    %c6_339 = arith.constant 6 : index
    %c0_340 = arith.constant 0 : index
    %c0_341 = arith.constant 0 : index
    %509 = vector.load %arg9[%c6_339, %c0_340, %c0_341] : memref<9x2x8xbf16, #tpu.memory_space<vmem>>, vector<1x2x8xbf16>
    %510 = vector.shape_cast %509 : vector<1x2x8xbf16> to vector<2x8xbf16>
    %511 = vector.extract_strided_slice %425 {offsets = [0, 12], sizes = [8, 78], strides = [1, 1]} : vector<8x100xbf16> to vector<8x78xbf16>
    %cst_342 = arith.constant dense<0.000000e+00> : vector<2x78xf32>
    %512 = tpu.matmul %510, %511, %cst_342 {dimension_numbers = #tpu.dot_dimension_numbers<[1], [0], [0], [1], [0, 0, 1, 1], [], []>} : vector<2x8xbf16>, vector<8x78xbf16>, vector<2x78xf32> -> vector<2x78xf32>
    %513 = arith.addf %508, %512 : vector<2x78xf32>
    %514 = arith.addf %504, %513 : vector<2x78xf32>
    %c8_343 = arith.constant 8 : index
    %c0_344 = arith.constant 0 : index
    %c0_345 = arith.constant 0 : index
    %515 = vector.load %arg8[%c8_343, %c0_344, %c0_345] : memref<9x2x8xbf16, #tpu.memory_space<vmem>>, vector<1x2x8xbf16>
    %516 = vector.shape_cast %515 : vector<1x2x8xbf16> to vector<2x8xbf16>
    %517 = vector.extract_strided_slice %424 {offsets = [0, 11], sizes = [8, 78], strides = [1, 1]} : vector<8x100xbf16> to vector<8x78xbf16>
    %cst_346 = arith.constant dense<0.000000e+00> : vector<2x78xf32>
    %518 = tpu.matmul %516, %517, %cst_346 {dimension_numbers = #tpu.dot_dimension_numbers<[1], [0], [0], [1], [0, 0, 1, 1], [], []>} : vector<2x8xbf16>, vector<8x78xbf16>, vector<2x78xf32> -> vector<2x78xf32>
    %c8_347 = arith.constant 8 : index
    %c0_348 = arith.constant 0 : index
    %c0_349 = arith.constant 0 : index
    %519 = vector.load %arg9[%c8_347, %c0_348, %c0_349] : memref<9x2x8xbf16, #tpu.memory_space<vmem>>, vector<1x2x8xbf16>
    %520 = vector.shape_cast %519 : vector<1x2x8xbf16> to vector<2x8xbf16>
    %521 = vector.extract_strided_slice %425 {offsets = [0, 11], sizes = [8, 78], strides = [1, 1]} : vector<8x100xbf16> to vector<8x78xbf16>
    %cst_350 = arith.constant dense<0.000000e+00> : vector<2x78xf32>
    %522 = tpu.matmul %520, %521, %cst_350 {dimension_numbers = #tpu.dot_dimension_numbers<[1], [0], [0], [1], [0, 0, 1, 1], [], []>} : vector<2x8xbf16>, vector<8x78xbf16>, vector<2x78xf32> -> vector<2x78xf32>
    %523 = arith.addf %518, %522 : vector<2x78xf32>
    %524 = arith.addf %514, %523 : vector<2x78xf32>
    %c3_351 = arith.constant 3 : index
    %c0_352 = arith.constant 0 : index
    %c0_353 = arith.constant 0 : index
    %525 = vector.load %arg19[%c3_351, %c0_352, %c0_353] : memref<4x78x256xf32, #tpu.memory_space<vmem>>, vector<1x78x256xf32>
    %526 = vector.shape_cast %525 : vector<1x78x256xf32> to vector<78x256xf32>
    %cst_354 = arith.constant dense<0.000000e+00> : vector<2x256xf32>
    %527 = tpu.matmul %524, %526, %cst_354 {dimension_numbers = #tpu.dot_dimension_numbers<[1], [0], [0], [1], [0, 0, 1, 1], [], []>} : vector<2x78xf32>, vector<78x256xf32>, vector<2x256xf32> -> vector<2x256xf32>
    %528 = arith.addf %485, %527 : vector<2x256xf32>
    %c0_355 = arith.constant 0 : index
    %c0_356 = arith.constant 0 : index
    %529 = vector.load %arg10[%c0_355, %c0_356] : memref<2x1xf32, #tpu.memory_space<vmem>>, vector<2x1xf32>
    %530 = vector.broadcast %529 : vector<2x1xf32> to vector<2x256xf32>
    %531 = arith.addf %528, %530 : vector<2x256xf32>
    %c0_357 = arith.constant 0 : index
    %c0_358 = arith.constant 0 : index
    %c0_359 = arith.constant 0 : index
    %532 = vector.load %arg20[%c0_357, %c0_358, %c0_359] : memref<1x2x256xf32, #tpu.memory_space<vmem>>, vector<1x2x256xf32>
    %533 = vector.shape_cast %532 : vector<1x2x256xf32> to vector<2x256xf32>
    %534 = vector.shape_cast %531 : vector<2x256xf32> to vector<1x2x256xf32>
    tpu.vector_store %arg20[%c0_357, %c0_358, %c0_359], %534 {strides = array<i32>} : memref<1x2x256xf32, #tpu.memory_space<vmem>>, vector<1x2x256xf32>,
    return
  }
  func.func @transform_0(%arg0: i32) -> (i32, i32) {
    %c0_i32 = arith.constant 0 : i32
    %c0_i32_0 = arith.constant 0 : i32
    %c0_i32_1 = arith.constant 0 : i32
    return %c0_i32, %c0_i32_0 : i32, i32
  }
  func.func @transform_1(%arg0: i32) -> (i32, i32, i32, i32) {
    %c0_i32 = arith.constant 0 : i32
    %c0_i32_0 = arith.constant 0 : i32
    %c0_i32_1 = arith.constant 0 : i32
    %c0_i32_2 = arith.constant 0 : i32
    return %arg0, %c0_i32, %c0_i32_0, %c0_i32_1 : i32, i32, i32, i32
  }
  func.func @transform_2(%arg0: i32) -> (i32, i32, i32) {
    %c0_i32 = arith.constant 0 : i32
    %c0_i32_0 = arith.constant 0 : i32
    %c0_i32_1 = arith.constant 0 : i32
    %c0_i32_2 = arith.constant 0 : i32
    return %c0_i32, %c0_i32_0, %c0_i32_1 : i32, i32, i32
  }
  func.func @transform_3(%arg0: i32) -> (i32, i32, i32) {
    %c0_i32 = arith.constant 0 : i32
    %c0_i32_0 = arith.constant 0 : i32
    %c0_i32_1 = arith.constant 0 : i32
    %c0_i32_2 = arith.constant 0 : i32
    return %c0_i32, %c0_i32_0, %c0_i32_1 : i32, i32, i32
  }
  func.func @transform_4(%arg0: i32) -> (i32, i32, i32) {
    %c0_i32 = arith.constant 0 : i32
    %c0_i32_0 = arith.constant 0 : i32
    %c0_i32_1 = arith.constant 0 : i32
    %c0_i32_2 = arith.constant 0 : i32
    return %c0_i32, %c0_i32_0, %c0_i32_1 : i32, i32, i32
  }
  func.func @transform_5(%arg0: i32) -> (i32, i32, i32) {
    %c0_i32 = arith.constant 0 : i32
    %c0_i32_0 = arith.constant 0 : i32
    %c0_i32_1 = arith.constant 0 : i32
    %c0_i32_2 = arith.constant 0 : i32
    return %c0_i32, %c0_i32_0, %c0_i32_1 : i32, i32, i32
  }
  func.func @transform_6(%arg0: i32) -> (i32, i32, i32) {
    %c0_i32 = arith.constant 0 : i32
    %c0_i32_0 = arith.constant 0 : i32
    %c0_i32_1 = arith.constant 0 : i32
    %c0_i32_2 = arith.constant 0 : i32
    return %c0_i32, %c0_i32_0, %c0_i32_1 : i32, i32, i32
  }
  func.func @transform_7(%arg0: i32) -> (i32, i32, i32) {
    %c0_i32 = arith.constant 0 : i32
    %c0_i32_0 = arith.constant 0 : i32
    %c0_i32_1 = arith.constant 0 : i32
    %c0_i32_2 = arith.constant 0 : i32
    return %c0_i32, %c0_i32_0, %c0_i32_1 : i32, i32, i32
  }
  func.func @transform_8(%arg0: i32) -> (i32, i32, i32) {
    %c0_i32 = arith.constant 0 : i32
    %c0_i32_0 = arith.constant 0 : i32
    %c0_i32_1 = arith.constant 0 : i32
    %c0_i32_2 = arith.constant 0 : i32
    return %c0_i32, %c0_i32_0, %c0_i32_1 : i32, i32, i32
  }
  func.func @transform_9(%arg0: i32) -> (i32, i32) {
    %c0_i32 = arith.constant 0 : i32
    %c0_i32_0 = arith.constant 0 : i32
    %c0_i32_1 = arith.constant 0 : i32
    return %c0_i32, %c0_i32_0 : i32, i32
  }
  func.func @transform_10(%arg0: i32) -> (i32, i32) {
    %c0_i32 = arith.constant 0 : i32
    %c0_i32_0 = arith.constant 0 : i32
    %c0_i32_1 = arith.constant 0 : i32
    return %c0_i32, %c0_i32_0 : i32, i32
  }
  func.func @transform_11(%arg0: i32) -> (i32, i32) {
    %c0_i32 = arith.constant 0 : i32
    %c0_i32_0 = arith.constant 0 : i32
    %c0_i32_1 = arith.constant 0 : i32
    return %c0_i32, %c0_i32_0 : i32, i32
  }
  func.func @transform_12(%arg0: i32) -> (i32, i32) {
    %c0_i32 = arith.constant 0 : i32
    %c0_i32_0 = arith.constant 0 : i32
    %c0_i32_1 = arith.constant 0 : i32
    return %c0_i32, %c0_i32_0 : i32, i32
  }
  func.func @transform_13(%arg0: i32) -> (i32, i32) {
    %c0_i32 = arith.constant 0 : i32
    %c0_i32_0 = arith.constant 0 : i32
    %c0_i32_1 = arith.constant 0 : i32
    return %c0_i32, %c0_i32_0 : i32, i32
  }
  func.func @transform_14(%arg0: i32) -> (i32, i32) {
    %c0_i32 = arith.constant 0 : i32
    %c0_i32_0 = arith.constant 0 : i32
    %c0_i32_1 = arith.constant 0 : i32
    return %c0_i32, %c0_i32_0 : i32, i32
  }
  func.func @transform_15(%arg0: i32) -> (i32, i32) {
    %c0_i32 = arith.constant 0 : i32
    %c0_i32_0 = arith.constant 0 : i32
    %c0_i32_1 = arith.constant 0 : i32
    return %c0_i32, %c0_i32_0 : i32, i32
  }
  func.func @transform_16(%arg0: i32) -> (i32, i32) {
    %c0_i32 = arith.constant 0 : i32
    %c0_i32_0 = arith.constant 0 : i32
    %c0_i32_1 = arith.constant 0 : i32
    return %c0_i32, %c0_i32_0 : i32, i32
  }
  func.func @transform_17(%arg0: i32) -> (i32, i32, i32) {
    %c0_i32 = arith.constant 0 : i32
    %c0_i32_0 = arith.constant 0 : i32
    %c0_i32_1 = arith.constant 0 : i32
    %c0_i32_2 = arith.constant 0 : i32
    return %c0_i32, %c0_i32_0, %c0_i32_1 : i32, i32, i32
  }
  func.func @transform_18(%arg0: i32) -> (i32, i32, i32) {
    %c0_i32 = arith.constant 0 : i32
    %c0_i32_0 = arith.constant 0 : i32
    %c0_i32_1 = arith.constant 0 : i32
    %c0_i32_2 = arith.constant 0 : i32
    return %c0_i32, %c0_i32_0, %c0_i32_1 : i32, i32, i32
  }
  func.func @transform_19(%arg0: i32) -> (i32, i32, i32) {
    %c0_i32 = arith.constant 0 : i32
    %c0_i32_0 = arith.constant 0 : i32
    %c0_i32_1 = arith.constant 0 : i32
    return %arg0, %c0_i32, %c0_i32_0 : i32, i32, i32
  }
}

</mosaic_0001>

<bundles_post_ra>
// kernel: unet_forward.1
= control target key start
LH: loop header
LB: loop body
LE: loop exit
PB: predicated region body
PF: predicated region fallthrough
CT: control target
= control target key end

     0   :  { %s4751_s0 = inlined_call_operand.vmem [shape: f32[1,4], index: 0, kind: input, shape index: {}]   ;;  %s4752_s1 = inlined_call_operand.vmem [shape: bf16[2,4,4,81], index: 1, kind: input, shape index: {}]   ;;  %s4753_s2 = inlined_call_operand.vmem [shape: bf16[9,8,4], index: 2, kind: input, shape index: {}]   ;;  %s4754_s3 = inlined_call_operand.vmem [shape: bf16[9,16,8], index: 3, kind: input, shape index: {}]   ;;  %s4755_s4 = inlined_call_operand.vmem [shape: bf16[9,32,16], index: 4, kind: input, shape index: {}]   ;;  %s4756_s5 = inlined_call_operand.vmem [shape: bf16[9,8,16], index: 5, kind: input, shape index: {}]   ;;  %s4757_s6 = inlined_call_operand.vmem [shape: bf16[9,8,32], index: 6, kind: input, shape index: {}]   ;;  %s4758_s7 = inlined_call_operand.vmem [shape: bf16[9,2,8], index: 7, kind: input, shape index: {}]   ;;  %s4759_s8 = inlined_call_operand.vmem [shape: bf16[9,2,8], index: 8, kind: input, shape index: {}]   ;;  %s4760_s9 = inlined_call_operand.vmem [shape: f32[2,1], index: 9, kind: input, shape index: {}]   ;;  %s4761_s10 = inlined_call_operand.vmem [shape: f32[1,71], index: 10, kind: input, shape index: {}]   ;;  %s4762_s11 = inlined_call_operand.vmem [shape: f32[1,19], index: 11, kind: input, shape index: {}]   ;;  %s4763_s12 = inlined_call_operand.vmem [shape: f32[1,22], index: 12, kind: input, shape index: {}]   ;;  %s4764_s13 = inlined_call_operand.vmem [shape: f32[71,100], index: 13, kind: input, shape index: {}]   ;;  %s4765_s14 = inlined_call_operand.vmem [shape: f32[71,100], index: 14, kind: input, shape index: {}]   ;;  %s4766_s15 = inlined_call_operand.vmem [shape: f32[19,36], index: 15, kind: input, shape index: {}]   ;;  %s4767_s16 = inlined_call_operand.vmem [shape: f32[22,36], index: 16, kind: input, shape index: {}]   ;;  %s4768_s17 = inlined_call_operand.vmem [shape: f32[4,22,100], index: 17, kind: input, shape index: {}]   ;;  %s4769_s18 = inlined_call_operand.vmem [shape: f32[4,78,256], index: 18, kind: input, shape index: {}]   ;;  %s4770_s19 = inlined_call_operand.vmem [shape: f32[2,2,256], index: 19, kind: output, shape index: {}]  }
   0x1   :  { %4782 = sst [smem:[#allocation2_spill]] %s4751_s0  ;;  %s3841_s0 = smov 0  }
   0x2   :  { %4783 = sst [smem:[#allocation3_spill]] %s4752_s1 }
   0x3   :  { %4784 = sst [smem:[#allocation4_spill]] %s4753_s2 }
   0x4   :  { %4785 = sst [smem:[#allocation5_spill]] %s4754_s3 }
   0x5 LB: > { %s3226_s30 = sadd.s32 4294967295, %s3714_s0   ;;  %p3230_p0 = scmp.ge.s32.totalorder %s3714_s0, 1  ;;  %s3714_s0 = sphi %s3841_s0, %s29_s0  }
   0x6   : > { %p537_p1 = scmp.lt.s32.totalorder %s3714_s0, 3 }
   0x8   : > { %p538_p2 = pnand %p3230_p0, %p537_p1 }
   0x9   : > { %p593_p3 = scmp.lt.s32.totalorder (!%p538_p2), %s3226_s30, 1  ;;  %s4786_s22 = sld [smem:[#allocation3_spill]] (!%p538_p2) }
   0xa   : > { %541 = sbr.rel (%p538_p2) target bundleno = 3131 (0xc3b), region = 96  ;;  %s3716_s23 = smov (!%p538_p2), 127  }
   0xb   : > { %s4787_s3 = sld [smem:[#allocation4_spill]] (!%p538_p2)  ;;  %s3717_s26 = smov (!%p538_p2), 119  }
   0xc   : > { %s3718_s27 = smov (!%p538_p2), 118   ;;  %s4788_s25 = sld [smem:[#allocation2_spill]] (!%p538_p2) }
   0xd   : > { %s3722_s24 = smov (!%p538_p2), 123   ;;  %s3726_s28 = smov (!%p538_p2), 77  }
   0xe   : > { %s3727_s29 = smov (!%p538_p2), 98   ;;  %s4789_s1 = sld [smem:[#allocation5_spill]] (!%p538_p2) }
   0xf   : > { %s4795_s30 = smov (!%p593_p3, %s3226_s30), 1  ;;  %vm618_vm0 = vcmask 1041408   ;;  %vm614_vm1 = vcmask 31744   ;;  %v3719_v44 = vmov 0   ;;  %v3683_v57 = vld [vmem:[%s4761_s10] ss:$0 sm:$0xff] }
  0x10   : > { %s3613_s20 = sshll.u32 %s4795_s30, 3  ;;  %3678 = vset.pattern.permute.xlu1 %v3719_v44  ;;  %3682 = vset.pattern.permute.xlu0 %v3719_v44  ;;  %vm839_vm2 = vcmask 580608   ;;  %vm892_vm3 = vcmask 1046528   ;;  %vm968_vm9 = vcmask 1043456   ;;  %vm964_vm10 = vcmask 64512   ;;  %s4791_s21 = smov 115  }
  0x11   : > { %s3855_s2 = scalar_lea.vmem %s4786_s22, %s3613_s20  ;;  %v3238_v5 = vld [vmem:[%s4787_s3 + $0x4] sm:$0xf]  ;;  %v3243_v12 = vld [vmem:[%s4787_s3 + $0xc] sm:$0xf]  ;;  %v611_v13 = vld [vmem:[%s4787_s3] sm:$0xf] }
  0x12   : > { %v604_v0 = vld [vmem:[%s3855_s2] sm:$0x3]  ;;  %v3236_v1 = vld [vmem:[%s3855_s2 + $0x4] sm:$0x3]  ;;  %v3235_v3 = vld [vmem:[%s3855_s2 + $0x2] sm:$0x3] }
  0x13   : > { %656 = vst [vmem:[#allocation1] ss:$4 sm:$0xff] %v604_v0  ;;  %v620_v4 = vsel %vm618_vm0, %v3235_v3, 0  ;;  %v687_v10 = vsel %vm618_vm0, %v3236_v1, 0  ;;  %v639_v11 = vsel %vm618_vm0, %v604_v0, 0  ;;  %s3721_s22 = smov 122  }
  0x14   : > { %629 = vmatpush.bf16.msra.mxu0 %v620_v4  ;;  %696 = vmatpush.bf16.msra.mxu3 %v687_v10  ;;  %v3237_v14 = vld [vmem:[%s3855_s2 + $0x6] sm:$0x3]  ;;  %v3245_v16 = vld [vmem:[%s4787_s3 + $0x10] sm:$0xf]  ;;  %v3241_v19 = vld [vmem:[%s4787_s3 + $0x8] sm:$0xf] }
  0x15   : > { %648 = vmatpush.bf16.msra.mxu1 %v639_v11  ;;  %v709_v15 = vsel %vm618_vm0, %v3237_v14, 0  ;;  %v3253_v22 = vld [vmem:[%s4787_s3 + $0x20] sm:$0xf]  ;;  %v3249_v26 = vld [vmem:[%s4787_s3 + $0x18] sm:$0xf]  ;;  %v922_v10 = vld [vmem:[%s4765_s14 + $0x30] sm:$0xff] }
  0x16   : > { %v3251_v30 = vld [vmem:[%s4787_s3 + $0x1c] sm:$0xf]  ;;  %v3247_v33 = vld [vmem:[%s4787_s3 + $0x14] sm:$0xf]  ;;  %v3911_v43 = vld [vmem:[%s4788_s25] ss:$0 sm:$0xff] }
  0x17   : > { %3239 = vmatmul.msk.bf16.vlgmr.msra.gmra.mxu0 %vm614_vm1, %v3238_v5  ;;  %3244 = vmatmul.msk.bf16.vlgmr.msra.gmra.mxu3 %vm614_vm1, %v3243_v12  ;;  %v888_v4 = vld [vmem:[%s4764_s13 + $0x40] sm:$0x7f]  ;;  %v885_v11 = vld [vmem:[%s4764_s13 + $0x28] sm:$0xff]  ;;  %s3723_s2 = smov 103   ;;  %vm1241_vm11 = vcmask 154624   ;;  %vm1316_vm12 = vcmask 1042432  }
  0x18   : > { %718 = vmatpush.bf16.msrb.mxu0 %v709_v15  ;;  %3240 = vmatmul.msk.bf16.vlgmr.msra.gmra.mxu1 %vm614_vm1, %v611_v13  ;;  %v924_v5 = vld [vmem:[%s4765_s14 + $0x40] sm:$0x7f]  ;;  %v921_v12 = vld [vmem:[%s4765_s14 + $0x28] sm:$0xff]  ;;  %s4790_s20 = smov 114  }
  0x19   : > { %v884_v14 = vld [vmem:[%s4764_s13 + $0x20] sm:$0xff] }
  0x1a   : > { %v657_v2 = vld.sshfl [vmem:[#allocation1] sm:$0xff pattern:$0x73625140] }
  0x1b   : > { %659 = vrot.lane.b32.xlu0 %v657_v2, %s3716_s23  ;;  %727 = vst [vmem:[#allocation1] ss:$4 sm:$0xff] %v3236_v1  ;;  %v3720_v1 = vmov 64.0   ;;  %v920_v15 = vld [vmem:[%s4765_s14 + $0x20] sm:$0xff] }
  0x1c   : > { %3687 = vrcp.f32 %v3720_v1 }
  0x22   : > { %v728_v6 = vld.sshfl [vmem:[#allocation1] sm:$0xff pattern:$0x73625140]  ;;  %v3688_v2 = vpop.eup %3687 }
  0x23   : > { %754 = vst [vmem:[#allocation1] ss:$4 sm:$0xff] %v604_v0  ;;  %vm852_vm4 = vweird.f32 %v3688_v2 }
  0x27   : > { %3246 = vmatmul.msk.bf16.vlgmr.msrb.gmra.mxu0 %vm614_vm1, %v3245_v16  ;;  %v883_v16 = vld [vmem:[%s4764_s13 + $0x18] sm:$0xff] }
  0x2a   : > { %v755_v7 = vld.sshfl [vmem:[#allocation1] sm:$0xff pattern:$0x73625140] }
  0x2b   : > { %757 = vrot.lane.b32.xlu0 %v755_v7, %s3717_s26  ;;  %781 = vst [vmem:[#allocation1] ss:$4 sm:$0xff] %v3235_v3  ;;  %v848_v3 = vmul.f32 64.0, %v3688_v2  ;;  %v923_v7 = vld [vmem:[%s4765_s14 + $0x38] sm:$0xff] }
  0x32   : > { %v782_v8 = vld.sshfl [vmem:[#allocation1] sm:$0xff pattern:$0x73625140] }
  0x33   : > { %784 = vrot.lane.b32.xlu1 %v782_v8, %s3717_s26  ;;  %808 = vst [vmem:[#allocation1] ss:$4 sm:$0xff] %v604_v0  ;;  %v849_v8 = vsub.f32 1.0, %v848_v3  ;;  %s3724_s26 = smov 53   ;;  %v3618_v3 = vld [vmem:[%s4789_s1 + $0x18] sm:$0xff] }
  0x35   : > { %v850_v13 = vmul.f32 %v3688_v2, %v849_v8  ;;  %v3623_v8 = vld [vmem:[%s4789_s1 + $0x40] sm:$0xff] }
  0x3a   : > { %v809_v9 = vld.sshfl [vmem:[#allocation1] sm:$0xff pattern:$0x73625140] }
  0x3b   : > { %730 = vrot.lane.b32.xlu1 %v728_v6, %s3716_s23  ;;  %811 = vrot.lane.b32.xlu2 %v809_v9, %s3718_s27  ;;  %v887_v6 = vld [vmem:[%s4764_s13 + $0x38] sm:$0xff]  ;;  %v886_v9 = vld [vmem:[%s4764_s13 + $0x30] sm:$0xff]  ;;  %s3725_s27 = smov 78  }
  0x43   : > { %875 = vperm.xlu1 %3678, %v3911_v43  }
  0x8d   : > { %v660_v17 = vpop.permute.xlu0 %659 }
  0x8e   : > { %v665_v18 = vsel %vm618_vm0, %v660_v17, 0  ;;  %v919_v17 = vld [vmem:[%s4765_s14 + $0x18] sm:$0xff] }
  0x8f   : > { %674 = vmatpush.bf16.msra.mxu2 %v665_v18  ;;  %v882_v18 = vld [vmem:[%s4764_s13 + $0x10] sm:$0xff] }
  0x92   : > { %3242 = vmatmul.msk.bf16.vlgmr.msra.gmra.mxu2 %vm614_vm1, %v3241_v19  ;;  %v918_v19 = vld [vmem:[%s4765_s14 + $0x10] sm:$0xff] }
  0x94   : > { %v631_v24 = vpop.f32.mrf.mxu0 }
  0x95   : > { %v812_v20 = vpop.permute.xlu2 %811  ;;  %v650_v34 = vpop.f32.mrf.mxu1 }
  0x96   : > { %v817_v21 = vsel %vm618_vm0, %v812_v20, 0  ;;  %v651_v46 = vadd.f32 %v650_v34, %v631_v24  ;;  %v851_v20 = vadd.f32 %v3688_v2, %v850_v13  ;;  %v880_v24 = vld [vmem:[%s4764_s13] sm:$0xff] }
  0x97   : > { %826 = vmatpush.bf16.msra.mxu0 %v817_v21  ;;  %v881_v21 = vld [vmem:[%s4764_s13 + $0x8] sm:$0xff] }
  0x9a   : > { %3254 = vmatmul.msk.bf16.vlgmr.msra.gmra.mxu0 %vm614_vm1, %v3253_v22  ;;  %v698_v35 = vpop.f32.mrf.mxu3  ;;  %v917_v22 = vld [vmem:[%s4765_s14 + $0x8] sm:$0xff] }
  0x9c   : > { %v633_v28 = vpop.f32.mrf.mxu0 }
  0x9d   : > { %v758_v23 = vpop.permute.xlu0 %757  ;;  %v652_v37 = vpop.f32.mrf.mxu1 }
  0x9e   : > { %v763_v25 = vsel %vm618_vm0, %v758_v23, 0  ;;  %v3970_v23 = vsel %vm852_vm4, %v3688_v2, %v851_v20 }
  0x9f   : > { %772 = vmatpush.bf16.msrb.mxu2 %v763_v25  ;;  %v916_v25 = vld [vmem:[%s4765_s14] sm:$0xff] }
  0xa2   : > { %3250 = vmatmul.msk.bf16.vlgmr.msrb.gmra.mxu2 %vm614_vm1, %v3249_v26  ;;  %v700_v38 = vpop.f32.mrf.mxu3 }
  0xa3   : > { %3257 = vmatpush.msk.msra.mxu2 %vm892_vm3, %v924_v5 }
  0xa4   : > { %v720_v36 = vpop.f32.mrf.mxu0 }
  0xa5   : > { %v785_v27 = vpop.permute.xlu1 %784  ;;  %936 = vmatpush.msra.mxu2 %v923_v7  ;;  %v3620_v7 = vld [vmem:[%s4789_s1 + $0x28] sm:$0xff] }
  0xa6   : > { %v790_v29 = vsel %vm618_vm0, %v785_v27, 0 }
  0xa7   : > { %799 = vmatpush.bf16.msrb.mxu3 %v790_v29  ;;  %937 = vmatpush.msra.mxu2 %v922_v10 }
  0xa9   : > { %938 = vmatpush.msra.mxu2 %v921_v12 }
  0xaa   : > { %3252 = vmatmul.msk.bf16.vlgmr.msrb.gmra.mxu3 %vm614_vm1, %v3251_v30 }
  0xab   : > { %939 = vmatpush.msra.mxu2 %v920_v15 }
  0xac   : > { %v722_v39 = vpop.f32.mrf.mxu0 }
  0xad   : > { %v731_v31 = vpop.permute.xlu1 %730  ;;  %940 = vmatpush.msra.mxu2 %v919_v17 }
  0xae   : > { %v736_v32 = vsel %vm618_vm0, %v731_v31, 0 }
  0xaf   : > { %745 = vmatpush.bf16.msrb.mxu1 %v736_v32  ;;  %941 = vmatpush.msra.mxu2 %v918_v19 }
  0xb1   : > { %942 = vmatpush.msra.mxu2 %v917_v22 }
  0xb2   : > { %3248 = vmatmul.msk.bf16.vlgmr.msrb.gmra.mxu1 %vm614_vm1, %v3247_v33 }
  0xb3   : > { %3255 = vmatpush.msk.msra.mxu1 %vm892_vm3, %v888_v4  ;;  %943 = vmatpush.msra.mxu2 %v916_v25  ;;  %v3621_v4 = vld [vmem:[%s4789_s1 + $0x30] sm:$0xff] }
  0xb5   : > { %904 = vmatpush.msra.mxu1 %v887_v6 }
  0xb7   : > { %905 = vmatpush.msra.mxu1 %v886_v9 }
  0xb9   : > { %906 = vmatpush.msra.mxu1 %v885_v11  ;;  %v3622_v11 = vld [vmem:[%s4789_s1 + $0x38] sm:$0xff] }
  0xbb   : > { %907 = vmatpush.msra.mxu1 %v884_v14 }
  0xbd   : > { %908 = vmatpush.msra.mxu1 %v883_v16 }
  0xbf   : > { %909 = vmatpush.msra.mxu1 %v882_v18 }
  0xc1   : > { %910 = vmatpush.msra.mxu1 %v881_v21 }
  0xc3   : > { %911 = vmatpush.msra.mxu1 %v880_v24  ;;  %v3728_v24 = vmov 1  }
  0xc4   : > { %3679 = vset.pattern.permute.xlu2 %v3728_v24 }
 0x115   : > { %v676_v40 = vpop.f32.mrf.mxu2 }
 0x116   : > { %v680_v48 = vadd.f32 %v676_v40, %v651_v46  ;;  %v876_v40 = vpop.permute.xlu1 %875 }
 0x117   : > { %v828_v41 = vpop.f32.mrf.mxu0 }
 0x118   : > { %v702_v49 = vadd.f32 %v698_v35, %v680_v48 }
 0x11a   : > { %v724_v52 = vadd.f32 %v720_v36, %v702_v49 }
 0x11d   : > { %v678_v42 = vpop.f32.mrf.mxu2 }
 0x11f   : > { %v830_v45 = vpop.f32.mrf.mxu0 }
 0x125   : > { %v774_v47 = vpop.f32.mrf.mxu2 }
 0x12d   : > { %v801_v50 = vpop.f32.mrf.mxu3  ;;  %v776_v51 = vpop.f32.mrf.mxu2 }
 0x12e   : > { %v3615_v51 = vld [vmem:[%s4789_s1] sm:$0xff] }
 0x12f   : > { %v747_v53 = vpop.f32.mrf.mxu1 }
 0x130   : > { %v751_v54 = vadd.f32 %v747_v53, %v724_v52 }
 0x132   : > { %v778_v55 = vadd.f32 %v774_v47, %v751_v54  ;;  %v3616_v54 = vld [vmem:[%s4789_s1 + $0x8] sm:$0xff] }
 0x134   : > { %v805_v56 = vadd.f32 %v801_v50, %v778_v55 }
 0x135   : > { %v803_v58 = vpop.f32.mrf.mxu3 }
 0x136   : > { %v3917_v59 = vadd.f32 %v828_v41, %v805_v56  ;;  %v3617_v58 = vld [vmem:[%s4789_s1 + $0x10] sm:$0xff] }
 0x137   : > { %v749_v60 = vpop.f32.mrf.mxu1 }
 0x138   : > { %v838_v61 = vmul.f32 %v3683_v57, %v3917_v59 }
 0x13a   : > { %v840_v62 = vsel %vm839_vm2, %v838_v61, 0.0  ;;  %v843_v63 = vmul.f32 %v838_v61, %v838_v61 }
 0x13b   : > { %841 = vadd.xlane.f32.xlu2 %v840_v62 }
 0x13c   : > { %v844_v0 = vsel %vm839_vm2, %v843_v63, 0.0  ;;  %v3619_v63 = vld [vmem:[%s4789_s1 + $0x20] sm:$0xff]  ;;  %s3739_s1 = smov 107  }
 0x13d   : > { %845 = vadd.xlane.f32.xlu0 %v844_v0 }
 0x1ae   : > { %v842_v26 = vpop.xlane.xlu2 %841 }
 0x1af   : > { %v854_v27 = vmul.f32 %v3970_v23, %v842_v26 }
 0x1b0   : > { %v846_v28 = vpop.xlane.xlu0 %845 }
 0x1b1   : > { %v856_v29 = vmul.f32 %v854_v27, %v854_v27  ;;  %v855_v30 = vmul.f32 %v3970_v23, %v846_v28  ;;  %v858_v39 = vsub.f32 %v3917_v59, %v854_v27 }
 0x1b3   : > { %v857_v31 = vsub.f32 %v855_v30, %v856_v29 }
 0x1b5   : > { %v859_v32 = vadd.f32 1e-05, %v857_v31 }
 0x1b7   : > { %3689 = vrsqrt.f32 %v859_v32  ;;  %vm866_vm6 = vweird.f32 %v859_v32 }
 0x1bd   : > { %v3690_v33 = vpop.eup %3689 }
 0x1be   : > { %v861_v34 = vmul.f32 %v3690_v33, %v859_v32  ;;  %vm867_vm5 = vweird.f32 %v3690_v33 }
 0x1bf   : > { %vm868_vm7 = vmor %vm866_vm6, %vm867_vm5 }
 0x1c0   : > { %v862_v35 = vmul.f32 %v3690_v33, %v861_v34 }
 0x1c2   : > { %v863_v36 = vmul.f32 0.5, %v862_v35 }
 0x1c4   : > { %v864_v37 = vsub.f32 1.5, %v863_v36 }
 0x1c6   : > { %v865_v38 = vmul.f32 %v3690_v33, %v864_v37 }
 0x1c8   : > { %v869_v41 = vsel %vm868_vm7, %v3690_v33, %v865_v38  ;;  %vm1372_vm7 = vcmask 130048  }
 0x1c9   : > { %v870_v42 = vmul.f32 %v869_v41, %v858_v39  ;;  %v3685_v41 = vld [vmem:[%s4762_s11] ss:$0 sm:$0xff] }
 0x1cb   : > { %vm871_vm8 = vcmp.ge.f32.partialorder %v870_v42, 0.0  ;;  %v878_v44 = vmul.f32 %v876_v40, %v870_v42 }
 0x1cd   : > { %v879_v45 = vsel %vm871_vm8, %v870_v42, %v878_v44  ;;  %vm1899_vm8 = vcmask 1045504  }
 0x1ce   : > { %3256 = vmatmul.msk.f32.vlgmr.msra.gmra.mxu1 %vm839_vm2, %v879_v45  ;;  %3258 = vmatmul.msk.f32.vlgmr.msra.gmra.mxu2 %vm839_vm2, %v879_v45 }
 0x24b   : > { %v4030_v12 = vpop.f32.mrf.mxu1 }
 0x251   : > { %v945_v46 = vpop.f32.mrf.mxu2 }
 0x252   : > { %v948_v47 = vpack.c.bf16 %v945_v46, %v945_v46 }
 0x254   : > { %v960_v48 = vunpack.c.l.b16 %v948_v47  ;;  %v995_v49 = vsel %vm968_vm9, %v948_v47, 0 }
 0x255   : > { %1004 = vmatpush.bf16.msrb.mxu1 %v995_v49 }
 0x256   : > { %v961_v50 = vpack.c.b16 %v960_v48, %v960_v48 }
 0x258   : > { %1211 = vrot.lane.b32.xlu0 %v961_v50, %s3721_s22  ;;  %1147 = vrot.lane.b32.xlu2 %v961_v50, %s3722_s24  ;;  %s3730_s24 = smov 121  }
 0x259   : > { %962 = vrot.lane.b32.xlu1 %v961_v50, %s3723_s2  ;;  %3270 = vmatmul.msk.bf16.vlgmr.msrb.gmra.mxu1 %vm964_vm10, %v3615_v51  ;;  %s3731_s2 = smov 126  }
 0x261   : > { %1019 = vrot.lane.b32.xlu1 %v961_v50, %s3716_s23 }
 0x269   : > { %1083 = vrot.lane.b32.xlu1 %v961_v50, %s3724_s26  ;;  %s4774_s26 = smov 116  }
 0x271   : > { %1051 = vrot.lane.b32.xlu1 %v961_v50, %s3725_s27  ;;  %s3733_s27 = smov 120  }
 0x279   : > { %1115 = vrot.lane.b32.xlu1 %v961_v50, %s3726_s28  ;;  %s4776_s28 = smov 115  }
 0x281   : > { %1179 = vrot.lane.b32.xlu1 %v961_v50, %s3727_s29  ;;  %s4778_s29 = smov 114  }
 0x2b2   : > { %v1148_v55 = vpop.permute.xlu2 %1147 }
 0x2b3   : > { %v1153_v59 = vsel %vm968_vm9, %v1148_v55, 0 }
 0x2ca   : > { %v1212_v60 = vpop.permute.xlu0 %1211 }
 0x2cb   : > { %v963_v52 = vpop.permute.xlu1 %962  ;;  %v1217_v0 = vsel %vm968_vm9, %v1212_v60, 0 }
 0x2cc   : > { %v970_v53 = vsel %vm968_vm9, %v963_v52, 0 }
 0x2cd   : > { %979 = vmatpush.bf16.msra.mxu3 %v970_v53 }
 0x2d0   : > { %3265 = vmatmul.msk.bf16.vlgmr.msra.gmra.mxu3 %vm964_vm10, %v3616_v54 }
 0x2d3   : > { %v1020_v56 = vpop.permute.xlu1 %1019 }
 0x2d4   : > { %v1025_v57 = vsel %vm968_vm9, %v1020_v56, 0 }
 0x2d5   : > { %1034 = vmatpush.bf16.msrb.mxu2 %v1025_v57 }
 0x2d6   : > { %v1006_v14 = vpop.f32.mrf.mxu1 }
 0x2d8   : > { %3277 = vmatmul.msk.bf16.vlgmr.msrb.gmra.mxu2 %vm964_vm10, %v3617_v58 }
 0x2d9   : > { %1162 = vmatpush.bf16.msra.mxu2 %v1153_v59  ;;  %v3729_v59 = vmov 16.0  }
 0x2da   : > { %3691 = vrcp.f32 %v3729_v59  ;;  %v3626_v59 = vld [vmem:[%s4755_s4 + $0x10] sm:$0xff] }
 0x2db   : > { %v1084_v61 = vpop.permute.xlu1 %1083 }
 0x2dc   : > { %v1089_v62 = vsel %vm968_vm9, %v1084_v61, 0 }
 0x2dd   : > { %1098 = vmatpush.bf16.msrb.mxu3 %v1089_v62 }
 0x2de   : > { %v1008_v18 = vpop.f32.mrf.mxu1 }
 0x2e0   : > { %3291 = vmatmul.msk.bf16.vlgmr.msrb.gmra.mxu3 %vm964_vm10, %v3619_v63  ;;  %v3692_v60 = vpop.eup %3691 }
 0x2e1   : > { %1226 = vmatpush.bf16.msra.mxu3 %v1217_v0  ;;  %v1257_v61 = vmul.f32 16.0, %v3692_v60  ;;  %vm1261_vm13 = vweird.f32 %v3692_v60 }
 0x2e3   : > { %v1052_v1 = vpop.permute.xlu1 %1051  ;;  %v1258_v62 = vsub.f32 1.0, %v1257_v61 }
 0x2e4   : > { %v1057_v2 = vsel %vm968_vm9, %v1052_v1, 0  ;;  %v1309_v1 = vld [vmem:[%s4766_s15 + $0x10] sm:$0x7] }
 0x2e5   : > { %1066 = vmatpush.bf16.msrb.mxu0 %v1057_v2  ;;  %v1259_v63 = vmul.f32 %v3692_v60, %v1258_v62  ;;  %v1308_v2 = vld [vmem:[%s4766_s15 + $0x8] sm:$0xff] }
 0x2e7   : > { %v1260_v0 = vadd.f32 %v3692_v60, %v1259_v63  ;;  %v3630_v63 = vld [vmem:[%s4755_s4 + $0x30] sm:$0xff] }
 0x2e8   : > { %3284 = vmatmul.msk.bf16.vlgmr.msrb.gmra.mxu0 %vm964_vm10, %v3618_v3  ;;  %3305 = vmatmul.msk.bf16.vlgmr.msra.gmra.mxu2 %vm964_vm10, %v3621_v4  ;;  %v1307_v4 = vld [vmem:[%s4766_s15] sm:$0xff] }
 0x2e9   : > { %v4052_v3 = vsel %vm1261_vm13, %v3692_v60, %v1260_v0  ;;  %v1886_v60 = vld [vmem:[%s4767_s16 + $0x10] sm:$0x3f]  ;;  %v1885_v0 = vld [vmem:[%s4767_s16 + $0x8] sm:$0xff] }
 0x2eb   : > { %v1116_v5 = vpop.permute.xlu1 %1115 }
 0x2ec   : > { %v1121_v6 = vsel %vm968_vm9, %v1116_v5, 0 }
 0x2ed   : > { %1130 = vmatpush.bf16.msra.mxu1 %v1121_v6 }
 0x2f0   : > { %3298 = vmatmul.msk.bf16.vlgmr.msra.gmra.mxu1 %vm964_vm10, %v3620_v7  ;;  %3319 = vmatmul.msk.bf16.vlgmr.msra.gmra.mxu3 %vm964_vm10, %v3623_v8 }
 0x2f1   : > { %3642 = vmatpush.msk.msrb.mxu1 %vm1316_vm12, %v1309_v1 }
 0x2f3   : > { %v1180_v9 = vpop.permute.xlu1 %1179  ;;  %3643 = vmatpush.msrb.mxu1 %v1308_v2 }
 0x2f4   : > { %v1185_v10 = vsel %vm968_vm9, %v1180_v9, 0 }
 0x2f5   : > { %1194 = vmatpush.bf16.msra.mxu0 %v1185_v10  ;;  %3644 = vmatpush.msrb.mxu1 %v1307_v4 }
 0x2f8   : > { %3312 = vmatmul.msk.bf16.vlgmr.msra.gmra.mxu0 %vm964_vm10, %v3622_v11 }
 0x2f9   : > { %3320 = vmatpush.msk.msrb.mxu0 %vm1316_vm12, %v1309_v1  ;;  %v3634_v1 = vld [vmem:[%s4755_s4 + $0x50] sm:$0xff] }
 0x2fb   : > { %1334 = vmatpush.msrb.mxu0 %v1308_v2 }
 0x2fd   : > { %1335 = vmatpush.msrb.mxu0 %v1307_v4  ;;  %v1884_v4 = vld [vmem:[%s4767_s16] sm:$0xff] }
 0x353   : > { %v981_v13 = vpop.f32.mrf.mxu3 }
 0x354   : > { %v1007_v20 = vadd.f32 %v1006_v14, %v981_v13 }
 0x35b   : > { %v983_v15 = vpop.f32.mrf.mxu3  ;;  %v1036_v16 = vpop.f32.mrf.mxu2 }
 0x35c   : > { %v1041_v22 = vadd.f32 %v1036_v16, %v1007_v20  ;;  %v1009_v29 = vadd.f32 %v1008_v18, %v983_v15 }
 0x363   : > { %v1100_v17 = vpop.f32.mrf.mxu3  ;;  %v1038_v21 = vpop.f32.mrf.mxu2 }
 0x364   : > { %v1042_v31 = vadd.f32 %v1038_v21, %v1009_v29 }
 0x365   : > { %v1068_v19 = vpop.f32.mrf.mxu0 }
 0x366   : > { %v1073_v25 = vadd.f32 %v1068_v19, %v1041_v22 }
 0x368   : > { %v1105_v30 = vadd.f32 %v1100_v17, %v1073_v25 }
 0x36b   : > { %v1102_v26 = vpop.f32.mrf.mxu3  ;;  %v1164_v33 = vpop.f32.mrf.mxu2 }
 0x36d   : > { %v1070_v27 = vpop.f32.mrf.mxu0  ;;  %v1132_v28 = vpop.f32.mrf.mxu1 }
 0x36e   : > { %v1137_v32 = vadd.f32 %v1132_v28, %v1105_v30  ;;  %v1074_v34 = vadd.f32 %v1070_v27, %v1042_v31 }
 0x370   : > { %v1169_v36 = vadd.f32 %v1164_v33, %v1137_v32  ;;  %v1106_v39 = vadd.f32 %v1102_v26, %v1074_v34 }
 0x373   : > { %v1228_v35 = vpop.f32.mrf.mxu3  ;;  %v1166_v46 = vpop.f32.mrf.mxu2 }
 0x375   : > { %v1134_v37 = vpop.f32.mrf.mxu1  ;;  %v1196_v38 = vpop.f32.mrf.mxu0 }
 0x376   : > { %v1201_v40 = vadd.f32 %v1196_v38, %v1169_v36  ;;  %v1138_v42 = vadd.f32 %v1134_v37, %v1106_v39 }
 0x378   : > { %v4035_v44 = vadd.f32 %v1228_v35, %v1201_v40  ;;  %v1170_v47 = vadd.f32 %v1166_v46, %v1138_v42 }
 0x37a   : > { %v1239_v45 = vmul.f32 %v3685_v41, %v4035_v44 }
 0x37b   : > { %v1230_v53 = vpop.f32.mrf.mxu3 }
 0x37c   : > { %v1242_v48 = vsel %vm1241_vm11, %v1239_v45, 0.0  ;;  %v1248_v49 = vmul.f32 %v1239_v45, %v1239_v45 }
 0x37d   : > { %v1198_v50 = vpop.f32.mrf.mxu0  ;;  %1243 = vadd.xlane.f32.xlu1 %v1242_v48 }
 0x37e   : > { %v1202_v51 = vadd.f32 %v1198_v50, %v1170_v47  ;;  %v1250_v52 = vsel %vm1241_vm11, %v1248_v49, 0.0 }
 0x37f   : > { %1251 = vadd.xlane.f32.xlu0 %v1250_v52  ;;  %v3624_v52 = vld [vmem:[%s4755_s4] sm:$0xff] }
 0x380   : > { %v4040_v54 = vadd.f32 %v1230_v53, %v1202_v51  ;;  %v3625_v53 = vld [vmem:[%s4755_s4 + $0x8] sm:$0xff] }
 0x382   : > { %v1240_v55 = vmul.f32 %v3685_v41, %v4040_v54 }
 0x384   : > { %v1245_v56 = vsel %vm1241_vm11, %v1240_v55, 0.0  ;;  %v1249_v57 = vmul.f32 %v1240_v55, %v1240_v55 }
 0x385   : > { %1246 = vadd.xlane.f32.xlu2 %v1245_v56 }
 0x386   : > { %v1253_v58 = vsel %vm1241_vm11, %v1249_v57, 0.0  ;;  %v3628_v57 = vld [vmem:[%s4755_s4 + $0x20] sm:$0xff] }
 0x387   : > { %1254 = vadd.xlane.f32.xlu1 %v1253_v58 }
 0x39d   : > { %1300 = vperm.xlu2 %3679, %v3911_v43  }
 0x3f0   : > { %v1244_v5 = vpop.xlane.xlu1 %1243 }
 0x3f1   : > { %v1263_v6 = vmul.f32 %v4052_v3, %v1244_v5  ;;  %v3629_v5 = vld [vmem:[%s4755_s4 + $0x28] sm:$0xff] }
 0x3f2   : > { %v1252_v7 = vpop.xlane.xlu0 %1251 }
 0x3f3   : > { %v1267_v8 = vmul.f32 %v1263_v6, %v1263_v6  ;;  %v1265_v9 = vmul.f32 %v4052_v3, %v1252_v7  ;;  %v1271_v29 = vsub.f32 %v4035_v44, %v1263_v6  ;;  %v3627_v7 = vld [vmem:[%s4755_s4 + $0x18] sm:$0xff] }
 0x3f5   : > { %v1269_v10 = vsub.f32 %v1265_v9, %v1267_v8  ;;  %v3631_v8 = vld [vmem:[%s4755_s4 + $0x38] sm:$0xff] }
 0x3f6   : > { %v3635_v9 = vld [vmem:[%s4755_s4 + $0x58] sm:$0xff] }
 0x3f7   : > { %v1273_v11 = vadd.f32 1e-05, %v1269_v10  ;;  %v3636_v10 = vld [vmem:[%s4755_s4 + $0x60] sm:$0xff] }
 0x3f8   : > { %v1247_v13 = vpop.xlane.xlu2 %1246 }
 0x3f9   : > { %3693 = vrsqrt.f32 %v1273_v11  ;;  %v1264_v14 = vmul.f32 %v4052_v3, %v1247_v13  ;;  %vm1281_vm15 = vweird.f32 %v1273_v11  ;;  %v3638_v13 = vld [vmem:[%s4755_s4 + $0x70] sm:$0xff] }
 0x3fa   : > { %v1255_v15 = vpop.xlane.xlu1 %1254 }
 0x3fb   : > { %v1268_v16 = vmul.f32 %v1264_v14, %v1264_v14  ;;  %v1266_v17 = vmul.f32 %v4052_v3, %v1255_v15  ;;  %v1272_v39 = vsub.f32 %v4040_v54, %v1264_v14  ;;  %v3637_v14 = vld [vmem:[%s4755_s4 + $0x68] sm:$0xff] }
 0x3fc   : > { %v3633_v15 = vld [vmem:[%s4755_s4 + $0x48] sm:$0xff] }
 0x3fd   : > { %v1270_v18 = vsub.f32 %v1266_v17, %v1268_v16  ;;  %v3639_v16 = vld [vmem:[%s4755_s4 + $0x78] sm:$0xff]  ;;  %v3640_v17 = vld [vmem:[%s4755_s4 + $0x80] sm:$0xff] }
 0x3ff   : > { %v3694_v19 = vpop.eup %3693  ;;  %v1274_v20 = vadd.f32 1e-05, %v1270_v18  ;;  %v3450_v18 = vld [vmem:[%s4756_s5 + $0x10] sm:$0xf] }
 0x400   : > { %v1276_v21 = vmul.f32 %v3694_v19, %v1273_v11  ;;  %vm1282_vm14 = vweird.f32 %v3694_v19  ;;  %v1301_v31 = vpop.permute.xlu2 %1300  ;;  %v3632_v11 = vld [vmem:[%s4755_s4 + $0x40] sm:$0xff] }
 0x401   : > { %3695 = vrsqrt.f32 %v1274_v20  ;;  %vm1283_vm1 = vmor %vm1281_vm15, %vm1282_vm14  ;;  %vm1291_vm4 = vweird.f32 %v1274_v20 }
 0x402   : > { %v1277_v22 = vmul.f32 %v3694_v19, %v1276_v21  ;;  %v3462_v21 = vld [vmem:[%s4756_s5 + $0x4] sm:$0xf] }
 0x404   : > { %v1278_v24 = vmul.f32 0.5, %v1277_v22 }
 0x406   : > { %v1279_v25 = vsub.f32 1.5, %v1278_v24 }
 0x407   : > { %v3696_v26 = vpop.eup %3695 }
 0x408   : > { %v1286_v27 = vmul.f32 %v3696_v26, %v1274_v20  ;;  %v1280_v28 = vmul.f32 %v3694_v19, %v1279_v25  ;;  %vm1292_vm3 = vweird.f32 %v3696_v26  ;;  %v3454_v20 = vld [vmem:[%s4756_s5 + $0xc] sm:$0xf] }
 0x409   : > { %vm1293_vm5 = vmor %vm1291_vm4, %vm1292_vm3 }
 0x40a   : > { %v1287_v30 = vmul.f32 %v3696_v26, %v1286_v27  ;;  %v1284_v32 = vsel %vm1283_vm1, %v3694_v19, %v1280_v28  ;;  %v3641_v19 = vld [vmem:[%s4755_s4 + $0x88] sm:$0xff] }
 0x40b   : > { %v1295_v33 = vmul.f32 %v1284_v32, %v1271_v29 }
 0x40c   : > { %v1288_v34 = vmul.f32 0.5, %v1287_v30 }
 0x40d   : > { %v1303_v35 = vmul.f32 %v1301_v31, %v1295_v33  ;;  %vm1297_vm2 = vcmp.ge.f32.partialorder %v1295_v33, 0.0 }
 0x40e   : > { %v1289_v36 = vsub.f32 1.5, %v1288_v34 }
 0x40f   : > { %v1305_v37 = vsel %vm1297_vm2, %v1295_v33, %v1303_v35 }
 0x410   : > { %v1290_v38 = vmul.f32 %v3696_v26, %v1289_v36  ;;  %3321 = vmatmul.msk.f32.vlgmr.msrb.gmra.mxu0 %vm1241_vm11, %v1305_v37 }
 0x412   : > { %v1294_v40 = vsel %vm1293_vm5, %v3696_v26, %v1290_v38 }
 0x413   : > { %v1296_v41 = vmul.f32 %v1294_v40, %v1272_v39 }
 0x415   : > { %v1304_v42 = vmul.f32 %v1301_v31, %v1296_v41  ;;  %vm1298_vm6 = vcmp.ge.f32.partialorder %v1296_v41, 0.0 }
 0x417   : > { %v1306_v44 = vsel %vm1298_vm6, %v1296_v41, %v1304_v42 }
 0x418   : > { %3322 = vmatmul.msk.f32.vlgmr.msrb.gmra.mxu1 %vm1241_vm11, %v1306_v44  ;;  %vm1771_vm11 = vcmask 179200  }
 0x48d   : > { %v1337_v45 = vpop.f32.mrf.mxu0 }
 0x48e   : > { %v1343_v46 = vpack.c.bf16 %v1337_v45, %v1337_v45 }
 0x490   : > { %v1366_v49 = vunpack.c.l.b16 %v1343_v46 }
 0x495   : > { %v1340_v47 = vpop.f32.mrf.mxu1 }
 0x496   : > { %v1344_v48 = vpack.c.bf16 %v1340_v47, %v1340_v47 }
 0x498   : > { %v1367_v50 = vunpack.c.l.b16 %v1344_v48 }
 0x49a   : > { %v1368_v51 = vpack.c.b16 %v1367_v50, %v1366_v49 }
 0x49c   : > { %1543 = vrot.lane.b32.xlu2 %v1368_v51, %s3730_s24  ;;  %1449 = vrot.lane.b32.xlu1 %v1368_v51, %s3731_s2 }
 0x49d   : > { %1369 = vrot.lane.b32.xlu0 %v1368_v51, %s3716_s23  ;;  %1422 = vmatpush.bf16.msra.mxu0 %v1368_v51 }
 0x4a0   : > { %3345 = vmatmul.msk.bf16.vlgmr.msra.gmra.mxu0 %vm1372_vm7, %v3624_v52 }
 0x4a4   : > { %1637 = vrot.lane.b32.xlu2 %v1368_v51, %s4774_s26  ;;  %1590 = vrot.lane.b32.xlu1 %v1368_v51, %s3733_s27  ;;  %s3740_s26 = smov 106  }
 0x4a5   : > { %1496 = vrot.lane.b32.xlu0 %v1368_v51, %s3721_s22 }
 0x4ac   : > { %1684 = vrot.lane.b32.xlu2 %v1368_v51, %s4776_s28 }
 0x4ad   : > { %1731 = vrot.lane.b32.xlu0 %v1368_v51, %s4778_s29  ;;  %s4793_s29 = smov 117  }
 0x4b0   : > { %3346 = vmatmul.msk.bf16.gmra.mxu0 %vm1372_vm7, %v3625_v53 }
 0x4f6   : > { %v4080_v54 = vpop.permute.xlu2 %1543 }
 0x4fe   : > { %v1638_v55 = vpop.permute.xlu2 %1637 }
 0x506   : > { %v4103_v2 = vpop.permute.xlu2 %1684 }
 0x50e   : > { %v1450_v56 = vpop.permute.xlu1 %1449 }
 0x50f   : > { %v1370_v58 = vpop.permute.xlu0 %1369  ;;  %1465 = vmatpush.bf16.msrb.mxu3 %v1450_v56 }
 0x510   : > { %1386 = vmatpush.bf16.msrb.mxu2 %v1370_v58 }
 0x512   : > { %3359 = vmatmul.msk.bf16.vlgmr.msrb.gmra.mxu3 %vm1372_vm7, %v3628_v57 }
 0x513   : > { %1653 = vmatpush.bf16.msra.mxu3 %v1638_v55  ;;  %3335 = vmatmul.msk.bf16.vlgmr.msrb.gmra.mxu2 %vm1372_vm7, %v3626_v59 }
 0x514   : > { %1559 = vmatpush.bf16.msra.mxu2 %v4080_v54 }
 0x516   : > { %v1591_v61 = vpop.permute.xlu1 %1590 }
 0x517   : > { %v1497_v62 = vpop.permute.xlu0 %1496  ;;  %1606 = vmatpush.bf16.msrb.mxu0 %v1591_v61 }
 0x518   : > { %1512 = vmatpush.bf16.msra.mxu1 %v1497_v62 }
 0x51a   : > { %3401 = vmatmul.msk.bf16.vlgmr.msrb.gmra.mxu0 %vm1372_vm7, %v3634_v1 }
 0x51b   : > { %3445 = vmatpush.msk.msra.mxu0 %vm1899_vm8, %v1886_v60  ;;  %3373 = vmatmul.msk.bf16.vlgmr.msra.gmra.mxu1 %vm1372_vm7, %v3630_v63 }
 0x51c   : > { %1700 = vmatpush.bf16.msrb.mxu1 %v4103_v2 }
 0x51d   : > { %1917 = vmatpush.msra.mxu0 %v1885_v0  ;;  %v1424_v24 = vpop.f32.mrf.mxu0  ;;  %v4178_v0 = vld [vmem:[%s4763_s12] ss:$0 sm:$0xff] }
 0x51f   : > { %1918 = vmatpush.msra.mxu0 %v1884_v4  ;;  %v1732_v6 = vpop.permute.xlu0 %1731 }
 0x520   : > { %1983 = vmatpush.bf16.msra.mxu1 %v4080_v54  ;;  %1747 = vmatpush.bf16.msrb.mxu2 %v1732_v6 }
 0x521   : > { %2071 = vmatpush.bf16.msrb.mxu0 %v4080_v54 }
 0x522   : > { %3360 = vmatmul.msk.bf16.gmra.mxu3 %vm1372_vm7, %v3629_v5 }
 0x523   : > { %3336 = vmatmul.msk.bf16.gmra.mxu2 %vm1372_vm7, %v3627_v7 }
 0x525   : > { %v1426_v29 = vpop.f32.mrf.mxu0 }
 0x52a   : > { %3402 = vmatmul.msk.bf16.gmra.mxu0 %vm1372_vm7, %v3635_v9 }
 0x52b   : > { %3374 = vmatmul.msk.bf16.gmra.mxu1 %vm1372_vm7, %v3631_v8  ;;  %v3736_v8 = vmov 2  }
 0x52c   : > { %3680 = vset.pattern.permute.xlu2 %v3736_v8 }
 0x52d   : > { %v1429_v33 = vpop.f32.mrf.mxu0 }
 0x532   : > { %3415 = vmatmul.msk.bf16.vlgmr.msra.gmra.mxu3 %vm1372_vm7, %v3636_v10 }
 0x533   : > { %3387 = vmatmul.msk.bf16.vlgmr.msra.gmra.mxu2 %vm1372_vm7, %v3632_v11 }
 0x535   : > { %v1431_v37 = vpop.f32.mrf.mxu0 }
 0x53b   : > { %3429 = vmatmul.msk.bf16.vlgmr.msrb.gmra.mxu1 %vm1372_vm7, %v3638_v13 }
 0x53c   : > { %2035 = vmatpush.bf16.msrb.mxu1 %v1591_v61 }
 0x542   : > { %3416 = vmatmul.msk.bf16.gmra.mxu3 %vm1372_vm7, %v3637_v14 }
 0x543   : > { %3388 = vmatmul.msk.bf16.gmra.mxu2 %vm1372_vm7, %v3633_v15 }
 0x54b   : > { %3430 = vmatmul.msk.bf16.gmra.mxu1 %vm1372_vm7, %v3639_v16 }
 0x553   : > { %3443 = vmatmul.msk.bf16.vlgmr.msrb.gmra.mxu2 %vm1372_vm7, %v3640_v17 }
 0x55b   : > { %3453 = vmatmul.msk.bf16.vlgmr.msra.gmra.mxu1 %vm1372_vm7, %v3450_v18 }
 0x55c   : > { %2124 = vmatpush.bf16.msra.mxu1 %v4103_v2 }
 0x563   : > { %3444 = vmatmul.msk.bf16.gmra.mxu2 %vm1372_vm7, %v3641_v19 }
 0x56b   : > { %3457 = vmatmul.msk.bf16.vlgmr.msrb.gmra.mxu1 %vm1372_vm7, %v3454_v20 }
 0x56c   : > { %2211 = vmatpush.bf16.msrb.mxu1 %v1732_v6 }
 0x57b   : > { %3465 = vmatmul.msk.bf16.vlgmr.msra.gmra.mxu1 %vm1372_vm7, %v3462_v21 }
 0x57c   : > { %2284 = vmatpush.bf16.msra.mxu1 %v1591_v61 }
 0x595   : > { %v1467_v26 = vpop.f32.mrf.mxu3 }
 0x596   : > { %v1388_v22 = vpop.f32.mrf.mxu2 }
 0x597   : > { %v1425_v39 = vadd.f32 %v1424_v24, %v1388_v22  ;;  %v1608_v44 = vpop.f32.mrf.mxu0 }
 0x598   : > { %v1514_v27 = vpop.f32.mrf.mxu1 }
 0x599   : > { %v1477_v41 = vadd.f32 %v1467_v26, %v1425_v39 }
 0x59b   : > { %v1524_v46 = vadd.f32 %v1514_v27, %v1477_v41 }
 0x59d   : > { %v1469_v30 = vpop.f32.mrf.mxu3 }
 0x59e   : > { %v1390_v25 = vpop.f32.mrf.mxu2 }
 0x59f   : > { %v1427_v47 = vadd.f32 %v1426_v29, %v1390_v25  ;;  %v1610_v53 = vpop.f32.mrf.mxu0 }
 0x5a0   : > { %v1516_v32 = vpop.f32.mrf.mxu1 }
 0x5a1   : > { %v1478_v50 = vadd.f32 %v1469_v30, %v1427_v47 }
 0x5a3   : > { %v1525_v56 = vadd.f32 %v1516_v32, %v1478_v50 }
 0x5a5   : > { %v1472_v34 = vpop.f32.mrf.mxu3 }
 0x5a6   : > { %v1393_v28 = vpop.f32.mrf.mxu2 }
 0x5a7   : > { %v1430_v57 = vadd.f32 %v1429_v33, %v1393_v28  ;;  %v1613_v9 = vpop.f32.mrf.mxu0 }
 0x5a8   : > { %v1519_v36 = vpop.f32.mrf.mxu1 }
 0x5a9   : > { %v1479_v61 = vadd.f32 %v1472_v34, %v1430_v57 }
 0x5ab   : > { %v1526_v5 = vadd.f32 %v1519_v36, %v1479_v61 }
 0x5ad   : > { %v1474_v40 = vpop.f32.mrf.mxu3 }
 0x5ae   : > { %v1395_v31 = vpop.f32.mrf.mxu2 }
 0x5af   : > { %v1432_v6 = vadd.f32 %v1431_v37, %v1395_v31  ;;  %v1615_v29 = vpop.f32.mrf.mxu0 }
 0x5b0   : > { %v1521_v42 = vpop.f32.mrf.mxu1 }
 0x5b1   : > { %v1480_v14 = vadd.f32 %v1474_v40, %v1432_v6 }
 0x5b3   : > { %v1527_v22 = vadd.f32 %v1521_v42, %v1480_v14 }
 0x5b5   : > { %v1655_v48 = vpop.f32.mrf.mxu3 }
 0x5b6   : > { %v1561_v35 = vpop.f32.mrf.mxu2 }
 0x5b7   : > { %v1571_v49 = vadd.f32 %v1561_v35, %v1524_v46 }
 0x5b8   : > { %v1702_v51 = vpop.f32.mrf.mxu1 }
 0x5b9   : > { %v1618_v52 = vadd.f32 %v1608_v44, %v1571_v49 }
 0x5bb   : > { %v1665_v58 = vadd.f32 %v1655_v48, %v1618_v52 }
 0x5bd   : > { %v1657_v60 = vpop.f32.mrf.mxu3  ;;  %v1712_v62 = vadd.f32 %v1702_v51, %v1665_v58 }
 0x5be   : > { %v1563_v38 = vpop.f32.mrf.mxu2 }
 0x5bf   : > { %v1572_v59 = vadd.f32 %v1563_v38, %v1525_v56 }
 0x5c0   : > { %v1704_v1 = vpop.f32.mrf.mxu1 }
 0x5c1   : > { %v1619_v63 = vadd.f32 %v1610_v53, %v1572_v59 }
 0x5c3   : > { %v1666_v10 = vadd.f32 %v1657_v60, %v1619_v63 }
 0x5c5   : > { %v1660_v17 = vpop.f32.mrf.mxu3  ;;  %v1713_v18 = vadd.f32 %v1704_v1, %v1666_v10 }
 0x5c6   : > { %v1566_v45 = vpop.f32.mrf.mxu2 }
 0x5c7   : > { %v1573_v11 = vadd.f32 %v1566_v45, %v1526_v5 }
 0x5c8   : > { %v1707_v25 = vpop.f32.mrf.mxu1 }
 0x5c9   : > { %v1620_v19 = vadd.f32 %v1613_v9, %v1573_v11 }
 0x5cb   : > { %v1667_v26 = vadd.f32 %v1660_v17, %v1620_v19 }
 0x5cd   : > { %v1714_v32 = vadd.f32 %v1707_v25, %v1667_v26  ;;  %v1662_v35 = vpop.f32.mrf.mxu3 }
 0x5ce   : > { %v1568_v55 = vpop.f32.mrf.mxu2 }
 0x5cf   : > { %v1574_v27 = vadd.f32 %v1568_v55, %v1527_v22 }
 0x5d0   : > { %v1709_v40 = vpop.f32.mrf.mxu1 }
 0x5d1   : > { %v1621_v33 = vadd.f32 %v1615_v29, %v1574_v27 }
 0x5d3   : > { %v1668_v38 = vadd.f32 %v1662_v35, %v1621_v33 }
 0x5d5   : > { %v1715_v44 = vadd.f32 %v1709_v40, %v1668_v38 }
 0x5d6   : > { %v1749_v4 = vpop.f32.mrf.mxu2 }
 0x5d7   : > { %v4180_v7 = vadd.f32 %v1749_v4, %v1712_v62 }
 0x5d9   : > { %v1767_v13 = vmul.f32 %v4178_v0, %v4180_v7 }
 0x5db   : > { %v1772_v15 = vsel %vm1771_vm11, %v1767_v13, 0.0  ;;  %v1784_v16 = vmul.f32 %v1767_v13, %v1767_v13 }
 0x5dc   : > { %1773 = vadd.xlane.f32.xlu1 %v1772_v15 }
 0x5dd   : > { %v1788_v20 = vsel %vm1771_vm11, %v1784_v16, 0.0 }
 0x5de   : > { %v1751_v21 = vpop.f32.mrf.mxu2  ;;  %1789 = vadd.xlane.f32.xlu0 %v1788_v20 }
 0x5df   : > { %v4186_v24 = vadd.f32 %v1751_v21, %v1713_v18 }
 0x5e1   : > { %v1768_v28 = vmul.f32 %v4178_v0, %v4186_v24 }
 0x5e3   : > { %v1775_v30 = vsel %vm1771_vm11, %v1768_v28, 0.0  ;;  %v1785_v31 = vmul.f32 %v1768_v28, %v1768_v28 }
 0x5e4   : > { %1776 = vadd.xlane.f32.xlu2 %v1775_v30 }
 0x5e5   : > { %v1791_v34 = vsel %vm1771_vm11, %v1785_v31, 0.0 }
 0x5e6   : > { %v1754_v36 = vpop.f32.mrf.mxu2  ;;  %1792 = vadd.xlane.f32.xlu1 %v1791_v34 }
 0x5e7   : > { %v4192_v37 = vadd.f32 %v1754_v36, %v1714_v32 }
 0x5e9   : > { %v1769_v39 = vmul.f32 %v4178_v0, %v4192_v37 }
 0x5eb   : > { %v1778_v41 = vsel %vm1771_vm11, %v1769_v39, 0.0  ;;  %v1786_v42 = vmul.f32 %v1769_v39, %v1769_v39 }
 0x5ec   : > { %1779 = vadd.xlane.f32.xlu0 %v1778_v41 }
 0x5ed   : > { %v1794_v45 = vsel %vm1771_vm11, %v1786_v42, 0.0 }
 0x5ee   : > { %v1756_v46 = vpop.f32.mrf.mxu2  ;;  %1795 = vadd.xlane.f32.xlu2 %v1794_v45 }
 0x5ef   : > { %v4198_v47 = vadd.f32 %v1756_v46, %v1715_v44 }
 0x5f1   : > { %v1770_v48 = vmul.f32 %v4178_v0, %v4198_v47 }
 0x5f3   : > { %v1781_v49 = vsel %vm1771_vm11, %v1770_v48, 0.0  ;;  %v1787_v50 = vmul.f32 %v1770_v48, %v1770_v48 }
 0x5f4   : > { %1782 = vadd.xlane.f32.xlu1 %v1781_v49 }
 0x5f5   : > { %v1797_v51 = vsel %vm1771_vm11, %v1787_v50, 0.0 }
 0x5f6   : > { %1798 = vadd.xlane.f32.xlu0 %v1797_v51 }
 0x606   : > { %1873 = vperm.xlu2 %3680, %v3911_v43  }
 0x64f   : > { %v1774_v52 = vpop.xlane.xlu1 %1773 }
 0x650   : > { %v1800_v53 = vmul.f32 %v1774_v52, %v4052_v3 }
 0x651   : > { %v1790_v55 = vpop.xlane.xlu0 %1789 }
 0x652   : > { %v1808_v56 = vmul.f32 %v1800_v53, %v1800_v53  ;;  %v1804_v57 = vmul.f32 %v1790_v55, %v4052_v3  ;;  %v1816_v25 = vsub.f32 %v4180_v7, %v1800_v53 }
 0x654   : > { %v1812_v58 = vsub.f32 %v1804_v57, %v1808_v56 }
 0x656   : > { %v1820_v59 = vadd.f32 1e-05, %v1812_v58 }
 0x657   : > { %v1777_v60 = vpop.xlane.xlu2 %1776 }
 0x658   : > { %3697 = vrsqrt.f32 %v1820_v59  ;;  %v1801_v61 = vmul.f32 %v1777_v60, %v4052_v3  ;;  %vm1830_vm13 = vweird.f32 %v1820_v59 }
 0x659   : > { %v1793_v62 = vpop.xlane.xlu1 %1792 }
 0x65a   : > { %v1809_v63 = vmul.f32 %v1801_v61, %v1801_v61  ;;  %v1805_v1 = vmul.f32 %v1793_v62, %v4052_v3  ;;  %v1817_v44 = vsub.f32 %v4186_v24, %v1801_v61 }
 0x65c   : > { %v1813_v4 = vsub.f32 %v1805_v1, %v1809_v63 }
 0x65e   : > { %v3698_v5 = vpop.eup %3697  ;;  %v1821_v43 = vadd.f32 1e-05, %v1813_v4 }
 0x65f   : > { %v1825_v6 = vmul.f32 %v3698_v5, %v1820_v59  ;;  %v1780_v8 = vpop.xlane.xlu0 %1779  ;;  %vm1831_vm12 = vweird.f32 %v3698_v5 }
 0x660   : > { %3699 = vrsqrt.f32 %v1821_v43  ;;  %v1802_v9 = vmul.f32 %v1780_v8, %v4052_v3  ;;  %vm1832_vm14 = vmor %vm1830_vm13, %vm1831_vm12  ;;  %vm1840_vm2 = vweird.f32 %v1821_v43 }
 0x661   : > { %v1826_v10 = vmul.f32 %v3698_v5, %v1825_v6  ;;  %v1796_v11 = vpop.xlane.xlu2 %1795  ;;  %v3458_v6 = vld [vmem:[%s4756_s5 + $0x14] sm:$0xf] }
 0x662   : > { %v1810_v13 = vmul.f32 %v1802_v9, %v1802_v9  ;;  %v1806_v14 = vmul.f32 %v1796_v11, %v4052_v3  ;;  %v1818_v24 = vsub.f32 %v4192_v37, %v1802_v9 }
 0x663   : > { %v1827_v15 = vmul.f32 0.5, %v1826_v10 }
 0x664   : > { %v1814_v16 = vsub.f32 %v1806_v14, %v1810_v13 }
 0x665   : > { %v1828_v17 = vsub.f32 1.5, %v1827_v15 }
 0x666   : > { %v3700_v18 = vpop.eup %3699  ;;  %v1822_v19 = vadd.f32 1e-05, %v1814_v16 }
 0x667   : > { %v1829_v20 = vmul.f32 %v3698_v5, %v1828_v17  ;;  %v1835_v21 = vmul.f32 %v3700_v18, %v1821_v43  ;;  %v1783_v22 = vpop.xlane.xlu1 %1782  ;;  %vm1841_vm1 = vweird.f32 %v3700_v18 }
 0x668   : > { %3701 = vrsqrt.f32 %v1822_v19  ;;  %v1803_v26 = vmul.f32 %v1783_v22, %v4052_v3  ;;  %vm1842_vm3 = vmor %vm1840_vm2, %vm1841_vm1  ;;  %vm1850_vm6 = vweird.f32 %v1822_v19 }
 0x669   : > { %v1833_v27 = vsel %vm1832_vm14, %v3698_v5, %v1829_v20  ;;  %v1836_v28 = vmul.f32 %v3700_v18, %v1835_v21  ;;  %v1799_v29 = vpop.xlane.xlu0 %1798  ;;  %v1874_v30 = vpop.permute.xlu2 %1873 }
 0x66a   : > { %v1811_v31 = vmul.f32 %v1803_v26, %v1803_v26  ;;  %v1807_v32 = vmul.f32 %v1799_v29, %v4052_v3  ;;  %v1864_v33 = vmul.f32 %v1833_v27, %v1816_v25  ;;  %v1819_v1 = vsub.f32 %v4198_v47, %v1803_v26  ;;  %v3466_v47 = vld [vmem:[%s4756_s5 + $0x1c] sm:$0xf]  ;;  %v3451_v26 = vld [vmem:[%s4757_s6 + $0x10] sm:$0xf]  ;;  %v3459_v27 = vld [vmem:[%s4757_s6 + $0x14] sm:$0xf] }
 0x66b   : > { %v1837_v34 = vmul.f32 0.5, %v1836_v28 }
 0x66c   : > { %v1815_v35 = vsub.f32 %v1807_v32, %v1811_v31  ;;  %v1876_v36 = vmul.f32 %v1874_v30, %v1864_v33  ;;  %vm1868_vm15 = vcmp.ge.f32.partialorder %v1864_v33, 0.0  ;;  %v3455_v31 = vld [vmem:[%s4757_s6 + $0xc] sm:$0xf]  ;;  %v3467_v32 = vld [vmem:[%s4757_s6 + $0x1c] sm:$0xf] }
 0x66d   : > { %v1838_v38 = vsub.f32 1.5, %v1837_v34 }
 0x66e   : > { %v3702_v39 = vpop.eup %3701  ;;  %v1823_v7 = vadd.f32 1e-05, %v1815_v35  ;;  %v1880_v40 = vsel %vm1868_vm15, %v1864_v33, %v1876_v36  ;;  %v2177_v33 = vld [vmem:[%s4756_s5] sm:$0xf]  ;;  %v3472_v35 = vld [vmem:[%s4756_s5 + $0x8] sm:$0xf] }
 0x66f   : > { %v1839_v41 = vmul.f32 %v3700_v18, %v1838_v38  ;;  %v1845_v42 = vmul.f32 %v3702_v39, %v1822_v19  ;;  %3446 = vmatmul.msk.f32.vlgmr.msra.gmra.mxu0 %vm1771_vm11, %v1880_v40  ;;  %vm1851_vm5 = vweird.f32 %v3702_v39  ;;  %3471 = vmatmul.msk.bf16.vlgmr.msrb.gmra.mxu1 %vm1372_vm7, %v2177_v33  ;;  %v3463_v38 = vld [vmem:[%s4757_s6 + $0x4] sm:$0xf]  ;;  %v3480_v40 = vld [vmem:[%s4756_s5 + $0x20] sm:$0xf] }
 0x670   : > { %3703 = vrsqrt.f32 %v1823_v7  ;;  %2160 = vmatpush.bf16.msra.mxu0 %v4080_v54  ;;  %vm1852_vm12 = vmor %vm1850_vm6, %vm1851_vm5  ;;  %vm1860_vm15 = vweird.f32 %v1823_v7 }
 0x671   : > { %v1843_v3 = vsel %vm1842_vm3, %v3700_v18, %v1839_v41  ;;  %v1846_v45 = vmul.f32 %v3702_v39, %v1845_v42  ;;  %vm1956_vm3 = vcmask 261120   ;;  %v2178_v41 = vld [vmem:[%s4757_s6] sm:$0xf] }
 0x672   : > { %v1865_v46 = vmul.f32 %v1843_v3, %v1817_v44  ;;  %v3481_v42 = vld [vmem:[%s4757_s6 + $0x20] sm:$0xf]  ;;  %v3477_v44 = vld [vmem:[%s4757_s6 + $0x18] sm:$0xf]  ;;  %v1985_v3 = vpop.f32.mrf.mxu1 }
 0x673   : > { %v1847_v48 = vmul.f32 0.5, %v1846_v45 }
 0x674   : > { %v1877_v49 = vmul.f32 %v1874_v30, %v1865_v46  ;;  %vm1869_vm4 = vcmp.ge.f32.partialorder %v1865_v46, 0.0 }
 0x675   : > { %v1848_v50 = vsub.f32 1.5, %v1847_v48 }
 0x676   : > { %v3704_v51 = vpop.eup %3703  ;;  %v1881_v52 = vsel %vm1869_vm4, %v1865_v46, %v1877_v49 }
 0x677   : > { %v1849_v53 = vmul.f32 %v3702_v39, %v1848_v50  ;;  %v1855_v55 = vmul.f32 %v3704_v51, %v1823_v7  ;;  %3447 = vmatmul.msk.f32.gmra.mxu0 %vm1771_vm11, %v1881_v52  ;;  %vm1861_vm14 = vweird.f32 %v3704_v51  ;;  %v3476_v7 = vld [vmem:[%s4756_s5 + $0x18] sm:$0xf] }
 0x678   : > { %vm1862_vm1 = vmor %vm1860_vm15, %vm1861_vm14 }
 0x679   : > { %v1853_v56 = vsel %vm1852_vm12, %v3702_v39, %v1849_v53  ;;  %v1856_v57 = vmul.f32 %v3704_v51, %v1855_v55  ;;  %v3473_v39 = vld [vmem:[%s4757_s6 + $0x8] sm:$0xf] }
 0x67a   : > { %v1866_v58 = vmul.f32 %v1853_v56, %v1818_v24  ;;  %v1987_v45 = vpop.f32.mrf.mxu1 }
 0x67b   : > { %v1857_v59 = vmul.f32 0.5, %v1856_v57  ;;  %v3737_v45 = vmov 3  }
 0x67c   : > { %v1878_v60 = vmul.f32 %v1874_v30, %v1866_v58  ;;  %vm1870_vm13 = vcmp.ge.f32.partialorder %v1866_v58, 0.0  ;;  %3681 = vset.pattern.permute.xlu1 %v3737_v45 }
 0x67d   : > { %v1858_v61 = vsub.f32 1.5, %v1857_v59 }
 0x67e   : > { %v1882_v62 = vsel %vm1870_vm13, %v1866_v58, %v1878_v60 }
 0x67f   : > { %v1859_v63 = vmul.f32 %v3704_v51, %v1858_v61  ;;  %3448 = vmatmul.msk.f32.gmra.mxu0 %vm1771_vm11, %v1882_v62  ;;  %3479 = vmatmul.msk.bf16.vlgmr.msra.gmra.mxu1 %vm1372_vm7, %v3476_v7 }
 0x681   : > { %v1863_v4 = vsel %vm1862_vm1, %v3704_v51, %v1859_v63 }
 0x682   : > { %v1867_v5 = vmul.f32 %v1863_v4, %v1819_v1  ;;  %v2037_v46 = vpop.f32.mrf.mxu1 }
 0x684   : > { %v1879_v37 = vmul.f32 %v1874_v30, %v1867_v5  ;;  %vm1871_vm2 = vcmp.ge.f32.partialorder %v1867_v5, 0.0 }
 0x686   : > { %v1883_v43 = vsel %vm1871_vm2, %v1867_v5, %v1879_v37 }
 0x687   : > { %3449 = vmatmul.msk.f32.gmra.mxu0 %vm1771_vm11, %v1883_v43 }
 0x68a   : > { %v2039_v49 = vpop.f32.mrf.mxu1 }
 0x68f   : > { %3461 = vmatmul.msk.bf16.vlgmr.msrb.gmra.mxu0 %vm1372_vm7, %v3458_v6 }
 0x690   : > { %2247 = vmatpush.bf16.msrb.mxu0 %v4103_v2 }
 0x692   : > { %v2126_v51 = vpop.f32.mrf.mxu1 }
 0x69a   : > { %v2128_v56 = vpop.f32.mrf.mxu1 }
 0x69f   : > { %3469 = vmatmul.msk.bf16.vlgmr.msra.gmra.mxu0 %vm1372_vm7, %v3466_v47 }
 0x6a0   : > { %2321 = vmatpush.bf16.msra.mxu0 %v4080_v54 }
 0x6af   : > { %3475 = vmatmul.msk.bf16.vlgmr.msrb.gmra.mxu0 %vm1372_vm7, %v3472_v35 }
 0x6bf   : > { %3483 = vmatmul.msk.bf16.vlgmr.msra.gmra.mxu0 %vm1372_vm7, %v3480_v40 }
 0x6ec   : > { %v1920_v8 = vpop.f32.mrf.mxu0  ;;  %v2213_v1 = vpop.f32.mrf.mxu1 }
 0x6ed   : > { %v1932_v9 = vpack.c.bf16 %v1920_v8, %v1920_v8 }
 0x6ef   : > { %v1944_v13 = vunpack.c.l.b16 %v1932_v9 }
 0x6f4   : > { %v1923_v10 = vpop.f32.mrf.mxu0  ;;  %v2215_v47 = vpop.f32.mrf.mxu1 }
 0x6f5   : > { %v1933_v11 = vpack.c.bf16 %v1923_v10, %v1923_v10  ;;  %v3491_v47 = vld [vmem:[%s4768_s17 + $0x30] sm:$0xff] }
 0x6f7   : > { %v1945_v14 = vunpack.c.l.b16 %v1933_v11 }
 0x6f9   : > { %v1948_v15 = vpack.c.b16 %v1945_v14, %v1944_v13 }
 0x6fb   : > { %2003 = vrot.lane.b32.xlu2 %v1948_v15, %s3733_s27  ;;  %1950 = vrot.lane.b32.xlu0 %v1948_v15, %s3730_s24 }
 0x6fc   : > { %v1926_v2 = vpop.f32.mrf.mxu0 }
 0x6fd   : > { %v1934_v16 = vpack.c.bf16 %v1926_v2, %v1926_v2 }
 0x6ff   : > { %v1946_v19 = vunpack.c.l.b16 %v1934_v16  ;;  %v2286_v16 = vpop.f32.mrf.mxu1 }
 0x704   : > { %v1929_v17 = vpop.f32.mrf.mxu0 }
 0x705   : > { %v1935_v18 = vpack.c.bf16 %v1929_v17, %v1929_v17 }
 0x707   : > { %v1947_v20 = vunpack.c.l.b16 %v1935_v18 }
 0x709   : > { %v1949_v21 = vpack.c.b16 %v1947_v20, %v1946_v19 }
 0x70b   : > { %2181 = vrot.lane.b32.xlu2 %v1949_v21, %s4790_s20  ;;  %2005 = vrot.lane.b32.xlu0 %v1949_v21, %s3733_s27 }
 0x70c   : > { %1952 = vrot.lane.b32.xlu1 %v1949_v21, %s3730_s24  ;;  %v2073_v48 = vpop.f32.mrf.mxu0 }
 0x713   : > { %2092 = vrot.lane.b32.xlu0 %v1948_v15, %s4791_s21 }
 0x714   : > { %2094 = vrot.lane.b32.xlu1 %v1949_v21, %s4791_s21  ;;  %v2075_v50 = vpop.f32.mrf.mxu0  ;;  %s4792_s21 = smov 116  }
 0x71c   : > { %2179 = vrot.lane.b32.xlu1 %v1948_v15, %s4790_s20  ;;  %v2162_v52 = vpop.f32.mrf.mxu0  ;;  %s4780_s20 = smov 117  }
 0x724   : > { %v2164_v58 = vpop.f32.mrf.mxu0 }
 0x72c   : > { %v2249_v4 = vpop.f32.mrf.mxu0 }
 0x734   : > { %v2251_v9 = vpop.f32.mrf.mxu0 }
 0x73c   : > { %v2323_v17 = vpop.f32.mrf.mxu0 }
 0x755   : > { %v2004_v28 = vpop.permute.xlu2 %2003 }
 0x765   : > { %v2182_v34 = vpop.permute.xlu2 %2181 }
 0x76d   : > { %v1951_v54 = vpop.permute.xlu0 %1950 }
 0x77d   : > { %v2006_v25 = vpop.permute.xlu0 %2005 }
 0x77e   : > { %v1953_v22 = vpop.permute.xlu1 %1952 }
 0x77f   : > { %1966 = vmatpush.bf16.msrb.mxu3 %v1953_v22  ;;  %2054 = vmatpush.bf16.msra.mxu2 %v1953_v22 }
 0x783   : > { %1967 = vmatpush.bf16.msrb.mxu3 %v1951_v54  ;;  %2055 = vmatpush.bf16.msra.mxu2 %v1951_v54 }
 0x785   : > { %v2093_v30 = vpop.permute.xlu0 %2092 }
 0x786   : > { %3452 = vmatmul.msk.bf16.vlgmr.msrb.gmra.mxu3 %vm1956_vm3, %v3451_v26  ;;  %3460 = vmatmul.msk.bf16.vlgmr.msra.gmra.mxu2 %vm1956_vm3, %v3459_v27  ;;  %v2095_v29 = vpop.permute.xlu1 %2094 }
 0x787   : > { %2018 = vmatpush.bf16.msra.mxu3 %v2006_v25  ;;  %2143 = vmatpush.bf16.msrb.mxu2 %v1953_v22 }
 0x78b   : > { %2019 = vmatpush.bf16.msra.mxu3 %v2004_v28  ;;  %2144 = vmatpush.bf16.msrb.mxu2 %v1951_v54 }
 0x78e   : > { %v2180_v36 = vpop.permute.xlu1 %2179 }
 0x78f   : > { %2107 = vmatpush.bf16.msrb.mxu3 %v2095_v29  ;;  %2230 = vmatpush.bf16.msra.mxu2 %v2095_v29 }
 0x793   : > { %2108 = vmatpush.bf16.msrb.mxu3 %v2093_v30  ;;  %2231 = vmatpush.bf16.msra.mxu2 %v2093_v30 }
 0x796   : > { %3456 = vmatmul.msk.bf16.vlgmr.msra.gmra.mxu3 %vm1956_vm3, %v3455_v31  ;;  %3468 = vmatmul.msk.bf16.vlgmr.msrb.gmra.mxu2 %vm1956_vm3, %v3467_v32 }
 0x797   : > { %2194 = vmatpush.bf16.msra.mxu3 %v2182_v34  ;;  %2304 = vmatpush.bf16.msrb.mxu2 %v1953_v22 }
 0x79b   : > { %2195 = vmatpush.bf16.msra.mxu3 %v2180_v36  ;;  %2305 = vmatpush.bf16.msrb.mxu2 %v1951_v54  ;;  %v2288_v54 = vpop.f32.mrf.mxu1 }
 0x7a6   : > { %3464 = vmatmul.msk.bf16.vlgmr.msrb.gmra.mxu3 %vm1956_vm3, %v3463_v38  ;;  %3474 = vmatmul.msk.bf16.vlgmr.msra.gmra.mxu2 %vm1956_vm3, %v3473_v39 }
 0x7a7   : > { %2267 = vmatpush.bf16.msrb.mxu3 %v2006_v25  ;;  %v2325_v25 = vpop.f32.mrf.mxu0 }
 0x7ab   : > { %2268 = vmatpush.bf16.msrb.mxu3 %v2004_v28 }
 0x7b6   : > { %3470 = vmatmul.msk.bf16.vlgmr.msra.gmra.mxu3 %vm1956_vm3, %v2178_v41  ;;  %3482 = vmatmul.msk.bf16.vlgmr.msrb.gmra.mxu2 %vm1956_vm3, %v3481_v42 }
 0x7c6   : > { %3478 = vmatmul.msk.bf16.vlgmr.msrb.gmra.mxu3 %vm1956_vm3, %v3477_v44 }
 0x809   : > { %v1969_v53 = vpop.f32.mrf.mxu3  ;;  %v2057_v55 = vpop.f32.mrf.mxu2 }
 0x80a   : > { %v4292_v24 = vadd.f32 %v1985_v3, %v1969_v53  ;;  %v2074_v5 = vadd.f32 %v2073_v48, %v2057_v55  ;;  %v3707_v48 = vld [vmem:[%s4788_s25] ss:$0 sm:$0xff] }
 0x80c   : > { %v1989_v57 = vmul.f32 %v4178_v0, %v4292_v24 }
 0x80e   : > { %v1990_v59 = vsel %vm1771_vm11, %v1989_v57, 0.0  ;;  %v1994_v60 = vmul.f32 %v1989_v57, %v1989_v57 }
 0x80f   : > { %1991 = vadd.xlane.f32.xlu0 %v1990_v59 }
 0x810   : > { %v1995_v61 = vsel %vm1771_vm11, %v1994_v60, 0.0  ;;  %v3486_v60 = vld [vmem:[%s4768_s17 + $0x28] sm:$0x3f] }
 0x811   : > { %v1971_v62 = vpop.f32.mrf.mxu3  ;;  %v2059_v63 = vpop.f32.mrf.mxu2  ;;  %1996 = vadd.xlane.f32.xlu1 %v1995_v61  ;;  %3487 = vmatpush.msk.msra.mxu3 %vm1899_vm8, %v3486_v60  ;;  %v3493_v61 = vld [vmem:[%s4768_s17 + $0x40] sm:$0x3f] }
 0x812   : > { %3494 = vmatpush.msk.msrb.mxu1 %vm1899_vm8, %v3493_v61  ;;  %v3509_v60 = vld [vmem:[%s4758_s7 + $0x5] sm:$0x1]  ;;  %v2553_v61 = vld [vmem:[%s4769_s18 + $0x8] sm:$0xff] }
 0x819   : > { %v2021_v37 = vpop.f32.mrf.mxu3  ;;  %v2146_v43 = vpop.f32.mrf.mxu2 }
 0x81a   : > { %v2038_v6 = vadd.f32 %v2037_v46, %v2021_v37  ;;  %v2163_v18 = vadd.f32 %v2162_v52, %v2146_v43  ;;  %v2498_v52 = vpack.c.bf16 %v4030_v12, %v4030_v12  ;;  %v3485_v12 = vld [vmem:[%s4768_s17 + $0x20] sm:$0xff]  ;;  %v3492_v37 = vld [vmem:[%s4768_s17 + $0x38] sm:$0xff]  ;;  %v2364_v43 = vld [vmem:[%s4768_s17 + $0x10] sm:$0x3f] }
 0x81b   : > { %2394 = vmatpush.msra.mxu3 %v3485_v12  ;;  %2455 = vmatpush.msrb.mxu1 %v3492_v37  ;;  %v2555_v12 = vld [vmem:[%s4769_s18 + $0x18] sm:$0xff] }
 0x81c   : > { %v4298_v8 = vadd.f32 %v2074_v5, %v2038_v6  ;;  %v2529_v53 = vunpack.c.l.b16 %v2498_v52  ;;  %v3484_v5 = vld [vmem:[%s4768_s17 + $0x18] sm:$0xff]  ;;  %v2569_v52 = vld [vmem:[%s4769_s18 + $0x88] sm:$0xff] }
 0x81d   : > { %2395 = vmatpush.msra.mxu3 %v3484_v5  ;;  %2456 = vmatpush.msrb.mxu1 %v3491_v47  ;;  %v3528_v37 = vld [vmem:[%s4769_s18 + $0x118] sm:$0xff] }
 0x81e   : > { %v2078_v10 = vmul.f32 %v4178_v0, %v4298_v8 }
 0x81f   : > { %3489 = vmatpush.msk.msrb.mxu3 %vm1899_vm8, %v2364_v43 }
 0x820   : > { %v2079_v11 = vsel %vm1771_vm11, %v2078_v10, 0.0  ;;  %v2083_v13 = vmul.f32 %v2078_v10, %v2078_v10 }
 0x821   : > { %v2023_v14 = vpop.f32.mrf.mxu3  ;;  %2080 = vadd.xlane.f32.xlu2 %v2079_v11  ;;  %v2148_v15 = vpop.f32.mrf.mxu2 }
 0x822   : > { %v2084_v2 = vsel %vm1771_vm11, %v2083_v13, 0.0  ;;  %v2363_v13 = vld [vmem:[%s4768_s17 + $0x8] sm:$0xff]  ;;  %v2362_v14 = vld [vmem:[%s4768_s17] sm:$0xff] }
 0x823   : > { %2085 = vadd.xlane.f32.xlu0 %v2084_v2  ;;  %2420 = vmatpush.msrb.mxu3 %v2363_v13 }
 0x825   : > { %2421 = vmatpush.msrb.mxu3 %v2362_v14 }
 0x829   : > { %v2110_v19 = vpop.f32.mrf.mxu3  ;;  %v2233_v20 = vpop.f32.mrf.mxu2 }
 0x82a   : > { %v2127_v21 = vadd.f32 %v2126_v51, %v2110_v19  ;;  %v2250_v38 = vadd.f32 %v2249_v4, %v2233_v20 }
 0x82c   : > { %v4304_v22 = vadd.f32 %v2163_v18, %v2127_v21 }
 0x82e   : > { %v2167_v26 = vmul.f32 %v4178_v0, %v4304_v22 }
 0x830   : > { %v2168_v27 = vsel %vm1771_vm11, %v2167_v26, 0.0  ;;  %v2172_v28 = vmul.f32 %v2167_v26, %v2167_v26 }
 0x831   : > { %2169 = vadd.xlane.f32.xlu2 %v2168_v27  ;;  %v2112_v29 = vpop.f32.mrf.mxu3  ;;  %v2235_v30 = vpop.f32.mrf.mxu2 }
 0x832   : > { %v2173_v31 = vsel %vm1771_vm11, %v2172_v28, 0.0 }
 0x833   : > { %2174 = vadd.xlane.f32.xlu1 %v2173_v31 }
 0x839   : > { %v2197_v32 = vpop.f32.mrf.mxu3  ;;  %v2307_v33 = vpop.f32.mrf.mxu2 }
 0x83a   : > { %v2214_v36 = vadd.f32 %v2213_v1, %v2197_v32  ;;  %v2324_v41 = vadd.f32 %v2323_v17, %v2307_v33 }
 0x83c   : > { %v2253_v7 = vadd.f32 %v2250_v38, %v2214_v36 }
 0x841   : > { %v2199_v34 = vpop.f32.mrf.mxu3  ;;  %v2309_v35 = vpop.f32.mrf.mxu2 }
 0x849   : > { %v2270_v39 = vpop.f32.mrf.mxu3 }
 0x84a   : > { %v2287_v40 = vadd.f32 %v2286_v16, %v2270_v39 }
 0x84c   : > { %v2290_v42 = vadd.f32 %v2287_v40, %v2253_v7  ;;  %2357 = vperm.xlu1 %3681, %v3707_v48  }
 0x84e   : > { %v4310_v44 = vadd.f32 %v2324_v41, %v2290_v42  ;;  %v3497_v41 = vld [vmem:[%s4768_s17 + $0x50] sm:$0xff] }
 0x850   : > { %v2328_v3 = vmul.f32 %v4178_v0, %v4310_v44  ;;  %v4321_v0 = vpack.c.b16 %v2529_v53, %v2529_v53  ;;  %v2567_v53 = vld [vmem:[%s4769_s18 + $0x78] sm:$0xff] }
 0x851   : > { %v2272_v46 = vpop.f32.mrf.mxu3 }
 0x852   : > { %v2329_v49 = vsel %vm1771_vm11, %v2328_v3, 0.0  ;;  %v2333_v50 = vmul.f32 %v2328_v3, %v2328_v3 }
 0x853   : > { %2330 = vadd.xlane.f32.xlu0 %v2329_v49 }
 0x854   : > { %v2334_v51 = vsel %vm1771_vm11, %v2333_v50, 0.0 }
 0x855   : > { %2335 = vadd.xlane.f32.xlu2 %v2334_v51  ;;  %v2571_v51 = vld [vmem:[%s4769_s18 + $0x98] sm:$0x3f] }
 0x867   : > { %2531 = vrot.lane.b32.xlu0 %v4321_v0, %s4780_s20 }
 0x86f   : > { %2597 = vrot.lane.b32.xlu0 %v4321_v0, %s4792_s21 }
 0x882   : > { %v1992_v55 = vpop.xlane.xlu0 %1991 }
 0x884   : > { %v1997_v57 = vpop.xlane.xlu1 %1996 }
 0x894   : > { %v2081_v56 = vpop.xlane.xlu2 %2080 }
 0x895   : > { %v2082_v62 = vadd.f32 %v2081_v56, %v1992_v55  ;;  %v2565_v55 = vld [vmem:[%s4769_s18 + $0x68] sm:$0xff]  ;;  %v2563_v56 = vld [vmem:[%s4769_s18 + $0x58] sm:$0xff] }
 0x896   : > { %v2086_v58 = vpop.xlane.xlu0 %2085 }
 0x897   : > { %v2087_v1 = vadd.f32 %v2086_v58, %v1997_v57  ;;  %v2561_v57 = vld [vmem:[%s4769_s18 + $0x48] sm:$0xff]  ;;  %v2559_v58 = vld [vmem:[%s4769_s18 + $0x38] sm:$0xff] }
 0x8a4   : > { %v2170_v59 = vpop.xlane.xlu2 %2169 }
 0x8a5   : > { %v2171_v4 = vadd.f32 %v2170_v59, %v2082_v62  ;;  %v2557_v59 = vld [vmem:[%s4769_s18 + $0x28] sm:$0xff] }
 0x8a6   : > { %v2175_v63 = vpop.xlane.xlu1 %2174 }
 0x8a7   : > { %v2176_v9 = vadd.f32 %v2175_v63, %v2087_v1  ;;  %v3532_v1 = vld [vmem:[%s4769_s18 + $0x138] sm:$0x3f] }
 0x8be   : > { %v2358_v33 = vpop.permute.xlu1 %2357 }
 0x8c6   : > { %v2331_v6 = vpop.xlane.xlu0 %2330 }
 0x8c7   : > { %v2332_v10 = vadd.f32 %v2331_v6, %v2171_v4  ;;  %v3530_v4 = vld [vmem:[%s4769_s18 + $0x128] sm:$0xff] }
 0x8c8   : > { %v2336_v11 = vpop.xlane.xlu2 %2335  ;;  %v3526_v6 = vld [vmem:[%s4769_s18 + $0x108] sm:$0xff] }
 0x8c9   : > { %v2338_v15 = vmul.f32 %v2332_v10, %v3970_v23  ;;  %v2337_v2 = vadd.f32 %v2336_v11, %v2176_v9  ;;  %v3524_v10 = vld [vmem:[%s4769_s18 + $0xf8] sm:$0xff] }
 0x8cb   : > { %v2339_v16 = vmul.f32 %v2337_v2, %v3970_v23  ;;  %v2340_v17 = vmul.f32 %v2338_v15, %v2338_v15  ;;  %v2365_v30 = vsub.f32 %v4298_v8, %v2338_v15  ;;  %v2426_v23 = vsub.f32 %v4304_v22, %v2338_v15  ;;  %v3498_v8 = vld [vmem:[%s4768_s17 + $0x58] sm:$0x3f]  ;;  %v3522_v2 = vld [vmem:[%s4769_s18 + $0xe8] sm:$0xff] }
 0x8cc   : > { %v2353_v36 = vsub.f32 %v4292_v24, %v2338_v15  ;;  %v3496_v24 = vld [vmem:[%s4768_s17 + $0x48] sm:$0xff]  ;;  %v2462_v3 = vsub.f32 %v4310_v44, %v2338_v15  ;;  %v3501_v44 = vld [vmem:[%s4758_s7 + $0x4] sm:$0x1] }
 0x8cd   : > { %v2341_v18 = vsub.f32 %v2339_v16, %v2340_v17  ;;  %v3520_v16 = vld [vmem:[%s4769_s18 + $0xd8] sm:$0xff]  ;;  %v3518_v17 = vld [vmem:[%s4769_s18 + $0xc8] sm:$0xff] }
 0x8cf   : > { %v2342_v19 = vadd.f32 1e-05, %v2341_v18  ;;  %v3514_v18 = vld [vmem:[%s4769_s18 + $0xa8] sm:$0xff] }
 0x8d1   : > { %3705 = vrsqrt.f32 %v2342_v19  ;;  %vm2349_vm4 = vweird.f32 %v2342_v19 }
 0x8d7   : > { %v3706_v20 = vpop.eup %3705 }
 0x8d8   : > { %v2344_v21 = vmul.f32 %v3706_v20, %v2342_v19  ;;  %vm2350_vm7 = vweird.f32 %v3706_v20  ;;  %v3505_v19 = vld [vmem:[%s4758_s7 + $0x3] sm:$0x1] }
 0x8d9   : > { %v2532_v54 = vpop.permute.xlu0 %2531  ;;  %vm2351_vm5 = vmor %vm2349_vm4, %vm2350_vm7 }
 0x8da   : > { %v2345_v25 = vmul.f32 %v3706_v20, %v2344_v21  ;;  %v4380_v48 = vsel %vm968_vm9, %v2532_v54, 0  ;;  %v3502_v54 = vld [vmem:[%s4759_s8 + $0x4] sm:$0x1] }
 0x8dc   : > { %v2346_v26 = vmul.f32 0.5, %v2345_v25  ;;  %v2570_v25 = vld [vmem:[%s4769_s18 + $0x90] sm:$0x3f] }
 0x8de   : > { %v2347_v27 = vsub.f32 1.5, %v2346_v26  ;;  %v2568_v26 = vld [vmem:[%s4769_s18 + $0x80] sm:$0xff] }
 0x8e0   : > { %v2348_v28 = vmul.f32 %v3706_v20, %v2347_v27  ;;  %v2566_v27 = vld [vmem:[%s4769_s18 + $0x70] sm:$0xff] }
 0x8e1   : > { %v2598_v29 = vpop.permute.xlu0 %2597 }
 0x8e2   : > { %v2352_v31 = vsel %vm2351_vm5, %v3706_v20, %v2348_v28  ;;  %v4362_v32 = vsel %vm968_vm9, %v2598_v29, 0 }
 0x8e3   : > { %2612 = vmatpush.bf16.msra.mxu2 %v4362_v32  ;;  %v2366_v34 = vmul.f32 %v2365_v30, %v2352_v31  ;;  %v2427_v35 = vmul.f32 %v2426_v23, %v2352_v31  ;;  %v2354_v22 = vmul.f32 %v2353_v36, %v2352_v31  ;;  %v2463_v45 = vmul.f32 %v2462_v3, %v2352_v31  ;;  %v2564_v30 = vld [vmem:[%s4769_s18 + $0x60] sm:$0xff]  ;;  %v2562_v23 = vld [vmem:[%s4769_s18 + $0x50] sm:$0xff] }
 0x8e4   : > { %v2560_v31 = vld [vmem:[%s4769_s18 + $0x40] sm:$0xff]  ;;  %v2554_v36 = vld [vmem:[%s4769_s18 + $0x10] sm:$0xff] }
 0x8e5   : > { %v2368_v38 = vmul.f32 %v2366_v34, %v2358_v33  ;;  %v2429_v39 = vmul.f32 %v2427_v35, %v2358_v33  ;;  %vm2367_vm6 = vcmp.ge.f32.partialorder %v2366_v34, 0.0  ;;  %vm2428_vm12 = vcmp.ge.f32.partialorder %v2427_v35, 0.0  ;;  %v3521_v3 = vld [vmem:[%s4769_s18 + $0xe0] sm:$0xff] }
 0x8e6   : > { %v2360_v42 = vmul.f32 %v2358_v33, %v2354_v22  ;;  %vm2355_vm13 = vcmp.ge.f32.partialorder %v2354_v22, 0.0  ;;  %v2465_v49 = vmul.f32 %v2463_v45, %v2358_v33  ;;  %vm2464_vm14 = vcmp.ge.f32.partialorder %v2463_v45, 0.0  ;;  %3508 = vmatmul.msk.bf16.vlgmr.msra.gmra.mxu2 %vm964_vm10, %v3505_v19  ;;  %v2558_v33 = vld [vmem:[%s4769_s18 + $0x30] sm:$0xff]  ;;  %v3558_v19 = vld [vmem:[%s4769_s18 + $0x188] sm:$0xff] }
 0x8e7   : > { %v2369_v7 = vsel %vm2367_vm6, %v2366_v34, %v2368_v38  ;;  %v2430_v40 = vsel %vm2428_vm12, %v2427_v35, %v2429_v39  ;;  %3535 = vmatpush.msk.msrb.mxu2 %vm1899_vm8, %v3532_v1  ;;  %v2556_v34 = vld [vmem:[%s4769_s18 + $0x20] sm:$0xff] }
 0x8e8   : > { %3488 = vmatmul.msk.f32.vlgmr.msra.gmra.mxu3 %vm1771_vm11, %v2369_v7  ;;  %3495 = vmatmul.msk.f32.vlgmr.msrb.gmra.mxu1 %vm1771_vm11, %v2430_v40  ;;  %v2361_v46 = vsel %vm2355_vm13, %v2354_v22, %v2360_v42  ;;  %v2466_v50 = vsel %vm2464_vm14, %v2463_v45, %v2465_v49  ;;  %v3510_v35 = vld [vmem:[%s4759_s8 + $0x5] sm:$0x1]  ;;  %v3506_v7 = vld [vmem:[%s4759_s8 + $0x3] sm:$0x1]  ;;  %v3523_v42 = vld [vmem:[%s4769_s18 + $0xf0] sm:$0xff] }
 0x8e9   : > { %3499 = vmatpush.msk.msra.mxu3 %vm1899_vm8, %v3498_v8  ;;  %2713 = vmatpush.msrb.mxu2 %v3530_v4  ;;  %v2552_v38 = vld [vmem:[%s4769_s18] sm:$0xff]  ;;  %v3531_v8 = vld [vmem:[%s4769_s18 + $0x130] sm:$0x3f] }
 0x8ea   : > { %v3529_v40 = vld [vmem:[%s4769_s18 + $0x120] sm:$0xff]  ;;  %v3519_v45 = vld [vmem:[%s4769_s18 + $0xd0] sm:$0xff] }
 0x8eb   : > { %2491 = vmatpush.msra.mxu3 %v3497_v41  ;;  %2714 = vmatpush.msrb.mxu2 %v3528_v37  ;;  %v3527_v41 = vld [vmem:[%s4769_s18 + $0x110] sm:$0xff] }
 0x8ec   : > { %v3515_v49 = vld [vmem:[%s4769_s18 + $0xb0] sm:$0xff] }
 0x8ed   : > { %2492 = vmatpush.msra.mxu3 %v3496_v24  ;;  %2715 = vmatpush.msrb.mxu2 %v3526_v6  ;;  %v3525_v24 = vld [vmem:[%s4769_s18 + $0x100] sm:$0xff]  ;;  %v3567_v6 = vld [vmem:[%s4769_s18 + $0x1d0] sm:$0x3f] }
 0x8ef   : > { %2716 = vmatpush.msrb.mxu2 %v3524_v10  ;;  %v3563_v10 = vld [vmem:[%s4769_s18 + $0x1b0] sm:$0xff] }
 0x8f0   : > { %3490 = vmatmul.msk.f32.vlgmr.msrb.gmra.mxu3 %vm1771_vm11, %v2361_v46  ;;  %v3517_v46 = vld [vmem:[%s4769_s18 + $0xc0] sm:$0xff] }
 0x8f1   : > { %2546 = vmatpush.bf16.msrb.mxu3 %v4380_v48  ;;  %2717 = vmatpush.msrb.mxu2 %v3522_v2  ;;  %v3541_v2 = vld [vmem:[%s4758_s7 + $0x1] sm:$0x1] }
 0x8f3   : > { %2718 = vmatpush.msrb.mxu2 %v3520_v16  ;;  %v3542_v16 = vld [vmem:[%s4759_s8 + $0x1] sm:$0x1] }
 0x8f5   : > { %2719 = vmatpush.msrb.mxu2 %v3518_v17  ;;  %v3559_v17 = vld [vmem:[%s4769_s18 + $0x190] sm:$0xff] }
 0x8f8   : > { %3500 = vmatmul.msk.f32.vlgmr.msra.gmra.mxu3 %vm1771_vm11, %v2466_v50  ;;  %vm2676_vm11 = vcmask 637952  }
 0x8f9   : > { %2648 = vmatpush.bf16.msra.mxu3 %v4380_v48 }
 0x900   : > { %3504 = vmatmul.msk.bf16.vlgmr.msrb.gmra.mxu3 %vm964_vm10, %v3501_v44  ;;  %v3513_v44 = vld [vmem:[%s4769_s18 + $0xa0] sm:$0xff] }
 0x901   : > { %3539 = vmatpush.msk.msrb.mxu3 %vm1899_vm8, %v2571_v51 }
 0x903   : > { %2762 = vmatpush.msrb.mxu3 %v2569_v52 }
 0x905   : > { %2763 = vmatpush.msrb.mxu3 %v2567_v53 }
 0x907   : > { %2764 = vmatpush.msrb.mxu3 %v2565_v55 }
 0x909   : > { %2765 = vmatpush.msrb.mxu3 %v2563_v56 }
 0x90b   : > { %2766 = vmatpush.msrb.mxu3 %v2561_v57 }
 0x90d   : > { %2767 = vmatpush.msrb.mxu3 %v2559_v58 }
 0x90f   : > { %2768 = vmatpush.msrb.mxu3 %v2557_v59 }
 0x910   : > { %3512 = vmatmul.msk.bf16.vlgmr.msra.gmra.mxu3 %vm964_vm10, %v3509_v60 }
 0x911   : > { %2769 = vmatpush.msrb.mxu3 %v2555_v12  ;;  %v3546_v12 = vld [vmem:[%s4759_s8 + $0x7] sm:$0x1] }
 0x913   : > { %2770 = vmatpush.msrb.mxu3 %v2553_v61  ;;  %v3545_v61 = vld [vmem:[%s4758_s7 + $0x7] sm:$0x1] }
 0x915   : > { %2851 = vmatpush.bf16.msra.mxu3 %v4380_v48 }
 0x965   : > { %v2458_v43 = vpop.f32.mrf.mxu1 }
 0x969   : > { %v2614_v55 = vpop.f32.mrf.mxu2 }
 0x96b   : > { %v2397_v62 = vpop.f32.mrf.mxu3 }
 0x971   : > { %v2616_v57 = vpop.f32.mrf.mxu2 }
 0x972   : > { %v2931_v57 = vld [vmem:[%s4759_s8] sm:$0x1] }
 0x973   : > { %v2423_v63 = vpop.f32.mrf.mxu3 }
 0x974   : > { %v2424_v5 = vadd.f32 %v2423_v63, %v2397_v62 }
 0x976   : > { %v2461_v47 = vadd.f32 %v2458_v43, %v2424_v5 }
 0x97b   : > { %v2494_v9 = vpop.f32.mrf.mxu3 }
 0x97c   : > { %v2497_v11 = vadd.f32 %v2494_v9, %v2461_v47  ;;  %v3568_v47 = vld [vmem:[%s4769_s18 + $0x1d8] sm:$0x3f]  ;;  %v3566_v9 = vld [vmem:[%s4769_s18 + $0x1c8] sm:$0xff] }
 0x97e   : > { %v2499_v13 = vpack.c.bf16 %v2497_v11, %v2497_v11  ;;  %v3564_v11 = vld [vmem:[%s4769_s18 + $0x1b8] sm:$0xff] }
 0x980   : > { %v2505_v14 = vunpack.c.l.b16 %v2499_v13 }
 0x982   : > { %v2506_v15 = vpack.c.b16 %v2505_v14, %v2505_v14  ;;  %v3561_v14 = vld [vmem:[%s4769_s18 + $0x1a0] sm:$0xff] }
 0x983   : > { %v2548_v52 = vpop.f32.mrf.mxu3 }
 0x984   : > { %2779 = vrot.lane.b32.xlu0 %v2506_v15, %s3739_s1  ;;  %2576 = vrot.lane.b32.xlu1 %v2506_v15, %s4792_s21 }
 0x985   : > { %2507 = vrot.lane.b32.xlu2 %v2506_v15, %s4793_s29 }
 0x98b   : > { %v2550_v53 = vpop.f32.mrf.mxu3 }
 0x98c   : > { %2953 = vrot.lane.b32.xlu1 %v4321_v0, %s3740_s26 }
 0x98d   : > { %2800 = vrot.lane.b32.xlu2 %v4321_v0, %s3739_s1  ;;  %v3516_v0 = vld [vmem:[%s4769_s18 + $0xb8] sm:$0xff] }
 0x98e   : > { %2720 = vmatpush.msrb.mxu2 %v3516_v0  ;;  %v3560_v0 = vld [vmem:[%s4769_s18 + $0x198] sm:$0xff] }
 0x990   : > { %2721 = vmatpush.msrb.mxu2 %v3514_v18  ;;  %v3557_v18 = vld [vmem:[%s4769_s18 + $0x180] sm:$0xff] }
 0x993   : > { %v2650_v56 = vpop.f32.mrf.mxu3 }
 0x995   : > { %2932 = vrot.lane.b32.xlu2 %v2506_v15, %s3740_s26  ;;  %v3562_v15 = vld [vmem:[%s4769_s18 + $0x1a8] sm:$0xff]  ;;  %s3614_s26 = sshll.u32 %s4795_s30, 2 }
 0x996   : > { %s602_s23 = scalar_lea.vmem %s4770_s19, %s3614_s26 }
 0x99b   : > { %v2652_v58 = vpop.f32.mrf.mxu3 }
 0x99c   : > { %v3579_v58 = vld [vmem:[%s4758_s7 + $0x6] sm:$0x1] }
 0x9df   : > { %v2508_v20 = vpop.permute.xlu2 %2507 }
 0x9e0   : > { %v4466_v21 = vsel %vm968_vm9, %v2508_v20, 0  ;;  %v3555_v20 = vld [vmem:[%s4769_s18 + $0x170] sm:$0xff] }
 0x9e1   : > { %2522 = vmatpush.bf16.msrb.mxu0 %v4466_v21 }
 0x9e4   : > { %3503 = vmatmul.msk.bf16.vlgmr.msrb.gmra.mxu0 %vm964_vm10, %v3502_v54  ;;  %v3553_v54 = vld [vmem:[%s4769_s18 + $0x160] sm:$0xff] }
 0x9e5   : > { %2632 = vmatpush.bf16.msra.mxu0 %v4466_v21 }
 0x9e7   : > { %v2801_v28 = vpop.permute.xlu2 %2800 }
 0x9e8   : > { %v2806_v29 = vsel %vm968_vm9, %v2801_v28, 0 }
 0x9e9   : > { %3537 = vmatpush.msk.msrb.mxu0 %vm1899_vm8, %v2570_v25  ;;  %2815 = vmatpush.bf16.msra.mxu2 %v2806_v29  ;;  %v3554_v25 = vld [vmem:[%s4769_s18 + $0x168] sm:$0xff] }
 0x9eb   : > { %2742 = vmatpush.msrb.mxu0 %v2568_v26  ;;  %v3551_v26 = vld [vmem:[%s4769_s18 + $0x150] sm:$0xff] }
 0x9ed   : > { %2743 = vmatpush.msrb.mxu0 %v2566_v27  ;;  %v3552_v27 = vld [vmem:[%s4769_s18 + $0x158] sm:$0xff] }
 0x9ef   : > { %2744 = vmatpush.msrb.mxu0 %v2564_v30  ;;  %v2933_v28 = vpop.permute.xlu2 %2932  ;;  %v3549_v30 = vld [vmem:[%s4769_s18 + $0x140] sm:$0xff] }
 0x9f1   : > { %2745 = vmatpush.msrb.mxu0 %v2562_v23  ;;  %v3550_v23 = vld [vmem:[%s4769_s18 + $0x148] sm:$0xff] }
 0x9f3   : > { %2746 = vmatpush.msrb.mxu0 %v2560_v31  ;;  %v2938_v31 = vsel %vm968_vm9, %v2933_v28, 0 }
 0x9f4   : > { %3511 = vmatmul.msk.bf16.vlgmr.msra.gmra.mxu0 %vm964_vm10, %v3510_v35 }
 0x9f5   : > { %2747 = vmatpush.msrb.mxu0 %v2558_v33 }
 0x9f6   : > { %v2577_v39 = vpop.permute.xlu1 %2576  ;;  %v2780_v50 = vpop.permute.xlu0 %2779 }
 0x9f7   : > { %2748 = vmatpush.msrb.mxu0 %v2556_v34  ;;  %v4514_v22 = vsel %vm968_vm9, %v2577_v39, 0  ;;  %v2785_v51 = vsel %vm968_vm9, %v2780_v50, 0  ;;  %v3575_v39 = vld [vmem:[%s4758_s7 + $0x2] sm:$0x1] }
 0x9f8   : > { %2591 = vmatpush.bf16.msra.mxu1 %v4514_v22 }
 0x9f9   : > { %2749 = vmatpush.msrb.mxu0 %v2554_v36 }
 0x9fb   : > { %2750 = vmatpush.msrb.mxu0 %v2552_v38  ;;  %3507 = vmatmul.msk.bf16.vlgmr.msra.gmra.mxu1 %vm964_vm10, %v3506_v7  ;;  %v3576_v7 = vld [vmem:[%s4759_s8 + $0x2] sm:$0x1] }
 0x9fc   : > { %3533 = vmatpush.msk.msrb.mxu1 %vm1899_vm8, %v3531_v8 }
 0x9fd   : > { %2835 = vmatpush.bf16.msra.mxu0 %v4466_v21 }
 0x9fe   : > { %2693 = vmatpush.msrb.mxu1 %v3529_v40 }
 0xa00   : > { %2694 = vmatpush.msrb.mxu1 %v3527_v41 }
 0xa02   : > { %2695 = vmatpush.msrb.mxu1 %v3525_v24 }
 0xa04   : > { %2696 = vmatpush.msrb.mxu1 %v3523_v42 }
 0xa06   : > { %2697 = vmatpush.msrb.mxu1 %v3521_v3  ;;  %v3583_v3 = vld [vmem:[%s4758_s7 + $0x8] sm:$0x1] }
 0xa08   : > { %2698 = vmatpush.msrb.mxu1 %v3519_v45 }
 0xa0a   : > { %2699 = vmatpush.msrb.mxu1 %v3517_v46 }
 0xa0c   : > { %2700 = vmatpush.msrb.mxu1 %v3515_v49  ;;  %v3584_v49 = vld [vmem:[%s4759_s8 + $0x8] sm:$0x1] }
 0xa0e   : > { %2701 = vmatpush.msrb.mxu1 %v3513_v44 }
 0xa10   : > { %2794 = vmatpush.bf16.msra.mxu1 %v2785_v51 }
 0xa61   : > { %v2524_v59 = vpop.f32.mrf.mxu0 }
 0xa62   : > { %v2549_v60 = vadd.f32 %v2548_v52, %v2524_v59 }
 0xa64   : > { %3538 = vmatmul.msk.f32.vlgmr.msrb.gmra.mxu0 %vm2676_vm11, %v2549_v60  ;;  %3540 = vmatmul.msk.f32.vlgmr.msrb.gmra.mxu3 %vm2676_vm11, %v2549_v60  ;;  %v3605_v60 = vld [vmem:[%s4769_s18 + $0x270] sm:$0x3f] }
 0xa65   : > { %2988 = vmatpush.bf16.msrb.mxu0 %v2785_v51  ;;  %3004 = vmatpush.bf16.msrb.mxu3 %v2806_v29  ;;  %v2954_v29 = vpop.permute.xlu1 %2953 }
 0xa66   : > { %v2959_v33 = vsel %vm968_vm9, %v2954_v29, 0 }
 0xa69   : > { %v2526_v62 = vpop.f32.mrf.mxu0 }
 0xa6a   : > { %v3604_v62 = vld [vmem:[%s4769_s18 + $0x268] sm:$0xff] }
 0xa6c   : > { %3547 = vmatmul.msk.bf16.vlgmr.msra.gmra.mxu0 %vm964_vm10, %v3546_v12  ;;  %3548 = vmatmul.msk.bf16.vlgmr.msra.gmra.mxu3 %vm964_vm10, %v3545_v61  ;;  %v3606_v12 = vld [vmem:[%s4769_s18 + $0x278] sm:$0x3f]  ;;  %v3603_v61 = vld [vmem:[%s4769_s18 + $0x260] sm:$0xff] }
 0xa6d   : > { %3062 = vmatpush.bf16.msra.mxu0 %v4466_v21  ;;  %3078 = vmatpush.bf16.msra.mxu3 %v4380_v48  ;;  %v3565_v48 = vld [vmem:[%s4769_s18 + $0x1c0] sm:$0xff]  ;;  %v3556_v21 = vld [vmem:[%s4769_s18 + $0x178] sm:$0xff] }
 0xa71   : > { %v2634_v63 = vpop.f32.mrf.mxu0 }
 0xa72   : > { %v2651_v1 = vadd.f32 %v2650_v56, %v2634_v63  ;;  %v2930_v56 = vld [vmem:[%s4758_s7] sm:$0x1] }
 0xa78   : > { %v2593_v4 = vpop.f32.mrf.mxu1 }
 0xa79   : > { %v2615_v5 = vadd.f32 %v2614_v55, %v2593_v4  ;;  %v2636_v37 = vpop.f32.mrf.mxu0  ;;  %v3601_v4 = vld [vmem:[%s4769_s18 + $0x250] sm:$0xff] }
 0xa7a   : > { %v3599_v37 = vld [vmem:[%s4769_s18 + $0x240] sm:$0xff] }
 0xa7b   : > { %v2654_v43 = vadd.f32 %v2651_v1, %v2615_v5  ;;  %v3602_v5 = vld [vmem:[%s4769_s18 + $0x258] sm:$0xff] }
 0xa7c   : > { %3578 = vmatmul.msk.bf16.vlgmr.msrb.gmra.mxu3 %vm964_vm10, %v3575_v39  ;;  %3577 = vmatmul.msk.bf16.vlgmr.msrb.gmra.mxu0 %vm964_vm10, %v3576_v7 }
 0xa7d   : > { %3534 = vmatmul.msk.f32.vlgmr.msrb.gmra.mxu1 %vm2676_vm11, %v2654_v43  ;;  %3536 = vmatmul.msk.f32.vlgmr.msrb.gmra.mxu2 %vm2676_vm11, %v2654_v43  ;;  %v3600_v43 = vld [vmem:[%s4769_s18 + $0x248] sm:$0xff] }
 0xa7e   : > { %3569 = vmatpush.msk.msrb.mxu1 %vm1899_vm8, %v3567_v6  ;;  %3571 = vmatpush.msk.msrb.mxu2 %vm1899_vm8, %v3568_v47  ;;  %v3597_v6 = vld [vmem:[%s4769_s18 + $0x230] sm:$0xff]  ;;  %v3598_v47 = vld [vmem:[%s4769_s18 + $0x238] sm:$0xff] }
 0xa80   : > { %2895 = vmatpush.msrb.mxu1 %v3565_v48  ;;  %2915 = vmatpush.msrb.mxu2 %v3566_v9  ;;  %v2595_v13 = vpop.f32.mrf.mxu1  ;;  %v3595_v48 = vld [vmem:[%s4769_s18 + $0x220] sm:$0xff]  ;;  %v3596_v9 = vld [vmem:[%s4769_s18 + $0x228] sm:$0xff] }
 0xa81   : > { %v3593_v13 = vld [vmem:[%s4769_s18 + $0x210] sm:$0xff] }
 0xa82   : > { %2896 = vmatpush.msrb.mxu1 %v3563_v10  ;;  %2916 = vmatpush.msrb.mxu2 %v3564_v11 }
 0xa84   : > { %2897 = vmatpush.msrb.mxu1 %v3561_v14  ;;  %2917 = vmatpush.msrb.mxu2 %v3562_v15  ;;  %v3594_v14 = vld [vmem:[%s4769_s18 + $0x218] sm:$0xff] }
 0xa85   : > { %3544 = vmatmul.msk.bf16.vlgmr.msra.gmra.mxu2 %vm964_vm10, %v3541_v2  ;;  %3543 = vmatmul.msk.bf16.vlgmr.msra.gmra.mxu1 %vm964_vm10, %v3542_v16  ;;  %v3591_v16 = vld [vmem:[%s4769_s18 + $0x200] sm:$0xff] }
 0xa86   : > { %2898 = vmatpush.msrb.mxu1 %v3559_v17  ;;  %2918 = vmatpush.msrb.mxu2 %v3560_v0  ;;  %v3592_v17 = vld [vmem:[%s4769_s18 + $0x208] sm:$0xff] }
 0xa88   : > { %2899 = vmatpush.msrb.mxu1 %v3557_v18  ;;  %2919 = vmatpush.msrb.mxu2 %v3558_v19  ;;  %v3589_v19 = vld [vmem:[%s4769_s18 + $0x1f0] sm:$0xff] }
 0xa8a   : > { %2900 = vmatpush.msrb.mxu1 %v3555_v20  ;;  %2920 = vmatpush.msrb.mxu2 %v3556_v21  ;;  %v3590_v20 = vld [vmem:[%s4769_s18 + $0x1f8] sm:$0xff]  ;;  %v3587_v21 = vld [vmem:[%s4769_s18 + $0x1e0] sm:$0xff] }
 0xa8c   : > { %2901 = vmatpush.msrb.mxu1 %v3553_v54  ;;  %2921 = vmatpush.msrb.mxu2 %v3554_v25  ;;  %v3588_v54 = vld [vmem:[%s4769_s18 + $0x1e8] sm:$0xff]  ;;  %v3157_v25 = vld [vmem:[%s4760_s9] sm:$0x3] }
 0xa8d   : > { %3586 = vmatmul.msk.bf16.vlgmr.msra.gmra.mxu3 %vm964_vm10, %v3583_v3  ;;  %3585 = vmatmul.msk.bf16.vlgmr.msra.gmra.mxu0 %vm964_vm10, %v3584_v49 }
 0xa8e   : > { %2902 = vmatpush.msrb.mxu1 %v3551_v26  ;;  %2922 = vmatpush.msrb.mxu2 %v3552_v27 }
 0xa8f   : > { %3160 = vperm.xlu0 %3682, %v3157_v25  }
 0xa90   : > { %2903 = vmatpush.msrb.mxu1 %v3549_v30  ;;  %2923 = vmatpush.msrb.mxu2 %v3550_v23 }
 0xa92   : > { %2947 = vmatpush.bf16.msra.mxu1 %v2938_v31  ;;  %2968 = vmatpush.bf16.msra.mxu2 %v2959_v33 }
 0xae1   : > { %v2752_v34 = vpop.f32.mrf.mxu0 }
 0xae7   : > { %v2772_v35 = vpop.f32.mrf.mxu3 }
 0xae9   : > { %v2837_v36 = vpop.f32.mrf.mxu0 }
 0xaef   : > { %v2853_v38 = vpop.f32.mrf.mxu3 }
 0xaf0   : > { %v2854_v50 = vadd.f32 %v2853_v38, %v2837_v36 }
 0xaf1   : > { %v2839_v8 = vpop.f32.mrf.mxu0 }
 0xaf7   : > { %v2855_v40 = vpop.f32.mrf.mxu3 }
 0xafa   : > { %v2703_v41 = vpop.f32.mrf.mxu1 }
 0xafb   : > { %v2753_v24 = vadd.f32 %v2752_v34, %v2703_v41 }
 0xaff   : > { %v3006_v59 = vpop.f32.mrf.mxu3 }
 0xb00   : > { %v2723_v42 = vpop.f32.mrf.mxu2 }
 0xb01   : > { %v4648_v45 = vadd.f32 %v2772_v35, %v2723_v42 }
 0xb02   : > { %v2796_v46 = vpop.f32.mrf.mxu1 }
 0xb07   : > { %v3008_v1 = vpop.f32.mrf.mxu3 }
 0xb08   : > { %v2817_v44 = vpop.f32.mrf.mxu2 }
 0xb09   : > { %v2818_v51 = vadd.f32 %v2817_v44, %v2796_v46  ;;  %v3161_v46 = vpop.permute.xlu0 %3160 }
 0xb0a   : > { %v2798_v52 = vpop.f32.mrf.mxu1 }
 0xb0b   : > { %v2857_v53 = vadd.f32 %v2854_v50, %v2818_v51 }
 0xb0d   : > { %3570 = vmatmul.msk.f32.vlgmr.msrb.gmra.mxu1 %vm2676_vm11, %v2857_v53  ;;  %3572 = vmatmul.msk.f32.vlgmr.msrb.gmra.mxu2 %vm2676_vm11, %v2857_v53 }
 0xb0e   : > { %3025 = vmatpush.bf16.msrb.mxu1 %v4514_v22  ;;  %3041 = vmatpush.bf16.msrb.mxu2 %v4362_v32  ;;  %v3580_v32 = vld [vmem:[%s4759_s8 + $0x6] sm:$0x1]  ;;  %v2990_v22 = vpop.f32.mrf.mxu0 }
 0xb0f   : > { %v3007_v34 = vadd.f32 %v3006_v59, %v2990_v22 }
 0xb10   : > { %v2819_v55 = vpop.f32.mrf.mxu2  ;;  %v3080_v11 = vpop.f32.mrf.mxu3 }
 0xb15   : > { %3574 = vmatmul.msk.bf16.vlgmr.msra.gmra.mxu2 %vm964_vm10, %v2930_v56  ;;  %3573 = vmatmul.msk.bf16.vlgmr.msra.gmra.mxu1 %vm964_vm10, %v2931_v57 }
 0xb16   : > { %3607 = vmatpush.msk.msra.mxu1 %vm1899_vm8, %v3605_v60  ;;  %3609 = vmatpush.msk.msra.mxu2 %vm1899_vm8, %v3606_v12  ;;  %v2992_v63 = vpop.f32.mrf.mxu0 }
 0xb18   : > { %3122 = vmatpush.msra.mxu1 %v3603_v61  ;;  %3142 = vmatpush.msra.mxu2 %v3604_v62  ;;  %v3082_v18 = vpop.f32.mrf.mxu3 }
 0xb1a   : > { %3123 = vmatpush.msra.mxu1 %v3601_v4  ;;  %3143 = vmatpush.msra.mxu2 %v3602_v5 }
 0xb1c   : > { %3124 = vmatpush.msra.mxu1 %v3599_v37  ;;  %3144 = vmatpush.msra.mxu2 %v3600_v43 }
 0xb1e   : > { %v3064_v10 = vpop.f32.mrf.mxu0  ;;  %3125 = vmatpush.msra.mxu1 %v3597_v6  ;;  %3145 = vmatpush.msra.mxu2 %v3598_v47 }
 0xb1f   : > { %v3081_v39 = vadd.f32 %v3080_v11, %v3064_v10 }
 0xb20   : > { %3126 = vmatpush.msra.mxu1 %v3595_v48  ;;  %3146 = vmatpush.msra.mxu2 %v3596_v9 }
 0xb22   : > { %3127 = vmatpush.msra.mxu1 %v3593_v13  ;;  %3147 = vmatpush.msra.mxu2 %v3594_v14 }
 0xb24   : > { %3128 = vmatpush.msra.mxu1 %v3591_v16  ;;  %3148 = vmatpush.msra.mxu2 %v3592_v17 }
 0xb25   : > { %3582 = vmatmul.msk.bf16.vlgmr.msrb.gmra.mxu2 %vm964_vm10, %v3579_v58  ;;  %3581 = vmatmul.msk.bf16.vlgmr.msrb.gmra.mxu1 %vm964_vm10, %v3580_v32 }
 0xb26   : > { %v3066_v0 = vpop.f32.mrf.mxu0  ;;  %3129 = vmatpush.msra.mxu1 %v3589_v19  ;;  %3149 = vmatpush.msra.mxu2 %v3590_v20 }
 0xb28   : > { %3130 = vmatpush.msra.mxu1 %v3587_v21  ;;  %3150 = vmatpush.msra.mxu2 %v3588_v54 }
 0xb8a   : > { %v2905_v15 = vpop.f32.mrf.mxu1 }
 0xb8b   : > { %v2928_v2 = vadd.f32 %v2905_v15, %v2753_v24 }
 0xb90   : > { %v2925_v26 = vpop.f32.mrf.mxu2 }
 0xb91   : > { %v2929_v27 = vadd.f32 %v2925_v26, %v4648_v45 }
 0xb92   : > { %v2949_v28 = vpop.f32.mrf.mxu1 }
 0xb98   : > { %v2970_v29 = vpop.f32.mrf.mxu2 }
 0xb99   : > { %v2971_v33 = vadd.f32 %v2970_v29, %v2949_v28 }
 0xb9a   : > { %v2951_v30 = vpop.f32.mrf.mxu1 }
 0xb9b   : > { %v3010_v36 = vadd.f32 %v3007_v34, %v2971_v33 }
 0xba0   : > { %v2972_v23 = vpop.f32.mrf.mxu2 }
 0xba2   : > { %v3027_v31 = vpop.f32.mrf.mxu1 }
 0xba8   : > { %v3043_v35 = vpop.f32.mrf.mxu2 }
 0xba9   : > { %v3044_v38 = vadd.f32 %v3043_v35, %v3027_v31 }
 0xbaa   : > { %v3029_v8 = vpop.f32.mrf.mxu1 }
 0xbab   : > { %v3047_v7 = vadd.f32 %v3044_v38, %v3010_v36 }
 0xbad   : > { %v3084_v40 = vadd.f32 %v3081_v39, %v3047_v7 }
 0xbaf   : > { %3608 = vmatmul.msk.f32.vlgmr.msra.gmra.mxu1 %vm2676_vm11, %v3084_v40  ;;  %3610 = vmatmul.msk.f32.vlgmr.msra.gmra.mxu2 %vm2676_vm11, %v3084_v40 }
 0xbb0   : > { %v3045_v41 = vpop.f32.mrf.mxu2 }
 0xc2c   : > { %v3132_v24 = vpop.f32.mrf.mxu1 }
 0xc2d   : > { %v3155_v3 = vadd.f32 %v3132_v24, %v2928_v2 }
 0xc2f   : > { %v3163_v50 = vadd.f32 %v3161_v46, %v3155_v3 }
 0xc32   : > { %v3152_v42 = vpop.f32.mrf.mxu2 }
 0xc33   : > { %v3156_v45 = vadd.f32 %v3152_v42, %v2929_v27 }
 0xc35   : > { %v3164_v49 = vadd.f32 %v3161_v46, %v3156_v45 }
 0xc37   : > { %v3167_v44 = vrot.slane %v3164_v49, 6 }
 0xc39   : > { %v3168_v51 = vsel %vm618_vm0, %v3163_v50, %v3167_v44 }
 0xc3a   : > { %3170 = vst [vmem:[%s602_s23] sm:$0xf] %v3168_v51 }
 0xc3b PF: > { %s29_s0 = sadd.s32 1, %s3714_s0  }
 0xc3c   : > { %p26_p4 = scmp.ge.s32.totalorder %s29_s0, 4  }
 0xc3e   :  { %28 = sbr.rel (!%p26_p4) target bundleno = 5 (0x5), region = 191 }

</bundles_post_ra>
